<compile_context>
chip_gen: v6e
topology: v6e:2x2x1
jax: 0.10.0
libtpu: 0.0.40
codegen_flags: <defaults>
</compile_context>

<pallas_src>
import jax
import jax.numpy as jnp
from jax.experimental import pallas as pl
from jax.experimental.pallas import tpu as pltpu

NEG_SLOPE = 0.01   # PyTorch LeakyReLU default negative_slope
BN_EPS = 1e-5      # PyTorch BatchNorm1d default eps

C = 32                       # channels of every conv layer
K1, K2, K3 = 4, 6, 4         # kernel sizes
D1, D2, D3 = 1, 2, 1         # dilations
S = 3                        # stride of every conv
S_TOT = S * S * S            # 27: total downsampling of the conv stack
N_OUT = 20                   # fc output features
L3 = 147                     # conv-stack output length for L_in = 4005
W_PAD = 160                  # padded per-batch column width (>= L3)
K1P = 8                      # conv1 contraction depth (4 taps + ones + pad)

# phase bookkeeping (extended phases => only full-row, shift-free reads in-kernel)
N_PH2 = K3                                      # 4  : conv3 reads y2 phase p = k
N_PH1 = S * (N_PH2 - 1) + D2 * (K2 - 1) + 1     # 20 : conv2 reads y1 phase 3p + 2k
R_X = S * (N_PH1 - 1) + D1 * (K1 - 1) + 1       # 61 : conv1 reads x row   3q + k


# ----------------------------- Pallas kernel --------------------------------
def _net_z_kernel(xt_ref, w1_ref, w2_ref, w3_ref, shift_ref, wfc_ref, bfc_ref,
                  o_ref, y1e_scr, y1o_scr, y2_scr):
    n_lanes = xt_ref.shape[-1]          # BB * W_PAD (batch along lanes)
    n_b = n_lanes // W_PAD              # batch elements in this grid step

    def lrelu(v):
        return jnp.maximum(v, NEG_SLOPE * v)

    # conv1 (+ folded BN affine, shift via the ones row) + LeakyReLU ----------
    # One small MXU dot per polyphase output; results land directly in the
    # even/odd phase banks (32-row aligned stores, no copies).
    w1 = w1_ref[...]                                        # (32, 8)
    for q in range(N_PH1):
        if q == 1:
            continue                    # y1 phase 1 is never read by conv2
        acc = jnp.dot(w1, xt_ref[q], preferred_element_type=jnp.float32)
        bank = y1e_scr if q % 2 == 0 else y1o_scr
        r0 = (q // 2) * C
        bank[r0:r0 + C, :] = lrelu(acc)

    # conv2 (+ folded BN) + LeakyReLU: one K=192 MXU dot per output phase -----
    # The six taps of phase p share p's parity, so they are one contiguous,
    # aligned (192, N) slice of the matching bank -- no concatenate.
    w2 = w2_ref[...]                                        # (32, 192)
    sh2 = jnp.broadcast_to(shift_ref[:, 0:1], (C, n_lanes))  # hoisted broadcast
    for p in range(N_PH2):
        bank = y1e_scr if p % 2 == 0 else y1o_scr
        s0 = ((3 * p - (p % 2)) // 2) * C
        acc = jnp.dot(w2, bank[s0:s0 + K2 * C, :],
                      preferred_element_type=jnp.float32)
        y2_scr[p * C:(p + 1) * C, :] = lrelu(acc + sh2)      # rows = conv3 RHS

    # conv3 (+ folded BN) + LeakyReLU: single K=128 MXU dot -------------------
    sh3 = jnp.broadcast_to(shift_ref[:, 1:2], (C, n_lanes))
    y3 = lrelu(jnp.dot(w3_ref[...], y2_scr[...],
                       preferred_element_type=jnp.float32) + sh3)   # (32, N)

    # fc + LeakyReLU: per-batch-segment VPU multiply + reduce -----------------
    # wfc is zero beyond column L3-1, so junk conv columns contribute exactly 0.
    wfc = wfc_ref[...]                                      # (20, 32, W_PAD)
    cols = []
    for b in range(n_b):
        y3b = y3[:, b * W_PAD:(b + 1) * W_PAD]              # (32, W_PAD)
        part = jnp.sum(wfc * y3b[None, :, :], axis=-1)      # (20, 32)
        cols.append(jnp.sum(part, axis=-1, keepdims=True))  # (20, 1)
    fc = jnp.concatenate(cols, axis=1) + bfc_ref[...]       # (20, n_b)
    o_ref[...] = lrelu(fc)


# ------------------------------ JAX glue -------------------------------------
def net_z_forward(params, h, z):
    B = h.shape[0]
    x = jnp.concatenate([h, z], axis=2)[:, 0, :].astype(jnp.float32)   # (B, L0)
    L0 = x.shape[1]

    # static shape bookkeeping (must match the hard-coded Linear(4704, 20))
    L1 = (L0 - D1 * (K1 - 1) - 1) // S + 1
    L2 = (L1 - D2 * (K2 - 1) - 1) // S + 1
    L3_ = (L2 - D3 * (K3 - 1) - 1) // S + 1
    assert L3_ == L3 and params["fc_w"].shape == (N_OUT, C * L3), (L1, L2, L3_)

    # batch blocking: >=2 grid steps whenever B >= 2 (feeds both v7x cores),
    # BB capped at 8 (raise with vmem_limit_bytes if chasing bigger blocks).
    BB = max(1, min(8, -(-B // 2)))
    G = -(-B // BB)
    Bp = G * BB
    BW = BB * W_PAD

    # polyphase split by the total stride 27: pad -> reshape -> transpose ->
    # three contiguous column slices (no XLA gather).
    n_col = W_PAD + 2                                            # 162
    x_p = jnp.pad(x, ((0, Bp - B), (0, S_TOT * n_col - L0)))     # zero pad
    xt = x_p.reshape(Bp, n_col, S_TOT).transpose(0, 2, 1)        # xt[b,r,i]=x[27i+r]
    xph = jnp.concatenate(
        [xt[:, :, 0:W_PAD], xt[:, :, 1:W_PAD + 1],
         xt[:, :R_X - 2 * S_TOT, 2:W_PAD + 2]], axis=1)          # (Bp, 61, 160)

    # conv1 tap slabs: xtap[b, q, k, j] = xph[b, 3q+k, j]; row K1 = ones (bias +
    # BN shift ride in the matmul); rows K1+1..7 = zeros (pad K to 8, aligned).
    taps = jnp.stack([xph[:, k::S, :][:, :N_PH1] for k in range(K1)], axis=2)
    ones = jnp.ones((Bp, N_PH1, 1, W_PAD), jnp.float32)
    zpad = jnp.zeros((Bp, N_PH1, K1P - K1 - 1, W_PAD), jnp.float32)
    xtap = jnp.concatenate([taps, ones, zpad], axis=2)           # (Bp, 20, 8, 160)
    xtap = (xtap.reshape(G, BB, N_PH1, K1P, W_PAD)
                .transpose(0, 2, 3, 1, 4)
                .reshape(G, N_PH1, K1P, BW))                     # lanes = b*160+j

    # fold conv bias + eval-mode BN into the conv weights / per-channel shifts
    def fold(w, b, gamma, beta, mean, var):
        s = gamma / jnp.sqrt(var + BN_EPS)
        return w * s[:, None, None], (b - mean) * s + beta

    w1f, sh1 = fold(*params["conv1"])
    w2f, sh2 = fold(*params["conv2"])
    w3f, sh3 = fold(*params["conv3"])

    w1 = jnp.concatenate(
        [w1f[:, 0, :], sh1[:, None], jnp.zeros((C, K1P - K1 - 1), jnp.float32)],
        axis=1).astype(jnp.float32)                                      # (32, 8)
    # taps folded into the contraction dim, (k, c_in) ordering matches the banks
    w2 = jnp.transpose(w2f, (0, 2, 1)).reshape(C, K2 * C).astype(jnp.float32)
    w3 = jnp.transpose(w3f, (0, 2, 1)).reshape(C, K3 * C).astype(jnp.float32)
    shifts = jnp.stack([sh2, sh3], axis=1).astype(jnp.float32)           # (32, 2)
    # fc weight: PyTorch flatten is channel-major -> (20, 32, 147), zero-pad cols
    wfc = jnp.pad(params["fc_w"].reshape(N_OUT, C, L3),
                  ((0, 0), (0, 0), (0, W_PAD - L3))).astype(jnp.float32)
    bfc = params["fc_b"].reshape(N_OUT, 1).astype(jnp.float32)

    out = pl.pallas_call(
        _net_z_kernel,
        out_shape=jax.ShapeDtypeStruct((G, N_OUT, BB), jnp.float32),
        grid=(G,),
        in_specs=[
            pl.BlockSpec((None, N_PH1, K1P, BW), lambda g: (g, 0, 0, 0)),  # xtap
            pl.BlockSpec((C, K1P), lambda g: (0, 0)),                      # w1
            pl.BlockSpec((C, K2 * C), lambda g: (0, 0)),                   # w2
            pl.BlockSpec((C, K3 * C), lambda g: (0, 0)),                   # w3
            pl.BlockSpec((C, 2), lambda g: (0, 0)),                        # shifts
            pl.BlockSpec((N_OUT, C, W_PAD), lambda g: (0, 0, 0)),          # wfc
            pl.BlockSpec((N_OUT, 1), lambda g: (0, 0)),                    # bfc
        ],
        out_specs=pl.BlockSpec((None, N_OUT, BB), lambda g: (g, 0, 0)),
        scratch_shapes=[
            pltpu.VMEM((N_PH1 // 2 * C, BW), jnp.float32),   # y1 even phases
            pltpu.VMEM((N_PH1 // 2 * C, BW), jnp.float32),   # y1 odd phases
            pltpu.VMEM((N_PH2 * C, BW), jnp.float32),        # y2 (= conv3 RHS)
        ],
        compiler_params=pltpu.CompilerParams(
            dimension_semantics=("parallel",)),
    )(xtap, w1, w2, w3, shifts, wfc, bfc)

    out = out.transpose(0, 2, 1).reshape(Bp, N_OUT)[:B]
    return out.reshape(B, 1, N_OUT)                                    # (B, 1, 20)


# --------------------------- deterministic params ----------------------------
def _conv_block_params(key, c_in, c_out, k):
    kw, kb, kg, kbt, km, kv = jax.random.split(key, 6)
    bound = 1.0 / jnp.sqrt(jnp.float32(c_in * k))
    w = jax.random.uniform(kw, (c_out, c_in, k), jnp.float32, -bound, bound)
    b = jax.random.uniform(kb, (c_out,), jnp.float32, -bound, bound)
    gamma = jax.random.uniform(kg, (c_out,), jnp.float32, 0.5, 1.5)
    beta = 0.1 * jax.random.normal(kbt, (c_out,), jnp.float32)
    run_mean = 0.1 * jax.random.normal(km, (c_out,), jnp.float32)
    run_var = jax.random.uniform(kv, (c_out,), jnp.float32, 0.5, 1.5)
    return (w, b, gamma, beta, run_mean, run_var)


def init_params(key):
    k1, k2, k3, kfw, kfb = jax.random.split(key, 5)
    in_f, out_f = C * L3, N_OUT
    bound = 1.0 / jnp.sqrt(jnp.float32(in_f))
    return {
        "conv1": _conv_block_params(k1, 1, C, K1),
        "conv2": _conv_block_params(k2, C, C, K2),
        "conv3": _conv_block_params(k3, C, C, K3),
        "fc_w": jax.random.uniform(kfw, (out_f, in_f), jnp.float32, -bound, bound),
        "fc_b": jax.random.uniform(kfb, (out_f,), jnp.float32, -bound, bound),
    }


# ---------------------------------- main --------------------------------------
if __name__ == "__main__":
    key = jax.random.PRNGKey(0)
    kp, kh, kz = jax.random.split(key, 3)
    params = init_params(kp)

    # total length 2000 + 2005 = 4005 -> conv stack output (B, 32, 147) -> 4704 feats
    B = 2
    h = jax.random.normal(kh, (B, 1, 2000), jnp.float32)
    z = jax.random.normal(kz, (B, 1, 2005), jnp.float32)

    out = jax.jit(net_z_forward)(params, h, z)
    out = jax.block_until_ready(out)
    assert out.shape == (B, 1, N_OUT), out.shape
    print("KERNEL_OK")
</pallas_src>

<mosaic_0001>
module attributes {stable_mosaic.version = 11 : i64} {
  func.func @_net_z_kernel(%arg0: i32, %arg1: memref<1x20x8x160xf32, #tpu.memory_space<vmem>>, %arg2: memref<32x8xf32, #tpu.memory_space<vmem>>, %arg3: memref<32x192xf32, #tpu.memory_space<vmem>>, %arg4: memref<32x128xf32, #tpu.memory_space<vmem>>, %arg5: memref<32x2xf32, #tpu.memory_space<vmem>>, %arg6: memref<20x32x160xf32, #tpu.memory_space<vmem>>, %arg7: memref<20x1xf32, #tpu.memory_space<vmem>>, %arg8: memref<1x20x1xf32, #tpu.memory_space<vmem>>, %arg9: memref<320x160xf32, #tpu.memory_space<vmem>>, %arg10: memref<320x160xf32, #tpu.memory_space<vmem>>, %arg11: memref<128x160xf32, #tpu.memory_space<vmem>>) attributes {dimension_semantics = [#tpu.dimension_semantics<parallel>], iteration_bounds = array<i64: 2>, scalar_prefetch = 0 : i64, scratch_operands = 3 : i64, tpu.core_type = #tpu.core_type<tc>, window_params = [{transform_indices = @transform_0, window_bounds = array<i64: 1, 20, 8, 160>}, {pipeline_mode = #tpu.pipeline_mode<synchronous>, transform_indices = @transform_1, window_bounds = array<i64: 32, 8>}, {pipeline_mode = #tpu.pipeline_mode<synchronous>, transform_indices = @transform_2, window_bounds = array<i64: 32, 192>}, {pipeline_mode = #tpu.pipeline_mode<synchronous>, transform_indices = @transform_3, window_bounds = array<i64: 32, 128>}, {pipeline_mode = #tpu.pipeline_mode<synchronous>, transform_indices = @transform_4, window_bounds = array<i64: 32, 2>}, {pipeline_mode = #tpu.pipeline_mode<synchronous>, transform_indices = @transform_5, window_bounds = array<i64: 20, 32, 160>}, {pipeline_mode = #tpu.pipeline_mode<synchronous>, transform_indices = @transform_6, window_bounds = array<i64: 20, 1>}, {transform_indices = @transform_7, window_bounds = array<i64: 1, 20, 1>}]} {
    %c0 = arith.constant 0 : index
    %c0_0 = arith.constant 0 : index
    %0 = vector.load %arg2[%c0, %c0_0] : memref<32x8xf32, #tpu.memory_space<vmem>>, vector<32x8xf32>
    %c0_1 = arith.constant 0 : index
    %c0_2 = arith.constant 0 : index
    %c0_3 = arith.constant 0 : index
    %c0_4 = arith.constant 0 : index
    %1 = vector.load %arg1[%c0_1, %c0_2, %c0_3, %c0_4] : memref<1x20x8x160xf32, #tpu.memory_space<vmem>>, vector<1x1x8x160xf32>
    %2 = vector.shape_cast %1 : vector<1x1x8x160xf32> to vector<8x160xf32>
    %cst = arith.constant dense<0.000000e+00> : vector<32x160xf32>
    %3 = tpu.matmul %0, %2, %cst {dimension_numbers = #tpu.dot_dimension_numbers<[1], [0], [0], [1], [0, 0, 1, 1], [], []>} : vector<32x8xf32>, vector<8x160xf32>, vector<32x160xf32> -> vector<32x160xf32>
    %cst_5 = arith.constant 0.00999999977 : f32
    %4 = vector.broadcast %cst_5 : f32 to vector<32x160xf32>
    %5 = arith.mulf %4, %3 : vector<32x160xf32>
    %6 = arith.maximumf %3, %5 : vector<32x160xf32>
    %c0_6 = arith.constant 0 : index
    %c0_7 = arith.constant 0 : index
    %7 = vector.load %arg9[%c0_6, %c0_7] : memref<320x160xf32, #tpu.memory_space<vmem>>, vector<32x160xf32>
    tpu.vector_store %arg9[%c0_6, %c0_7], %6 {strides = array<i32>} : memref<320x160xf32, #tpu.memory_space<vmem>>, vector<32x160xf32>,
    %c0_8 = arith.constant 0 : index
    %c2 = arith.constant 2 : index
    %c0_9 = arith.constant 0 : index
    %c0_10 = arith.constant 0 : index
    %8 = vector.load %arg1[%c0_8, %c2, %c0_9, %c0_10] : memref<1x20x8x160xf32, #tpu.memory_space<vmem>>, vector<1x1x8x160xf32>
    %9 = vector.shape_cast %8 : vector<1x1x8x160xf32> to vector<8x160xf32>
    %cst_11 = arith.constant dense<0.000000e+00> : vector<32x160xf32>
    %10 = tpu.matmul %0, %9, %cst_11 {dimension_numbers = #tpu.dot_dimension_numbers<[1], [0], [0], [1], [0, 0, 1, 1], [], []>} : vector<32x8xf32>, vector<8x160xf32>, vector<32x160xf32> -> vector<32x160xf32>
    %cst_12 = arith.constant 0.00999999977 : f32
    %11 = vector.broadcast %cst_12 : f32 to vector<32x160xf32>
    %12 = arith.mulf %11, %10 : vector<32x160xf32>
    %13 = arith.maximumf %10, %12 : vector<32x160xf32>
    %c32 = arith.constant 32 : index
    %c0_13 = arith.constant 0 : index
    %14 = vector.load %arg9[%c32, %c0_13] : memref<320x160xf32, #tpu.memory_space<vmem>>, vector<32x160xf32>
    tpu.vector_store %arg9[%c32, %c0_13], %13 {strides = array<i32>} : memref<320x160xf32, #tpu.memory_space<vmem>>, vector<32x160xf32>,
    %c0_14 = arith.constant 0 : index
    %c3 = arith.constant 3 : index
    %c0_15 = arith.constant 0 : index
    %c0_16 = arith.constant 0 : index
    %15 = vector.load %arg1[%c0_14, %c3, %c0_15, %c0_16] : memref<1x20x8x160xf32, #tpu.memory_space<vmem>>, vector<1x1x8x160xf32>
    %16 = vector.shape_cast %15 : vector<1x1x8x160xf32> to vector<8x160xf32>
    %cst_17 = arith.constant dense<0.000000e+00> : vector<32x160xf32>
    %17 = tpu.matmul %0, %16, %cst_17 {dimension_numbers = #tpu.dot_dimension_numbers<[1], [0], [0], [1], [0, 0, 1, 1], [], []>} : vector<32x8xf32>, vector<8x160xf32>, vector<32x160xf32> -> vector<32x160xf32>
    %cst_18 = arith.constant 0.00999999977 : f32
    %18 = vector.broadcast %cst_18 : f32 to vector<32x160xf32>
    %19 = arith.mulf %18, %17 : vector<32x160xf32>
    %20 = arith.maximumf %17, %19 : vector<32x160xf32>
    %c32_19 = arith.constant 32 : index
    %c0_20 = arith.constant 0 : index
    %21 = vector.load %arg10[%c32_19, %c0_20] : memref<320x160xf32, #tpu.memory_space<vmem>>, vector<32x160xf32>
    tpu.vector_store %arg10[%c32_19, %c0_20], %20 {strides = array<i32>} : memref<320x160xf32, #tpu.memory_space<vmem>>, vector<32x160xf32>,
    %c0_21 = arith.constant 0 : index
    %c4 = arith.constant 4 : index
    %c0_22 = arith.constant 0 : index
    %c0_23 = arith.constant 0 : index
    %22 = vector.load %arg1[%c0_21, %c4, %c0_22, %c0_23] : memref<1x20x8x160xf32, #tpu.memory_space<vmem>>, vector<1x1x8x160xf32>
    %23 = vector.shape_cast %22 : vector<1x1x8x160xf32> to vector<8x160xf32>
    %cst_24 = arith.constant dense<0.000000e+00> : vector<32x160xf32>
    %24 = tpu.matmul %0, %23, %cst_24 {dimension_numbers = #tpu.dot_dimension_numbers<[1], [0], [0], [1], [0, 0, 1, 1], [], []>} : vector<32x8xf32>, vector<8x160xf32>, vector<32x160xf32> -> vector<32x160xf32>
    %cst_25 = arith.constant 0.00999999977 : f32
    %25 = vector.broadcast %cst_25 : f32 to vector<32x160xf32>
    %26 = arith.mulf %25, %24 : vector<32x160xf32>
    %27 = arith.maximumf %24, %26 : vector<32x160xf32>
    %c64 = arith.constant 64 : index
    %c0_26 = arith.constant 0 : index
    %28 = vector.load %arg9[%c64, %c0_26] : memref<320x160xf32, #tpu.memory_space<vmem>>, vector<32x160xf32>
    tpu.vector_store %arg9[%c64, %c0_26], %27 {strides = array<i32>} : memref<320x160xf32, #tpu.memory_space<vmem>>, vector<32x160xf32>,
    %c0_27 = arith.constant 0 : index
    %c5 = arith.constant 5 : index
    %c0_28 = arith.constant 0 : index
    %c0_29 = arith.constant 0 : index
    %29 = vector.load %arg1[%c0_27, %c5, %c0_28, %c0_29] : memref<1x20x8x160xf32, #tpu.memory_space<vmem>>, vector<1x1x8x160xf32>
    %30 = vector.shape_cast %29 : vector<1x1x8x160xf32> to vector<8x160xf32>
    %cst_30 = arith.constant dense<0.000000e+00> : vector<32x160xf32>
    %31 = tpu.matmul %0, %30, %cst_30 {dimension_numbers = #tpu.dot_dimension_numbers<[1], [0], [0], [1], [0, 0, 1, 1], [], []>} : vector<32x8xf32>, vector<8x160xf32>, vector<32x160xf32> -> vector<32x160xf32>
    %cst_31 = arith.constant 0.00999999977 : f32
    %32 = vector.broadcast %cst_31 : f32 to vector<32x160xf32>
    %33 = arith.mulf %32, %31 : vector<32x160xf32>
    %34 = arith.maximumf %31, %33 : vector<32x160xf32>
    %c64_32 = arith.constant 64 : index
    %c0_33 = arith.constant 0 : index
    %35 = vector.load %arg10[%c64_32, %c0_33] : memref<320x160xf32, #tpu.memory_space<vmem>>, vector<32x160xf32>
    tpu.vector_store %arg10[%c64_32, %c0_33], %34 {strides = array<i32>} : memref<320x160xf32, #tpu.memory_space<vmem>>, vector<32x160xf32>,
    %c0_34 = arith.constant 0 : index
    %c6 = arith.constant 6 : index
    %c0_35 = arith.constant 0 : index
    %c0_36 = arith.constant 0 : index
    %36 = vector.load %arg1[%c0_34, %c6, %c0_35, %c0_36] : memref<1x20x8x160xf32, #tpu.memory_space<vmem>>, vector<1x1x8x160xf32>
    %37 = vector.shape_cast %36 : vector<1x1x8x160xf32> to vector<8x160xf32>
    %cst_37 = arith.constant dense<0.000000e+00> : vector<32x160xf32>
    %38 = tpu.matmul %0, %37, %cst_37 {dimension_numbers = #tpu.dot_dimension_numbers<[1], [0], [0], [1], [0, 0, 1, 1], [], []>} : vector<32x8xf32>, vector<8x160xf32>, vector<32x160xf32> -> vector<32x160xf32>
    %cst_38 = arith.constant 0.00999999977 : f32
    %39 = vector.broadcast %cst_38 : f32 to vector<32x160xf32>
    %40 = arith.mulf %39, %38 : vector<32x160xf32>
    %41 = arith.maximumf %38, %40 : vector<32x160xf32>
    %c96 = arith.constant 96 : index
    %c0_39 = arith.constant 0 : index
    %42 = vector.load %arg9[%c96, %c0_39] : memref<320x160xf32, #tpu.memory_space<vmem>>, vector<32x160xf32>
    tpu.vector_store %arg9[%c96, %c0_39], %41 {strides = array<i32>} : memref<320x160xf32, #tpu.memory_space<vmem>>, vector<32x160xf32>,
    %c0_40 = arith.constant 0 : index
    %c7 = arith.constant 7 : index
    %c0_41 = arith.constant 0 : index
    %c0_42 = arith.constant 0 : index
    %43 = vector.load %arg1[%c0_40, %c7, %c0_41, %c0_42] : memref<1x20x8x160xf32, #tpu.memory_space<vmem>>, vector<1x1x8x160xf32>
    %44 = vector.shape_cast %43 : vector<1x1x8x160xf32> to vector<8x160xf32>
    %cst_43 = arith.constant dense<0.000000e+00> : vector<32x160xf32>
    %45 = tpu.matmul %0, %44, %cst_43 {dimension_numbers = #tpu.dot_dimension_numbers<[1], [0], [0], [1], [0, 0, 1, 1], [], []>} : vector<32x8xf32>, vector<8x160xf32>, vector<32x160xf32> -> vector<32x160xf32>
    %cst_44 = arith.constant 0.00999999977 : f32
    %46 = vector.broadcast %cst_44 : f32 to vector<32x160xf32>
    %47 = arith.mulf %46, %45 : vector<32x160xf32>
    %48 = arith.maximumf %45, %47 : vector<32x160xf32>
    %c96_45 = arith.constant 96 : index
    %c0_46 = arith.constant 0 : index
    %49 = vector.load %arg10[%c96_45, %c0_46] : memref<320x160xf32, #tpu.memory_space<vmem>>, vector<32x160xf32>
    tpu.vector_store %arg10[%c96_45, %c0_46], %48 {strides = array<i32>} : memref<320x160xf32, #tpu.memory_space<vmem>>, vector<32x160xf32>,
    %c0_47 = arith.constant 0 : index
    %c8 = arith.constant 8 : index
    %c0_48 = arith.constant 0 : index
    %c0_49 = arith.constant 0 : index
    %50 = vector.load %arg1[%c0_47, %c8, %c0_48, %c0_49] : memref<1x20x8x160xf32, #tpu.memory_space<vmem>>, vector<1x1x8x160xf32>
    %51 = vector.shape_cast %50 : vector<1x1x8x160xf32> to vector<8x160xf32>
    %cst_50 = arith.constant dense<0.000000e+00> : vector<32x160xf32>
    %52 = tpu.matmul %0, %51, %cst_50 {dimension_numbers = #tpu.dot_dimension_numbers<[1], [0], [0], [1], [0, 0, 1, 1], [], []>} : vector<32x8xf32>, vector<8x160xf32>, vector<32x160xf32> -> vector<32x160xf32>
    %cst_51 = arith.constant 0.00999999977 : f32
    %53 = vector.broadcast %cst_51 : f32 to vector<32x160xf32>
    %54 = arith.mulf %53, %52 : vector<32x160xf32>
    %55 = arith.maximumf %52, %54 : vector<32x160xf32>
    %c128 = arith.constant 128 : index
    %c0_52 = arith.constant 0 : index
    %56 = vector.load %arg9[%c128, %c0_52] : memref<320x160xf32, #tpu.memory_space<vmem>>, vector<32x160xf32>
    tpu.vector_store %arg9[%c128, %c0_52], %55 {strides = array<i32>} : memref<320x160xf32, #tpu.memory_space<vmem>>, vector<32x160xf32>,
    %c0_53 = arith.constant 0 : index
    %c9 = arith.constant 9 : index
    %c0_54 = arith.constant 0 : index
    %c0_55 = arith.constant 0 : index
    %57 = vector.load %arg1[%c0_53, %c9, %c0_54, %c0_55] : memref<1x20x8x160xf32, #tpu.memory_space<vmem>>, vector<1x1x8x160xf32>
    %58 = vector.shape_cast %57 : vector<1x1x8x160xf32> to vector<8x160xf32>
    %cst_56 = arith.constant dense<0.000000e+00> : vector<32x160xf32>
    %59 = tpu.matmul %0, %58, %cst_56 {dimension_numbers = #tpu.dot_dimension_numbers<[1], [0], [0], [1], [0, 0, 1, 1], [], []>} : vector<32x8xf32>, vector<8x160xf32>, vector<32x160xf32> -> vector<32x160xf32>
    %cst_57 = arith.constant 0.00999999977 : f32
    %60 = vector.broadcast %cst_57 : f32 to vector<32x160xf32>
    %61 = arith.mulf %60, %59 : vector<32x160xf32>
    %62 = arith.maximumf %59, %61 : vector<32x160xf32>
    %c128_58 = arith.constant 128 : index
    %c0_59 = arith.constant 0 : index
    %63 = vector.load %arg10[%c128_58, %c0_59] : memref<320x160xf32, #tpu.memory_space<vmem>>, vector<32x160xf32>
    tpu.vector_store %arg10[%c128_58, %c0_59], %62 {strides = array<i32>} : memref<320x160xf32, #tpu.memory_space<vmem>>, vector<32x160xf32>,
    %c0_60 = arith.constant 0 : index
    %c10 = arith.constant 10 : index
    %c0_61 = arith.constant 0 : index
    %c0_62 = arith.constant 0 : index
    %64 = vector.load %arg1[%c0_60, %c10, %c0_61, %c0_62] : memref<1x20x8x160xf32, #tpu.memory_space<vmem>>, vector<1x1x8x160xf32>
    %65 = vector.shape_cast %64 : vector<1x1x8x160xf32> to vector<8x160xf32>
    %cst_63 = arith.constant dense<0.000000e+00> : vector<32x160xf32>
    %66 = tpu.matmul %0, %65, %cst_63 {dimension_numbers = #tpu.dot_dimension_numbers<[1], [0], [0], [1], [0, 0, 1, 1], [], []>} : vector<32x8xf32>, vector<8x160xf32>, vector<32x160xf32> -> vector<32x160xf32>
    %cst_64 = arith.constant 0.00999999977 : f32
    %67 = vector.broadcast %cst_64 : f32 to vector<32x160xf32>
    %68 = arith.mulf %67, %66 : vector<32x160xf32>
    %69 = arith.maximumf %66, %68 : vector<32x160xf32>
    %c160 = arith.constant 160 : index
    %c0_65 = arith.constant 0 : index
    %70 = vector.load %arg9[%c160, %c0_65] : memref<320x160xf32, #tpu.memory_space<vmem>>, vector<32x160xf32>
    tpu.vector_store %arg9[%c160, %c0_65], %69 {strides = array<i32>} : memref<320x160xf32, #tpu.memory_space<vmem>>, vector<32x160xf32>,
    %c0_66 = arith.constant 0 : index
    %c11 = arith.constant 11 : index
    %c0_67 = arith.constant 0 : index
    %c0_68 = arith.constant 0 : index
    %71 = vector.load %arg1[%c0_66, %c11, %c0_67, %c0_68] : memref<1x20x8x160xf32, #tpu.memory_space<vmem>>, vector<1x1x8x160xf32>
    %72 = vector.shape_cast %71 : vector<1x1x8x160xf32> to vector<8x160xf32>
    %cst_69 = arith.constant dense<0.000000e+00> : vector<32x160xf32>
    %73 = tpu.matmul %0, %72, %cst_69 {dimension_numbers = #tpu.dot_dimension_numbers<[1], [0], [0], [1], [0, 0, 1, 1], [], []>} : vector<32x8xf32>, vector<8x160xf32>, vector<32x160xf32> -> vector<32x160xf32>
    %cst_70 = arith.constant 0.00999999977 : f32
    %74 = vector.broadcast %cst_70 : f32 to vector<32x160xf32>
    %75 = arith.mulf %74, %73 : vector<32x160xf32>
    %76 = arith.maximumf %73, %75 : vector<32x160xf32>
    %c160_71 = arith.constant 160 : index
    %c0_72 = arith.constant 0 : index
    %77 = vector.load %arg10[%c160_71, %c0_72] : memref<320x160xf32, #tpu.memory_space<vmem>>, vector<32x160xf32>
    tpu.vector_store %arg10[%c160_71, %c0_72], %76 {strides = array<i32>} : memref<320x160xf32, #tpu.memory_space<vmem>>, vector<32x160xf32>,
    %c0_73 = arith.constant 0 : index
    %c12 = arith.constant 12 : index
    %c0_74 = arith.constant 0 : index
    %c0_75 = arith.constant 0 : index
    %78 = vector.load %arg1[%c0_73, %c12, %c0_74, %c0_75] : memref<1x20x8x160xf32, #tpu.memory_space<vmem>>, vector<1x1x8x160xf32>
    %79 = vector.shape_cast %78 : vector<1x1x8x160xf32> to vector<8x160xf32>
    %cst_76 = arith.constant dense<0.000000e+00> : vector<32x160xf32>
    %80 = tpu.matmul %0, %79, %cst_76 {dimension_numbers = #tpu.dot_dimension_numbers<[1], [0], [0], [1], [0, 0, 1, 1], [], []>} : vector<32x8xf32>, vector<8x160xf32>, vector<32x160xf32> -> vector<32x160xf32>
    %cst_77 = arith.constant 0.00999999977 : f32
    %81 = vector.broadcast %cst_77 : f32 to vector<32x160xf32>
    %82 = arith.mulf %81, %80 : vector<32x160xf32>
    %83 = arith.maximumf %80, %82 : vector<32x160xf32>
    %c192 = arith.constant 192 : index
    %c0_78 = arith.constant 0 : index
    %84 = vector.load %arg9[%c192, %c0_78] : memref<320x160xf32, #tpu.memory_space<vmem>>, vector<32x160xf32>
    tpu.vector_store %arg9[%c192, %c0_78], %83 {strides = array<i32>} : memref<320x160xf32, #tpu.memory_space<vmem>>, vector<32x160xf32>,
    %c0_79 = arith.constant 0 : index
    %c13 = arith.constant 13 : index
    %c0_80 = arith.constant 0 : index
    %c0_81 = arith.constant 0 : index
    %85 = vector.load %arg1[%c0_79, %c13, %c0_80, %c0_81] : memref<1x20x8x160xf32, #tpu.memory_space<vmem>>, vector<1x1x8x160xf32>
    %86 = vector.shape_cast %85 : vector<1x1x8x160xf32> to vector<8x160xf32>
    %cst_82 = arith.constant dense<0.000000e+00> : vector<32x160xf32>
    %87 = tpu.matmul %0, %86, %cst_82 {dimension_numbers = #tpu.dot_dimension_numbers<[1], [0], [0], [1], [0, 0, 1, 1], [], []>} : vector<32x8xf32>, vector<8x160xf32>, vector<32x160xf32> -> vector<32x160xf32>
    %cst_83 = arith.constant 0.00999999977 : f32
    %88 = vector.broadcast %cst_83 : f32 to vector<32x160xf32>
    %89 = arith.mulf %88, %87 : vector<32x160xf32>
    %90 = arith.maximumf %87, %89 : vector<32x160xf32>
    %c192_84 = arith.constant 192 : index
    %c0_85 = arith.constant 0 : index
    %91 = vector.load %arg10[%c192_84, %c0_85] : memref<320x160xf32, #tpu.memory_space<vmem>>, vector<32x160xf32>
    tpu.vector_store %arg10[%c192_84, %c0_85], %90 {strides = array<i32>} : memref<320x160xf32, #tpu.memory_space<vmem>>, vector<32x160xf32>,
    %c0_86 = arith.constant 0 : index
    %c14 = arith.constant 14 : index
    %c0_87 = arith.constant 0 : index
    %c0_88 = arith.constant 0 : index
    %92 = vector.load %arg1[%c0_86, %c14, %c0_87, %c0_88] : memref<1x20x8x160xf32, #tpu.memory_space<vmem>>, vector<1x1x8x160xf32>
    %93 = vector.shape_cast %92 : vector<1x1x8x160xf32> to vector<8x160xf32>
    %cst_89 = arith.constant dense<0.000000e+00> : vector<32x160xf32>
    %94 = tpu.matmul %0, %93, %cst_89 {dimension_numbers = #tpu.dot_dimension_numbers<[1], [0], [0], [1], [0, 0, 1, 1], [], []>} : vector<32x8xf32>, vector<8x160xf32>, vector<32x160xf32> -> vector<32x160xf32>
    %cst_90 = arith.constant 0.00999999977 : f32
    %95 = vector.broadcast %cst_90 : f32 to vector<32x160xf32>
    %96 = arith.mulf %95, %94 : vector<32x160xf32>
    %97 = arith.maximumf %94, %96 : vector<32x160xf32>
    %c224 = arith.constant 224 : index
    %c0_91 = arith.constant 0 : index
    %98 = vector.load %arg9[%c224, %c0_91] : memref<320x160xf32, #tpu.memory_space<vmem>>, vector<32x160xf32>
    tpu.vector_store %arg9[%c224, %c0_91], %97 {strides = array<i32>} : memref<320x160xf32, #tpu.memory_space<vmem>>, vector<32x160xf32>,
    %c0_92 = arith.constant 0 : index
    %c15 = arith.constant 15 : index
    %c0_93 = arith.constant 0 : index
    %c0_94 = arith.constant 0 : index
    %99 = vector.load %arg1[%c0_92, %c15, %c0_93, %c0_94] : memref<1x20x8x160xf32, #tpu.memory_space<vmem>>, vector<1x1x8x160xf32>
    %100 = vector.shape_cast %99 : vector<1x1x8x160xf32> to vector<8x160xf32>
    %cst_95 = arith.constant dense<0.000000e+00> : vector<32x160xf32>
    %101 = tpu.matmul %0, %100, %cst_95 {dimension_numbers = #tpu.dot_dimension_numbers<[1], [0], [0], [1], [0, 0, 1, 1], [], []>} : vector<32x8xf32>, vector<8x160xf32>, vector<32x160xf32> -> vector<32x160xf32>
    %cst_96 = arith.constant 0.00999999977 : f32
    %102 = vector.broadcast %cst_96 : f32 to vector<32x160xf32>
    %103 = arith.mulf %102, %101 : vector<32x160xf32>
    %104 = arith.maximumf %101, %103 : vector<32x160xf32>
    %c224_97 = arith.constant 224 : index
    %c0_98 = arith.constant 0 : index
    %105 = vector.load %arg10[%c224_97, %c0_98] : memref<320x160xf32, #tpu.memory_space<vmem>>, vector<32x160xf32>
    tpu.vector_store %arg10[%c224_97, %c0_98], %104 {strides = array<i32>} : memref<320x160xf32, #tpu.memory_space<vmem>>, vector<32x160xf32>,
    %c0_99 = arith.constant 0 : index
    %c16 = arith.constant 16 : index
    %c0_100 = arith.constant 0 : index
    %c0_101 = arith.constant 0 : index
    %106 = vector.load %arg1[%c0_99, %c16, %c0_100, %c0_101] : memref<1x20x8x160xf32, #tpu.memory_space<vmem>>, vector<1x1x8x160xf32>
    %107 = vector.shape_cast %106 : vector<1x1x8x160xf32> to vector<8x160xf32>
    %cst_102 = arith.constant dense<0.000000e+00> : vector<32x160xf32>
    %108 = tpu.matmul %0, %107, %cst_102 {dimension_numbers = #tpu.dot_dimension_numbers<[1], [0], [0], [1], [0, 0, 1, 1], [], []>} : vector<32x8xf32>, vector<8x160xf32>, vector<32x160xf32> -> vector<32x160xf32>
    %cst_103 = arith.constant 0.00999999977 : f32
    %109 = vector.broadcast %cst_103 : f32 to vector<32x160xf32>
    %110 = arith.mulf %109, %108 : vector<32x160xf32>
    %111 = arith.maximumf %108, %110 : vector<32x160xf32>
    %c256 = arith.constant 256 : index
    %c0_104 = arith.constant 0 : index
    %112 = vector.load %arg9[%c256, %c0_104] : memref<320x160xf32, #tpu.memory_space<vmem>>, vector<32x160xf32>
    tpu.vector_store %arg9[%c256, %c0_104], %111 {strides = array<i32>} : memref<320x160xf32, #tpu.memory_space<vmem>>, vector<32x160xf32>,
    %c0_105 = arith.constant 0 : index
    %c17 = arith.constant 17 : index
    %c0_106 = arith.constant 0 : index
    %c0_107 = arith.constant 0 : index
    %113 = vector.load %arg1[%c0_105, %c17, %c0_106, %c0_107] : memref<1x20x8x160xf32, #tpu.memory_space<vmem>>, vector<1x1x8x160xf32>
    %114 = vector.shape_cast %113 : vector<1x1x8x160xf32> to vector<8x160xf32>
    %cst_108 = arith.constant dense<0.000000e+00> : vector<32x160xf32>
    %115 = tpu.matmul %0, %114, %cst_108 {dimension_numbers = #tpu.dot_dimension_numbers<[1], [0], [0], [1], [0, 0, 1, 1], [], []>} : vector<32x8xf32>, vector<8x160xf32>, vector<32x160xf32> -> vector<32x160xf32>
    %cst_109 = arith.constant 0.00999999977 : f32
    %116 = vector.broadcast %cst_109 : f32 to vector<32x160xf32>
    %117 = arith.mulf %116, %115 : vector<32x160xf32>
    %118 = arith.maximumf %115, %117 : vector<32x160xf32>
    %c256_110 = arith.constant 256 : index
    %c0_111 = arith.constant 0 : index
    %119 = vector.load %arg10[%c256_110, %c0_111] : memref<320x160xf32, #tpu.memory_space<vmem>>, vector<32x160xf32>
    tpu.vector_store %arg10[%c256_110, %c0_111], %118 {strides = array<i32>} : memref<320x160xf32, #tpu.memory_space<vmem>>, vector<32x160xf32>,
    %c0_112 = arith.constant 0 : index
    %c18 = arith.constant 18 : index
    %c0_113 = arith.constant 0 : index
    %c0_114 = arith.constant 0 : index
    %120 = vector.load %arg1[%c0_112, %c18, %c0_113, %c0_114] : memref<1x20x8x160xf32, #tpu.memory_space<vmem>>, vector<1x1x8x160xf32>
    %121 = vector.shape_cast %120 : vector<1x1x8x160xf32> to vector<8x160xf32>
    %cst_115 = arith.constant dense<0.000000e+00> : vector<32x160xf32>
    %122 = tpu.matmul %0, %121, %cst_115 {dimension_numbers = #tpu.dot_dimension_numbers<[1], [0], [0], [1], [0, 0, 1, 1], [], []>} : vector<32x8xf32>, vector<8x160xf32>, vector<32x160xf32> -> vector<32x160xf32>
    %cst_116 = arith.constant 0.00999999977 : f32
    %123 = vector.broadcast %cst_116 : f32 to vector<32x160xf32>
    %124 = arith.mulf %123, %122 : vector<32x160xf32>
    %125 = arith.maximumf %122, %124 : vector<32x160xf32>
    %c288 = arith.constant 288 : index
    %c0_117 = arith.constant 0 : index
    %126 = vector.load %arg9[%c288, %c0_117] : memref<320x160xf32, #tpu.memory_space<vmem>>, vector<32x160xf32>
    tpu.vector_store %arg9[%c288, %c0_117], %125 {strides = array<i32>} : memref<320x160xf32, #tpu.memory_space<vmem>>, vector<32x160xf32>,
    %c0_118 = arith.constant 0 : index
    %c19 = arith.constant 19 : index
    %c0_119 = arith.constant 0 : index
    %c0_120 = arith.constant 0 : index
    %127 = vector.load %arg1[%c0_118, %c19, %c0_119, %c0_120] : memref<1x20x8x160xf32, #tpu.memory_space<vmem>>, vector<1x1x8x160xf32>
    %128 = vector.shape_cast %127 : vector<1x1x8x160xf32> to vector<8x160xf32>
    %cst_121 = arith.constant dense<0.000000e+00> : vector<32x160xf32>
    %129 = tpu.matmul %0, %128, %cst_121 {dimension_numbers = #tpu.dot_dimension_numbers<[1], [0], [0], [1], [0, 0, 1, 1], [], []>} : vector<32x8xf32>, vector<8x160xf32>, vector<32x160xf32> -> vector<32x160xf32>
    %cst_122 = arith.constant 0.00999999977 : f32
    %130 = vector.broadcast %cst_122 : f32 to vector<32x160xf32>
    %131 = arith.mulf %130, %129 : vector<32x160xf32>
    %132 = arith.maximumf %129, %131 : vector<32x160xf32>
    %c288_123 = arith.constant 288 : index
    %c0_124 = arith.constant 0 : index
    %133 = vector.load %arg10[%c288_123, %c0_124] : memref<320x160xf32, #tpu.memory_space<vmem>>, vector<32x160xf32>
    tpu.vector_store %arg10[%c288_123, %c0_124], %132 {strides = array<i32>} : memref<320x160xf32, #tpu.memory_space<vmem>>, vector<32x160xf32>,
    %c0_125 = arith.constant 0 : index
    %c0_126 = arith.constant 0 : index
    %134 = vector.load %arg3[%c0_125, %c0_126] : memref<32x192xf32, #tpu.memory_space<vmem>>, vector<32x192xf32>
    %c0_127 = arith.constant 0 : index
    %c0_128 = arith.constant 0 : index
    %135 = vector.load %arg5[%c0_127, %c0_128] : memref<32x2xf32, #tpu.memory_space<vmem>>, vector<32x1xf32>
    %136 = vector.shape_cast %135 : vector<32x1xf32> to vector<32x1xf32>
    %137 = vector.broadcast %136 : vector<32x1xf32> to vector<32x160xf32>
    %c0_129 = arith.constant 0 : index
    %c0_130 = arith.constant 0 : index
    %138 = vector.load %arg9[%c0_129, %c0_130] : memref<320x160xf32, #tpu.memory_space<vmem>>, vector<192x160xf32>
    %cst_131 = arith.constant dense<0.000000e+00> : vector<32x160xf32>
    %139 = tpu.matmul %134, %138, %cst_131 {dimension_numbers = #tpu.dot_dimension_numbers<[1], [0], [0], [1], [0, 0, 1, 1], [], []>} : vector<32x192xf32>, vector<192x160xf32>, vector<32x160xf32> -> vector<32x160xf32>
    %140 = arith.addf %139, %137 : vector<32x160xf32>
    %cst_132 = arith.constant 0.00999999977 : f32
    %141 = vector.broadcast %cst_132 : f32 to vector<32x160xf32>
    %142 = arith.mulf %141, %140 : vector<32x160xf32>
    %143 = arith.maximumf %140, %142 : vector<32x160xf32>
    %c0_133 = arith.constant 0 : index
    %c0_134 = arith.constant 0 : index
    %144 = vector.load %arg11[%c0_133, %c0_134] : memref<128x160xf32, #tpu.memory_space<vmem>>, vector<32x160xf32>
    tpu.vector_store %arg11[%c0_133, %c0_134], %143 {strides = array<i32>} : memref<128x160xf32, #tpu.memory_space<vmem>>, vector<32x160xf32>,
    %c32_135 = arith.constant 32 : index
    %c0_136 = arith.constant 0 : index
    %145 = vector.load %arg10[%c32_135, %c0_136] : memref<320x160xf32, #tpu.memory_space<vmem>>, vector<192x160xf32>
    %cst_137 = arith.constant dense<0.000000e+00> : vector<32x160xf32>
    %146 = tpu.matmul %134, %145, %cst_137 {dimension_numbers = #tpu.dot_dimension_numbers<[1], [0], [0], [1], [0, 0, 1, 1], [], []>} : vector<32x192xf32>, vector<192x160xf32>, vector<32x160xf32> -> vector<32x160xf32>
    %147 = arith.addf %146, %137 : vector<32x160xf32>
    %cst_138 = arith.constant 0.00999999977 : f32
    %148 = vector.broadcast %cst_138 : f32 to vector<32x160xf32>
    %149 = arith.mulf %148, %147 : vector<32x160xf32>
    %150 = arith.maximumf %147, %149 : vector<32x160xf32>
    %c32_139 = arith.constant 32 : index
    %c0_140 = arith.constant 0 : index
    %151 = vector.load %arg11[%c32_139, %c0_140] : memref<128x160xf32, #tpu.memory_space<vmem>>, vector<32x160xf32>
    tpu.vector_store %arg11[%c32_139, %c0_140], %150 {strides = array<i32>} : memref<128x160xf32, #tpu.memory_space<vmem>>, vector<32x160xf32>,
    %c96_141 = arith.constant 96 : index
    %c0_142 = arith.constant 0 : index
    %152 = vector.load %arg9[%c96_141, %c0_142] : memref<320x160xf32, #tpu.memory_space<vmem>>, vector<192x160xf32>
    %cst_143 = arith.constant dense<0.000000e+00> : vector<32x160xf32>
    %153 = tpu.matmul %134, %152, %cst_143 {dimension_numbers = #tpu.dot_dimension_numbers<[1], [0], [0], [1], [0, 0, 1, 1], [], []>} : vector<32x192xf32>, vector<192x160xf32>, vector<32x160xf32> -> vector<32x160xf32>
    %154 = arith.addf %153, %137 : vector<32x160xf32>
    %cst_144 = arith.constant 0.00999999977 : f32
    %155 = vector.broadcast %cst_144 : f32 to vector<32x160xf32>
    %156 = arith.mulf %155, %154 : vector<32x160xf32>
    %157 = arith.maximumf %154, %156 : vector<32x160xf32>
    %c64_145 = arith.constant 64 : index
    %c0_146 = arith.constant 0 : index
    %158 = vector.load %arg11[%c64_145, %c0_146] : memref<128x160xf32, #tpu.memory_space<vmem>>, vector<32x160xf32>
    tpu.vector_store %arg11[%c64_145, %c0_146], %157 {strides = array<i32>} : memref<128x160xf32, #tpu.memory_space<vmem>>, vector<32x160xf32>,
    %c128_147 = arith.constant 128 : index
    %c0_148 = arith.constant 0 : index
    %159 = vector.load %arg10[%c128_147, %c0_148] : memref<320x160xf32, #tpu.memory_space<vmem>>, vector<192x160xf32>
    %cst_149 = arith.constant dense<0.000000e+00> : vector<32x160xf32>
    %160 = tpu.matmul %134, %159, %cst_149 {dimension_numbers = #tpu.dot_dimension_numbers<[1], [0], [0], [1], [0, 0, 1, 1], [], []>} : vector<32x192xf32>, vector<192x160xf32>, vector<32x160xf32> -> vector<32x160xf32>
    %161 = arith.addf %160, %137 : vector<32x160xf32>
    %cst_150 = arith.constant 0.00999999977 : f32
    %162 = vector.broadcast %cst_150 : f32 to vector<32x160xf32>
    %163 = arith.mulf %162, %161 : vector<32x160xf32>
    %164 = arith.maximumf %161, %163 : vector<32x160xf32>
    %c96_151 = arith.constant 96 : index
    %c0_152 = arith.constant 0 : index
    %165 = vector.load %arg11[%c96_151, %c0_152] : memref<128x160xf32, #tpu.memory_space<vmem>>, vector<32x160xf32>
    tpu.vector_store %arg11[%c96_151, %c0_152], %164 {strides = array<i32>} : memref<128x160xf32, #tpu.memory_space<vmem>>, vector<32x160xf32>,
    %c0_153 = arith.constant 0 : index
    %c1 = arith.constant 1 : index
    %166 = vector.load %arg5[%c0_153, %c1] : memref<32x2xf32, #tpu.memory_space<vmem>>, vector<32x1xf32>
    %167 = vector.shape_cast %166 : vector<32x1xf32> to vector<32x1xf32>
    %168 = vector.broadcast %167 : vector<32x1xf32> to vector<32x160xf32>
    %c0_154 = arith.constant 0 : index
    %c0_155 = arith.constant 0 : index
    %169 = vector.load %arg4[%c0_154, %c0_155] : memref<32x128xf32, #tpu.memory_space<vmem>>, vector<32x128xf32>
    %c0_156 = arith.constant 0 : index
    %c0_157 = arith.constant 0 : index
    %170 = vector.load %arg11[%c0_156, %c0_157] : memref<128x160xf32, #tpu.memory_space<vmem>>, vector<128x160xf32>
    %cst_158 = arith.constant dense<0.000000e+00> : vector<32x160xf32>
    %171 = tpu.matmul %169, %170, %cst_158 {dimension_numbers = #tpu.dot_dimension_numbers<[1], [0], [0], [1], [0, 0, 1, 1], [], []>} : vector<32x128xf32>, vector<128x160xf32>, vector<32x160xf32> -> vector<32x160xf32>
    %172 = arith.addf %171, %168 : vector<32x160xf32>
    %cst_159 = arith.constant 0.00999999977 : f32
    %173 = vector.broadcast %cst_159 : f32 to vector<32x160xf32>
    %174 = arith.mulf %173, %172 : vector<32x160xf32>
    %175 = arith.maximumf %172, %174 : vector<32x160xf32>
    %c0_160 = arith.constant 0 : index
    %c0_161 = arith.constant 0 : index
    %c0_162 = arith.constant 0 : index
    %176 = vector.load %arg6[%c0_160, %c0_161, %c0_162] : memref<20x32x160xf32, #tpu.memory_space<vmem>>, vector<20x32x160xf32>
    %177 = vector.shape_cast %175 : vector<32x160xf32> to vector<1x32x160xf32>
    %178 = vector.broadcast %177 : vector<1x32x160xf32> to vector<20x32x160xf32>
    %179 = arith.mulf %176, %178 : vector<20x32x160xf32>
    %cst_163 = arith.constant dense<0.000000e+00> : vector<20x32xf32>
    %180 = vector.multi_reduction <add>, %179, %cst_163 [2] : vector<20x32x160xf32> to vector<20x32xf32>
    %cst_164 = arith.constant dense<0.000000e+00> : vector<20xf32>
    %181 = vector.multi_reduction <add>, %180, %cst_164 [1] : vector<20x32xf32> to vector<20xf32>
    %182 = vector.shape_cast %181 : vector<20xf32> to vector<20x1xf32>
    %c0_165 = arith.constant 0 : index
    %c0_166 = arith.constant 0 : index
    %183 = vector.load %arg7[%c0_165, %c0_166] : memref<20x1xf32, #tpu.memory_space<vmem>>, vector<20x1xf32>
    %184 = arith.addf %182, %183 : vector<20x1xf32>
    %cst_167 = arith.constant 0.00999999977 : f32
    %185 = vector.broadcast %cst_167 : f32 to vector<20x1xf32>
    %186 = arith.mulf %185, %184 : vector<20x1xf32>
    %187 = arith.maximumf %184, %186 : vector<20x1xf32>
    %c0_168 = arith.constant 0 : index
    %c0_169 = arith.constant 0 : index
    %c0_170 = arith.constant 0 : index
    %188 = vector.load %arg8[%c0_168, %c0_169, %c0_170] : memref<1x20x1xf32, #tpu.memory_space<vmem>>, vector<1x20x1xf32>
    %189 = vector.shape_cast %188 : vector<1x20x1xf32> to vector<20x1xf32>
    %190 = vector.shape_cast %187 : vector<20x1xf32> to vector<1x20x1xf32>
    tpu.vector_store %arg8[%c0_168, %c0_169, %c0_170], %190 {strides = array<i32>} : memref<1x20x1xf32, #tpu.memory_space<vmem>>, vector<1x20x1xf32>,
    return
  }
  func.func @transform_0(%arg0: i32) -> (i32, i32, i32, i32) {
    %c0_i32 = arith.constant 0 : i32
    %c0_i32_0 = arith.constant 0 : i32
    %c0_i32_1 = arith.constant 0 : i32
    %c0_i32_2 = arith.constant 0 : i32
    return %arg0, %c0_i32, %c0_i32_0, %c0_i32_1 : i32, i32, i32, i32
  }
  func.func @transform_1(%arg0: i32) -> (i32, i32) {
    %c0_i32 = arith.constant 0 : i32
    %c0_i32_0 = arith.constant 0 : i32
    %c0_i32_1 = arith.constant 0 : i32
    return %c0_i32, %c0_i32_0 : i32, i32
  }
  func.func @transform_2(%arg0: i32) -> (i32, i32) {
    %c0_i32 = arith.constant 0 : i32
    %c0_i32_0 = arith.constant 0 : i32
    %c0_i32_1 = arith.constant 0 : i32
    return %c0_i32, %c0_i32_0 : i32, i32
  }
  func.func @transform_3(%arg0: i32) -> (i32, i32) {
    %c0_i32 = arith.constant 0 : i32
    %c0_i32_0 = arith.constant 0 : i32
    %c0_i32_1 = arith.constant 0 : i32
    return %c0_i32, %c0_i32_0 : i32, i32
  }
  func.func @transform_4(%arg0: i32) -> (i32, i32) {
    %c0_i32 = arith.constant 0 : i32
    %c0_i32_0 = arith.constant 0 : i32
    %c0_i32_1 = arith.constant 0 : i32
    return %c0_i32, %c0_i32_0 : i32, i32
  }
  func.func @transform_5(%arg0: i32) -> (i32, i32, i32) {
    %c0_i32 = arith.constant 0 : i32
    %c0_i32_0 = arith.constant 0 : i32
    %c0_i32_1 = arith.constant 0 : i32
    %c0_i32_2 = arith.constant 0 : i32
    return %c0_i32, %c0_i32_0, %c0_i32_1 : i32, i32, i32
  }
  func.func @transform_6(%arg0: i32) -> (i32, i32) {
    %c0_i32 = arith.constant 0 : i32
    %c0_i32_0 = arith.constant 0 : i32
    %c0_i32_1 = arith.constant 0 : i32
    return %c0_i32, %c0_i32_0 : i32, i32
  }
  func.func @transform_7(%arg0: i32) -> (i32, i32, i32) {
    %c0_i32 = arith.constant 0 : i32
    %c0_i32_0 = arith.constant 0 : i32
    %c0_i32_1 = arith.constant 0 : i32
    return %arg0, %c0_i32, %c0_i32_0 : i32, i32, i32
  }
}

</mosaic_0001>

<bundles_post_ra>
// kernel: net_z_forward.1
= control target key start
LH: loop header
LB: loop body
LE: loop exit
PB: predicated region body
PF: predicated region fallthrough
CT: control target
= control target key end

     0   :  { %s4783_s24 = smov 0   ;;  %s7083_s0 = inlined_call_operand.vmem [shape: f32[2,20,8,160], index: 0, kind: input, shape index: {}]   ;;  %s7084_s1 = inlined_call_operand.vmem [shape: f32[32,8], index: 1, kind: input, shape index: {}]   ;;  %s7085_s2 = inlined_call_operand.vmem [shape: f32[32,192], index: 2, kind: input, shape index: {}]   ;;  %s7086_s3 = inlined_call_operand.vmem [shape: f32[32,128], index: 3, kind: input, shape index: {}]   ;;  %s7087_s4 = inlined_call_operand.vmem [shape: f32[32,2], index: 4, kind: input, shape index: {}]   ;;  %s7088_s5 = inlined_call_operand.vmem [shape: f32[20,32,160], index: 5, kind: input, shape index: {}]   ;;  %s7089_s6 = inlined_call_operand.vmem [shape: f32[20,1], index: 6, kind: input, shape index: {}]   ;;  %s7090_s7 = inlined_call_operand.vmem [shape: f32[2,20,1], index: 7, kind: output, shape index: {}]  }
   0x1 LB: > { %s4571_s25 = sadd.s32 4294967295, %s4738_s24   ;;  %p4575_p0 = scmp.ge.s32.totalorder %s4738_s24, 1  ;;  %s4738_s24 = sphi %s4783_s24, %s17_s24  }
   0x2   : > { %p237_p1 = scmp.lt.s32.totalorder %s4738_s24, 3 }
   0x4   : > { %p238_p2 = pnand %p4575_p0, %p237_p1 }
   0x6   : > { %241 = sbr.rel (%p238_p2) target bundleno = 1314 (0x522), region = 48 }
   0xb   : > { %p269_p3 = scmp.lt.s32.totalorder %s4571_s25, 1  ;;  %v7091_v0 = vmov 0.0   ;;  %v4804_v1 = vld [vmem:[%s7084_s1] sm:$0xff]  ;;  %vm285_vm0 = vcmask 64512   ;;  %v4813_v6 = vld [vmem:[%s7084_s1 + $0x10] sm:$0xff]  ;;  %v4824_v9 = vld [vmem:[%s7084_s1 + $0x8] sm:$0xff] }
   0xc   : > { %362 = vmatprep.mubr.f32.mxu0 %v7091_v0  ;;  %491 = vmatprep.mubr.f32.mxu1 %v7091_v0  ;;  %v4832_v11 = vld [vmem:[%s7084_s1 + $0x18] sm:$0xff]  ;;  %v2501_v43 = vld [vmem:[%s7085_s2 + $0x8] sm:$0xff]  ;;  %vm2580_vm1 = vcmask 523264   ;;  %vm404_vm2 = vcmask 261120   ;;  %vm4085_vm3 = vcmask 130112   ;;  %vm4092_vm4 = vcmask 195712  }
   0xd   : > { %s7132_s25 = smov (!%p269_p3, %s4571_s25), 1  ;;  %vm4099_vm5 = vcmask 261312   ;;  %vm4462_vm6 = vcmask 1041409   ;;  %vm4464_vm7 = vcmask 1042434   ;;  %vm4466_vm8 = vcmask 1043459  }
   0xe   : > { %s4710_s26 = smul.u32 320, %s7132_s25  ;;  %vm4468_vm9 = vcmask 1044484   ;;  %vm4470_vm10 = vcmask 1045509   ;;  %vm4472_vm11 = vcmask 1046534   ;;  %vm4474_vm12 = vcmask 1047559  }
   0xf   : > { %vm4495_vm13 = vcmask 257024   ;;  %s4711_s22 = smul.u32 24, %s7132_s25  ;;  %vm4511_vm14 = vcmask 7168   ;;  %vm4514_vm15 = vcmask 3072  }
  0x10   : > { %s4799_s29 = scalar_lea.vmem %s7083_s0, %s4710_s26 }
  0x11   : > { %v284_v2 = vld [vmem:[%s4799_s29 + $0x8] sm:$0xff]  ;;  %v283_v4 = vld [vmem:[%s4799_s29] sm:$0xff]  ;;  %v4589_v8 = vld [vmem:[%s4799_s29 + $0x38] sm:$0xff]  ;;  %s278_s8 = scalar_lea.vmem %s7090_s7, %s4711_s22 }
  0x12   : > { %v4583_v3 = vld [vmem:[%s4799_s29 + $0x28] sm:$0xff]  ;;  %328 = vmatprep.subr.mxu0 %v284_v2  ;;  %v4582_v5 = vld [vmem:[%s4799_s29 + $0x20] sm:$0xff]  ;;  %v4588_v15 = vld [vmem:[%s4799_s29 + $0x30] sm:$0xff] }
  0x13   : > { %4708 = vmatprep.subr.mxu1 %v4583_v3  ;;  %329 = vmatpush1.msra.mxu0 %v283_v4  ;;  %v4595_v7 = vld [vmem:[%s4799_s29 + $0x48] sm:$0xff]  ;;  %v4594_v10 = vld [vmem:[%s4799_s29 + $0x40] sm:$0xff]  ;;  %v4601_v16 = vld [vmem:[%s4799_s29 + $0x58] sm:$0xff] }
  0x14   : > { %4709 = vmatpush1.msra.mxu1 %v4582_v5  ;;  %4578 = vmatmul.mubr.msk.f32.vlgmr.msra.gmra.mxu0 %vm285_vm0, %v4804_v1  ;;  %v4607_v12 = vld [vmem:[%s4799_s29 + $0x68] sm:$0xff]  ;;  %v4606_v13 = vld [vmem:[%s4799_s29 + $0x60] sm:$0xff]  ;;  %v4600_v17 = vld [vmem:[%s4799_s29 + $0x50] sm:$0xff] }
  0x15   : > { %445 = vmatprep.subr.mxu0 %v4583_v3  ;;  %4586 = vmatmul.mubr.msk.f32.vlgmr.msra.gmra.mxu1 %vm285_vm0, %v4813_v6  ;;  %v4619_v14 = vld [vmem:[%s4799_s29 + $0x88] sm:$0xff]  ;;  %v4618_v18 = vld [vmem:[%s4799_s29 + $0x80] sm:$0xff]  ;;  %v4613_v19 = vld [vmem:[%s4799_s29 + $0x78] sm:$0xff] }
  0x16   : > { %446 = vmatpush1.msra.mxu0 %v4582_v5  ;;  %368 = vmatprep.mubr.f32.mxu0 %v7091_v0  ;;  %v4631_v20 = vld [vmem:[%s4799_s29 + $0xa8] sm:$0xff]  ;;  %v4612_v21 = vld [vmem:[%s4799_s29 + $0x70] sm:$0xff]  ;;  %v4630_v22 = vld [vmem:[%s4799_s29 + $0xa0] sm:$0xff] }
  0x17   : > { %497 = vmatprep.mubr.f32.mxu1 %v7091_v0  ;;  %677 = vmatprep.subr.mxu1 %v4595_v7  ;;  %v4625_v23 = vld [vmem:[%s4799_s29 + $0x98] sm:$0xff]  ;;  %v4643_v24 = vld [vmem:[%s4799_s29 + $0xc8] sm:$0xff]  ;;  %v4624_v25 = vld [vmem:[%s4799_s29 + $0x90] sm:$0xff] }
  0x18   : > { %561 = vmatprep.subr.mxu0 %v4589_v8  ;;  %4579 = vmatmul.mubr.msk.f32.gmra.mxu0 %vm285_vm0, %v4824_v9  ;;  %v4642_v26 = vld [vmem:[%s4799_s29 + $0xc0] sm:$0xff]  ;;  %v4637_v27 = vld [vmem:[%s4799_s29 + $0xb8] sm:$0xff]  ;;  %v4655_v28 = vld [vmem:[%s4799_s29 + $0xe8] sm:$0xff] }
  0x19   : > { %678 = vmatpush1.msra.mxu1 %v4594_v10  ;;  %374 = vmatprep.mubr.f32.mxu0 %v7091_v0  ;;  %v4636_v29 = vld [vmem:[%s4799_s29 + $0xb0] sm:$0xff]  ;;  %v4649_v30 = vld [vmem:[%s4799_s29 + $0xd8] sm:$0xff]  ;;  %v4654_v31 = vld [vmem:[%s4799_s29 + $0xe0] sm:$0xff] }
  0x1a   : > { %4587 = vmatmul.mubr.msk.f32.gmra.mxu1 %vm285_vm0, %v4832_v11  ;;  %909 = vmatprep.subr.mxu1 %v4607_v12  ;;  %v4667_v32 = vld [vmem:[%s4799_s29 + $0x108] sm:$0xff]  ;;  %v4648_v33 = vld [vmem:[%s4799_s29 + $0xd0] sm:$0xff]  ;;  %v4661_v34 = vld [vmem:[%s4799_s29 + $0xf8] sm:$0xff] }
  0x1b   : > { %711 = vmatprep.mubr.f32.mxu1 %v7091_v0  ;;  %v4666_v35 = vld [vmem:[%s4799_s29 + $0x100] sm:$0xff]  ;;  %v4660_v36 = vld [vmem:[%s4799_s29 + $0xf0] sm:$0xff]  ;;  %v4673_v37 = vld [vmem:[%s4799_s29 + $0x118] sm:$0xff] }
  0x1c   : > { %4580 = vmatmul.mubr.msk.f32.gmra.mxu0 %vm285_vm0, %v4813_v6  ;;  %v4679_v38 = vld [vmem:[%s4799_s29 + $0x128] sm:$0xff]  ;;  %v4678_v39 = vld [vmem:[%s4799_s29 + $0x120] sm:$0xff]  ;;  %v4672_v40 = vld [vmem:[%s4799_s29 + $0x110] sm:$0xff] }
  0x1d   : > { %380 = vmatprep.mubr.f32.mxu0 %v7091_v0  ;;  %v4685_v41 = vld [vmem:[%s4799_s29 + $0x138] sm:$0xff]  ;;  %v4684_v42 = vld [vmem:[%s4799_s29 + $0x130] sm:$0xff] }
  0x1e   : > { %4596 = vmatmul.mubr.msk.f32.vlgmr.msra.gmra.mxu1 %vm285_vm0, %v4804_v1 }
  0x1f   : > { %717 = vmatprep.mubr.f32.mxu1 %v7091_v0  ;;  %910 = vmatpush1.msra.mxu1 %v4606_v13 }
  0x20   : > { %1141 = vmatprep.subr.mxu1 %v4619_v14  ;;  %4581 = vmatmul.mubr.msk.f32.gmra.mxu0 %vm285_vm0, %v4832_v11 }
  0x21   : > { %479 = vmatprep.mubr.f32.mxu0 %v7091_v0 }
  0x22   : > { %4597 = vmatmul.mubr.msk.f32.gmra.mxu1 %vm285_vm0, %v4824_v9 }
  0x23   : > { %723 = vmatprep.mubr.f32.mxu1 %v7091_v0 }
  0x24   : > { %4584 = vmatmul.mubr.msk.f32.vlgmr.msra.gmra.mxu0 %vm285_vm0, %v4804_v1 }
  0x25   : > { %562 = vmatpush1.msra.mxu0 %v4588_v15  ;;  %485 = vmatprep.mubr.f32.mxu0 %v7091_v0 }
  0x26   : > { %4598 = vmatmul.mubr.msk.f32.gmra.mxu1 %vm285_vm0, %v4813_v6  ;;  %793 = vmatprep.subr.mxu0 %v4601_v16 }
  0x27   : > { %729 = vmatprep.mubr.f32.mxu1 %v7091_v0 }
  0x28   : > { %4585 = vmatmul.mubr.msk.f32.gmra.mxu0 %vm285_vm0, %v4824_v9 }
  0x29   : > { %595 = vmatprep.mubr.f32.mxu0 %v7091_v0 }
  0x2a   : > { %4599 = vmatmul.mubr.msk.f32.gmra.mxu1 %vm285_vm0, %v4832_v11 }
  0x2b   : > { %943 = vmatprep.mubr.f32.mxu1 %v7091_v0 }
  0x2c   : > { %4590 = vmatmul.mubr.msk.f32.vlgmr.msra.gmra.mxu0 %vm285_vm0, %v4804_v1 }
  0x2d   : > { %794 = vmatpush1.msra.mxu0 %v4600_v17  ;;  %601 = vmatprep.mubr.f32.mxu0 %v7091_v0 }
  0x2e   : > { %4608 = vmatmul.mubr.msk.f32.vlgmr.msra.gmra.mxu1 %vm285_vm0, %v4804_v1  ;;  %1025 = vmatprep.subr.mxu0 %v4613_v19 }
  0x2f   : > { %949 = vmatprep.mubr.f32.mxu1 %v7091_v0  ;;  %1142 = vmatpush1.msra.mxu1 %v4618_v18 }
  0x30   : > { %4591 = vmatmul.mubr.msk.f32.gmra.mxu0 %vm285_vm0, %v4824_v9  ;;  %1373 = vmatprep.subr.mxu1 %v4631_v20 }
  0x31   : > { %607 = vmatprep.mubr.f32.mxu0 %v7091_v0 }
  0x32   : > { %4609 = vmatmul.mubr.msk.f32.gmra.mxu1 %vm285_vm0, %v4824_v9 }
  0x33   : > { %955 = vmatprep.mubr.f32.mxu1 %v7091_v0 }
  0x34   : > { %4592 = vmatmul.mubr.msk.f32.gmra.mxu0 %vm285_vm0, %v4813_v6 }
  0x35   : > { %613 = vmatprep.mubr.f32.mxu0 %v7091_v0 }
  0x36   : > { %4610 = vmatmul.mubr.msk.f32.gmra.mxu1 %vm285_vm0, %v4813_v6 }
  0x37   : > { %961 = vmatprep.mubr.f32.mxu1 %v7091_v0 }
  0x38   : > { %4593 = vmatmul.mubr.msk.f32.gmra.mxu0 %vm285_vm0, %v4832_v11 }
  0x39   : > { %827 = vmatprep.mubr.f32.mxu0 %v7091_v0 }
  0x3a   : > { %4611 = vmatmul.mubr.msk.f32.gmra.mxu1 %vm285_vm0, %v4832_v11 }
  0x3b   : > { %1175 = vmatprep.mubr.f32.mxu1 %v7091_v0 }
  0x3c   : > { %4602 = vmatmul.mubr.msk.f32.vlgmr.msra.gmra.mxu0 %vm285_vm0, %v4804_v1 }
  0x3d   : > { %1026 = vmatpush1.msra.mxu0 %v4612_v21  ;;  %833 = vmatprep.mubr.f32.mxu0 %v7091_v0 }
  0x3e   : > { %4620 = vmatmul.mubr.msk.f32.vlgmr.msra.gmra.mxu1 %vm285_vm0, %v4804_v1  ;;  %1257 = vmatprep.subr.mxu0 %v4625_v23 }
  0x3f   : > { %1181 = vmatprep.mubr.f32.mxu1 %v7091_v0  ;;  %1374 = vmatpush1.msra.mxu1 %v4630_v22 }
  0x40   : > { %4603 = vmatmul.mubr.msk.f32.gmra.mxu0 %vm285_vm0, %v4824_v9  ;;  %1605 = vmatprep.subr.mxu1 %v4643_v24 }
  0x41   : > { %839 = vmatprep.mubr.f32.mxu0 %v7091_v0 }
  0x42   : > { %4621 = vmatmul.mubr.msk.f32.gmra.mxu1 %vm285_vm0, %v4824_v9 }
  0x43   : > { %1187 = vmatprep.mubr.f32.mxu1 %v7091_v0 }
  0x44   : > { %4604 = vmatmul.mubr.msk.f32.gmra.mxu0 %vm285_vm0, %v4813_v6 }
  0x45   : > { %845 = vmatprep.mubr.f32.mxu0 %v7091_v0 }
  0x46   : > { %4622 = vmatmul.mubr.msk.f32.gmra.mxu1 %vm285_vm0, %v4813_v6 }
  0x47   : > { %1193 = vmatprep.mubr.f32.mxu1 %v7091_v0 }
  0x48   : > { %4605 = vmatmul.mubr.msk.f32.gmra.mxu0 %vm285_vm0, %v4832_v11 }
  0x49   : > { %1059 = vmatprep.mubr.f32.mxu0 %v7091_v0 }
  0x4a   : > { %4623 = vmatmul.mubr.msk.f32.gmra.mxu1 %vm285_vm0, %v4832_v11 }
  0x4b   : > { %1407 = vmatprep.mubr.f32.mxu1 %v7091_v0 }
  0x4c   : > { %4614 = vmatmul.mubr.msk.f32.vlgmr.msra.gmra.mxu0 %vm285_vm0, %v4804_v1 }
  0x4d   : > { %1258 = vmatpush1.msra.mxu0 %v4624_v25  ;;  %1065 = vmatprep.mubr.f32.mxu0 %v7091_v0 }
  0x4e   : > { %4632 = vmatmul.mubr.msk.f32.vlgmr.msra.gmra.mxu1 %vm285_vm0, %v4804_v1  ;;  %1489 = vmatprep.subr.mxu0 %v4637_v27 }
  0x4f   : > { %1413 = vmatprep.mubr.f32.mxu1 %v7091_v0  ;;  %1606 = vmatpush1.msra.mxu1 %v4642_v26 }
  0x50   : > { %4615 = vmatmul.mubr.msk.f32.gmra.mxu0 %vm285_vm0, %v4824_v9  ;;  %1837 = vmatprep.subr.mxu1 %v4655_v28 }
  0x51   : > { %1071 = vmatprep.mubr.f32.mxu0 %v7091_v0 }
  0x52   : > { %4633 = vmatmul.mubr.msk.f32.gmra.mxu1 %vm285_vm0, %v4824_v9 }
  0x53   : > { %1419 = vmatprep.mubr.f32.mxu1 %v7091_v0 }
  0x54   : > { %4616 = vmatmul.mubr.msk.f32.gmra.mxu0 %vm285_vm0, %v4813_v6 }
  0x55   : > { %1077 = vmatprep.mubr.f32.mxu0 %v7091_v0 }
  0x56   : > { %4634 = vmatmul.mubr.msk.f32.gmra.mxu1 %vm285_vm0, %v4813_v6 }
  0x57   : > { %1425 = vmatprep.mubr.f32.mxu1 %v7091_v0 }
  0x58   : > { %4617 = vmatmul.mubr.msk.f32.gmra.mxu0 %vm285_vm0, %v4832_v11 }
  0x59   : > { %1291 = vmatprep.mubr.f32.mxu0 %v7091_v0 }
  0x5a   : > { %4635 = vmatmul.mubr.msk.f32.gmra.mxu1 %vm285_vm0, %v4832_v11 }
  0x5b   : > { %1639 = vmatprep.mubr.f32.mxu1 %v7091_v0 }
  0x5c   : > { %4626 = vmatmul.mubr.msk.f32.vlgmr.msra.gmra.mxu0 %vm285_vm0, %v4804_v1 }
  0x5d   : > { %1490 = vmatpush1.msra.mxu0 %v4636_v29  ;;  %1297 = vmatprep.mubr.f32.mxu0 %v7091_v0 }
  0x5e   : > { %4644 = vmatmul.mubr.msk.f32.vlgmr.msra.gmra.mxu1 %vm285_vm0, %v4804_v1  ;;  %1721 = vmatprep.subr.mxu0 %v4649_v30 }
  0x5f   : > { %1645 = vmatprep.mubr.f32.mxu1 %v7091_v0  ;;  %1838 = vmatpush1.msra.mxu1 %v4654_v31 }
  0x60   : > { %4627 = vmatmul.mubr.msk.f32.gmra.mxu0 %vm285_vm0, %v4824_v9  ;;  %2069 = vmatprep.subr.mxu1 %v4667_v32 }
  0x61   : > { %1303 = vmatprep.mubr.f32.mxu0 %v7091_v0 }
  0x62   : > { %4645 = vmatmul.mubr.msk.f32.gmra.mxu1 %vm285_vm0, %v4824_v9 }
  0x63   : > { %1651 = vmatprep.mubr.f32.mxu1 %v7091_v0 }
  0x64   : > { %4628 = vmatmul.mubr.msk.f32.gmra.mxu0 %vm285_vm0, %v4813_v6 }
  0x65   : > { %1309 = vmatprep.mubr.f32.mxu0 %v7091_v0 }
  0x66   : > { %4646 = vmatmul.mubr.msk.f32.gmra.mxu1 %vm285_vm0, %v4813_v6 }
  0x67   : > { %1657 = vmatprep.mubr.f32.mxu1 %v7091_v0 }
  0x68   : > { %4629 = vmatmul.mubr.msk.f32.gmra.mxu0 %vm285_vm0, %v4832_v11 }
  0x69   : > { %1523 = vmatprep.mubr.f32.mxu0 %v7091_v0 }
  0x6a   : > { %4647 = vmatmul.mubr.msk.f32.gmra.mxu1 %vm285_vm0, %v4832_v11 }
  0x6b   : > { %1871 = vmatprep.mubr.f32.mxu1 %v7091_v0 }
  0x6c   : > { %4638 = vmatmul.mubr.msk.f32.vlgmr.msra.gmra.mxu0 %vm285_vm0, %v4804_v1 }
  0x6d   : > { %1722 = vmatpush1.msra.mxu0 %v4648_v33  ;;  %1529 = vmatprep.mubr.f32.mxu0 %v7091_v0 }
  0x6e   : > { %4656 = vmatmul.mubr.msk.f32.vlgmr.msra.gmra.mxu1 %vm285_vm0, %v4804_v1  ;;  %1953 = vmatprep.subr.mxu0 %v4661_v34 }
  0x6f   : > { %1877 = vmatprep.mubr.f32.mxu1 %v7091_v0  ;;  %2070 = vmatpush1.msra.mxu1 %v4666_v35 }
  0x70   : > { %4639 = vmatmul.mubr.msk.f32.gmra.mxu0 %vm285_vm0, %v4824_v9  ;;  %2301 = vmatprep.subr.mxu1 %v4679_v38 }
  0x71   : > { %1535 = vmatprep.mubr.f32.mxu0 %v7091_v0 }
  0x72   : > { %4657 = vmatmul.mubr.msk.f32.gmra.mxu1 %vm285_vm0, %v4824_v9 }
  0x73   : > { %1883 = vmatprep.mubr.f32.mxu1 %v7091_v0 }
  0x74   : > { %4640 = vmatmul.mubr.msk.f32.gmra.mxu0 %vm285_vm0, %v4813_v6 }
  0x75   : > { %1541 = vmatprep.mubr.f32.mxu0 %v7091_v0 }
  0x76   : > { %4658 = vmatmul.mubr.msk.f32.gmra.mxu1 %vm285_vm0, %v4813_v6 }
  0x77   : > { %1889 = vmatprep.mubr.f32.mxu1 %v7091_v0 }
  0x78   : > { %4641 = vmatmul.mubr.msk.f32.gmra.mxu0 %vm285_vm0, %v4832_v11 }
  0x79   : > { %1755 = vmatprep.mubr.f32.mxu0 %v7091_v0 }
  0x7a   : > { %4659 = vmatmul.mubr.msk.f32.gmra.mxu1 %vm285_vm0, %v4832_v11 }
  0x7b   : > { %2103 = vmatprep.mubr.f32.mxu1 %v7091_v0 }
  0x7c   : > { %4650 = vmatmul.mubr.msk.f32.vlgmr.msra.gmra.mxu0 %vm285_vm0, %v4804_v1 }
  0x7d   : > { %1954 = vmatpush1.msra.mxu0 %v4660_v36  ;;  %1761 = vmatprep.mubr.f32.mxu0 %v7091_v0 }
  0x7e   : > { %4668 = vmatmul.mubr.msk.f32.vlgmr.msra.gmra.mxu1 %vm285_vm0, %v4804_v1  ;;  %2185 = vmatprep.subr.mxu0 %v4673_v37 }
  0x7f   : > { %2109 = vmatprep.mubr.f32.mxu1 %v7091_v0  ;;  %2302 = vmatpush1.msra.mxu1 %v4678_v39 }
  0x80   : > { %4651 = vmatmul.mubr.msk.f32.gmra.mxu0 %vm285_vm0, %v4824_v9 }
  0x81   : > { %1767 = vmatprep.mubr.f32.mxu0 %v7091_v0 }
  0x82   : > { %4669 = vmatmul.mubr.msk.f32.gmra.mxu1 %vm285_vm0, %v4824_v9 }
  0x83   : > { %2115 = vmatprep.mubr.f32.mxu1 %v7091_v0 }
  0x84   : > { %4652 = vmatmul.mubr.msk.f32.gmra.mxu0 %vm285_vm0, %v4813_v6 }
  0x85   : > { %1773 = vmatprep.mubr.f32.mxu0 %v7091_v0 }
  0x86   : > { %4670 = vmatmul.mubr.msk.f32.gmra.mxu1 %vm285_vm0, %v4813_v6 }
  0x87   : > { %2121 = vmatprep.mubr.f32.mxu1 %v7091_v0 }
  0x88   : > { %4653 = vmatmul.mubr.msk.f32.gmra.mxu0 %vm285_vm0, %v4832_v11 }
  0x89   : > { %1987 = vmatprep.mubr.f32.mxu0 %v7091_v0 }
  0x8a   : > { %4671 = vmatmul.mubr.msk.f32.gmra.mxu1 %vm285_vm0, %v4832_v11 }
  0x8b   : > { %2335 = vmatprep.mubr.f32.mxu1 %v7091_v0 }
  0x8c   : > { %4662 = vmatmul.mubr.msk.f32.vlgmr.msra.gmra.mxu0 %vm285_vm0, %v4804_v1 }
  0x8d   : > { %2186 = vmatpush1.msra.mxu0 %v4672_v40  ;;  %1993 = vmatprep.mubr.f32.mxu0 %v7091_v0 }
  0x8e   : > { %2417 = vmatprep.subr.mxu0 %v4685_v41  ;;  %4680 = vmatmul.mubr.msk.f32.vlgmr.msra.gmra.mxu1 %vm285_vm0, %v4804_v1 }
  0x8f   : > { %2341 = vmatprep.mubr.f32.mxu1 %v7091_v0 }
  0x90   : > { %4663 = vmatmul.mubr.msk.f32.gmra.mxu0 %vm285_vm0, %v4824_v9 }
  0x91   : > { %1999 = vmatprep.mubr.f32.mxu0 %v7091_v0 }
  0x92   : > { %4681 = vmatmul.mubr.msk.f32.gmra.mxu1 %vm285_vm0, %v4824_v9 }
  0x93   : > { %2347 = vmatprep.mubr.f32.mxu1 %v7091_v0 }
  0x94   : > { %4664 = vmatmul.mubr.msk.f32.gmra.mxu0 %vm285_vm0, %v4813_v6 }
  0x95   : > { %2005 = vmatprep.mubr.f32.mxu0 %v7091_v0 }
  0x96   : > { %4682 = vmatmul.mubr.msk.f32.gmra.mxu1 %vm285_vm0, %v4813_v6 }
  0x97   : > { %2353 = vmatprep.mubr.f32.mxu1 %v7091_v0 }
  0x98   : > { %4665 = vmatmul.mubr.msk.f32.gmra.mxu0 %vm285_vm0, %v4832_v11 }
  0x99   : > { %2219 = vmatprep.mubr.f32.mxu0 %v7091_v0 }
  0x9a   : > { %4683 = vmatmul.mubr.msk.f32.gmra.mxu1 %vm285_vm0, %v4832_v11 }
  0x9b   : > { %4690 = vmatprep.mubr.msk.f32.mxu1 %vm2580_vm1, %v2501_v43 }
  0x9c   : > { %4674 = vmatmul.mubr.msk.f32.vlgmr.msra.gmra.mxu0 %vm285_vm0, %v4804_v1 }
  0x9d   : > { %2418 = vmatpush1.msra.mxu0 %v4684_v42  ;;  %2225 = vmatprep.mubr.f32.mxu0 %v7091_v0 }
  0xa0   : > { %4675 = vmatmul.mubr.msk.f32.gmra.mxu0 %vm285_vm0, %v4824_v9 }
  0xa1   : > { %2231 = vmatprep.mubr.f32.mxu0 %v7091_v0 }
  0xa4   : > { %4676 = vmatmul.mubr.msk.f32.gmra.mxu0 %vm285_vm0, %v4813_v6 }
  0xa5   : > { %2237 = vmatprep.mubr.f32.mxu0 %v7091_v0 }
  0xa8   : > { %4677 = vmatmul.mubr.msk.f32.gmra.mxu0 %vm285_vm0, %v4832_v11 }
  0xa9   : > { %2451 = vmatprep.mubr.f32.mxu0 %v7091_v0 }
  0xac   : > { %4686 = vmatmul.mubr.msk.f32.vlgmr.msra.gmra.mxu0 %vm285_vm0, %v4804_v1 }
  0xad   : > { %2457 = vmatprep.mubr.f32.mxu0 %v7091_v0 }
  0xb0   : > { %4687 = vmatmul.mubr.msk.f32.gmra.mxu0 %vm285_vm0, %v4824_v9 }
  0xb1   : > { %2463 = vmatprep.mubr.f32.mxu0 %v7091_v0 }
  0xb4   : > { %4688 = vmatmul.mubr.msk.f32.gmra.mxu0 %vm285_vm0, %v4813_v6 }
  0xb5   : > { %2469 = vmatprep.mubr.f32.mxu0 %v7091_v0 }
  0xb8   : > { %4689 = vmatmul.mubr.msk.f32.gmra.mxu0 %vm285_vm0, %v4832_v11 }
  0xb9   : > { %4694 = vmatprep.mubr.msk.f32.mxu0 %vm2580_vm1, %v2501_v43 }
  0xd4   : > { %v5090_v44 = vpop.f32.mrf.mxu0 }
  0xd5   : > { %v5093_v45 = vmul.f32 0.01, %v5090_v44  ;;  %v5095_v46 = vpop.f32.mrf.mxu1 }
  0xd6   : > { %v5098_v47 = vmul.f32 0.01, %v5095_v46  ;;  %v366_v48 = vpop.f32.mrf.mxu0 }
  0xd7   : > { %v388_v50 = vmul.f32 0.01, %v366_v48  ;;  %v495_v51 = vpop.f32.mrf.mxu1 }
  0xd8   : > { %v516_v52 = vmax.f32 %v5095_v46, %v5098_v47  ;;  %v509_v53 = vmul.f32 0.01, %v495_v51  ;;  %v5104_v54 = vpop.f32.mrf.mxu0 }
  0xd9   : > { %v396_v55 = vmax.f32 %v366_v48, %v388_v50  ;;  %v5107_v56 = vmul.f32 0.01, %v5104_v54 }
  0xda   : > { %v5109_v57 = vpop.f32.mrf.mxu1  ;;  %v517_v58 = vmax.f32 %v495_v51, %v509_v53  ;;  %v372_v60 = vpop.f32.mrf.mxu0 }
  0xdb   : > { %v5112_v59 = vmul.f32 0.01, %v5109_v57  ;;  %405 = vst.msk [vmem:[#allocation2 + $0x8] sm:$0xff] %vm404_vm2, %v396_v55  ;;  %v390_v62 = vmul.f32 0.01, %v372_v60 }
  0xdc   : > { %v501_v63 = vpop.f32.mrf.mxu1  ;;  %525 = vst.msk [vmem:[#allocation2 + $0x68] sm:$0xff] %vm404_vm2, %v517_v58  ;;  %v5120_v3 = vpop.f32.mrf.mxu0 }
  0xdd   : > { %v518_v1 = vmax.f32 %v5109_v57, %v5112_v59  ;;  %v511_v2 = vmul.f32 0.01, %v501_v63  ;;  %v398_v4 = vmax.f32 %v372_v60, %v390_v62  ;;  %v5123_v5 = vmul.f32 0.01, %v5120_v3 }
  0xde   : > { %v5125_v6 = vpop.f32.mrf.mxu1  ;;  %v378_v9 = vpop.f32.mrf.mxu0 }
  0xdf   : > { %v519_v7 = vmax.f32 %v501_v63, %v511_v2  ;;  %v5128_v8 = vmul.f32 0.01, %v5125_v6  ;;  %407 = vst.msk [vmem:[#allocation2 + $0x18] sm:$0xff] %vm404_vm2, %v398_v4  ;;  %v392_v11 = vmul.f32 0.01, %v378_v9 }
  0xe0   : > { %v715_v12 = vpop.f32.mrf.mxu1  ;;  %v5136_v15 = vpop.f32.mrf.mxu0 }
  0xe1   : > { %527 = vst.msk [vmem:[#allocation2 + $0x78] sm:$0xff] %vm404_vm2, %v519_v7  ;;  %v744_v13 = vmax.f32 %v5125_v6, %v5128_v8  ;;  %v737_v14 = vmul.f32 0.01, %v715_v12  ;;  %v400_v16 = vmax.f32 %v378_v9, %v392_v11  ;;  %v5139_v17 = vmul.f32 0.01, %v5136_v15 }
  0xe2   : > { %v5141_v18 = vpop.f32.mrf.mxu1  ;;  %v384_v21 = vpop.f32.mrf.mxu0 }
  0xe3   : > { %v745_v19 = vmax.f32 %v715_v12, %v737_v14  ;;  %v5144_v20 = vmul.f32 0.01, %v5141_v18  ;;  %409 = vst.msk [vmem:[#allocation2 + $0x28] sm:$0xff] %vm404_vm2, %v400_v16  ;;  %v394_v23 = vmul.f32 0.01, %v384_v21 }
  0xe4   : > { %v721_v24 = vpop.f32.mrf.mxu1  ;;  %v5152_v27 = vpop.f32.mrf.mxu0 }
  0xe5   : > { %753 = vst.msk [vmem:[#allocation2 + $0x88] sm:$0xff] %vm404_vm2, %v745_v19  ;;  %v746_v25 = vmax.f32 %v5141_v18, %v5144_v20  ;;  %v739_v26 = vmul.f32 0.01, %v721_v24  ;;  %v402_v28 = vmax.f32 %v384_v21, %v394_v23  ;;  %v5155_v29 = vmul.f32 0.01, %v5152_v27 }
  0xe6   : > { %v5157_v30 = vpop.f32.mrf.mxu1  ;;  %v483_v33 = vpop.f32.mrf.mxu0 }
  0xe7   : > { %v747_v31 = vmax.f32 %v721_v24, %v739_v26  ;;  %v5160_v32 = vmul.f32 0.01, %v5157_v30  ;;  %411 = vst.msk [vmem:[#allocation2 + $0x38] sm:$0xff] %vm404_vm2, %v402_v28  ;;  %v505_v35 = vmul.f32 0.01, %v483_v33 }
  0xe8   : > { %v727_v36 = vpop.f32.mrf.mxu1  ;;  %v5168_v39 = vpop.f32.mrf.mxu0 }
  0xe9   : > { %755 = vst.msk [vmem:[#allocation2 + $0x98] sm:$0xff] %vm404_vm2, %v747_v31  ;;  %v748_v37 = vmax.f32 %v5157_v30, %v5160_v32  ;;  %v741_v38 = vmul.f32 0.01, %v727_v36  ;;  %v513_v40 = vmax.f32 %v483_v33, %v505_v35  ;;  %v5171_v41 = vmul.f32 0.01, %v5168_v39  ;;  %v2547_v30 = vld [vmem:[#allocation2 + $0x78] sm:$0xff] }
  0xea   : > { %v5173_v42 = vpop.f32.mrf.mxu1  ;;  %v489_v50 = vpop.f32.mrf.mxu0 }
  0xeb   : > { %v749_v43 = vmax.f32 %v727_v36, %v741_v38  ;;  %v5176_v48 = vmul.f32 0.01, %v5173_v42  ;;  %521 = vst.msk [vmem:[#allocation2 + $0x48] sm:$0xff] %vm404_vm2, %v513_v40  ;;  %v514_v51 = vmax.f32 %v5168_v39, %v5171_v41  ;;  %v507_v53 = vmul.f32 0.01, %v489_v50 }
  0xec   : > { %v733_v55 = vpop.f32.mrf.mxu1  ;;  %v597_v62 = vpop.f32.mrf.mxu0 }
  0xed   : > { %757 = vst.msk [vmem:[#allocation2 + $0xa8] sm:$0xff] %vm404_vm2, %v749_v43  ;;  %v750_v58 = vmax.f32 %v5173_v42, %v5176_v48  ;;  %v743_v60 = vmul.f32 0.01, %v733_v55  ;;  %v515_v63 = vmax.f32 %v489_v50, %v507_v53  ;;  %v620_v2 = vmul.f32 0.01, %v597_v62 }
  0xee   : > { %v945_v4 = vpop.f32.mrf.mxu1  ;;  %v599_v11 = vpop.f32.mrf.mxu0 }
  0xef   : > { %v751_v7 = vmax.f32 %v733_v55, %v743_v60  ;;  %v968_v9 = vmul.f32 0.01, %v945_v4  ;;  %523 = vst.msk [vmem:[#allocation2 + $0x58] sm:$0xff] %vm404_vm2, %v515_v63  ;;  %v628_v12 = vmax.f32 %v597_v62, %v620_v2  ;;  %v621_v14 = vmul.f32 0.01, %v599_v11 }
  0xf0   : > { %v947_v16 = vpop.f32.mrf.mxu1  ;;  %v603_v23 = vpop.f32.mrf.mxu0 }
  0xf1   : > { %759 = vst.msk [vmem:[#allocation2 + $0xb8] sm:$0xff] %vm404_vm2, %v751_v7  ;;  %v5186_v19 = vmax.f32 %v945_v4, %v968_v9  ;;  %v969_v21 = vmul.f32 0.01, %v947_v16  ;;  %636 = vst [vmem:[#allocation3 + $0x40] sm:$0xff] %v628_v12  ;;  %v629_v24 = vmax.f32 %v599_v11, %v621_v14  ;;  %v622_v26 = vmul.f32 0.01, %v603_v23 }
  0xf2   : > { %v951_v28 = vpop.f32.mrf.mxu1  ;;  %v605_v35 = vpop.f32.mrf.mxu0 }
  0xf3   : > { %984 = vst [vmem:[#allocation2 + $0xc0] sm:$0xff] %v5186_v19  ;;  %v977_v31 = vmax.f32 %v947_v16, %v969_v21  ;;  %v970_v33 = vmul.f32 0.01, %v951_v28  ;;  %637 = vst.msk [vmem:[#allocation3 + $0x48] sm:$0xff] %vm404_vm2, %v629_v24  ;;  %v630_v36 = vmax.f32 %v603_v23, %v622_v26  ;;  %v623_v38 = vmul.f32 0.01, %v605_v35 }
  0xf4   : > { %v953_v40 = vpop.f32.mrf.mxu1  ;;  %v609_v53 = vpop.f32.mrf.mxu0 }
  0xf5   : > { %985 = vst.msk [vmem:[#allocation2 + $0xc8] sm:$0xff] %vm404_vm2, %v977_v31  ;;  %v5191_v43 = vmax.f32 %v951_v28, %v970_v33  ;;  %v971_v50 = vmul.f32 0.01, %v953_v40  ;;  %638 = vst [vmem:[#allocation3 + $0x50] sm:$0xff] %v630_v36  ;;  %v631_v55 = vmax.f32 %v605_v35, %v623_v38  ;;  %v624_v60 = vmul.f32 0.01, %v609_v53 }
  0xf6   : > { %v957_v62 = vpop.f32.mrf.mxu1  ;;  %v611_v4 = vpop.f32.mrf.mxu0 }
  0xf7   : > { %986 = vst [vmem:[#allocation2 + $0xd0] sm:$0xff] %v5191_v43  ;;  %v979_v63 = vmax.f32 %v953_v40, %v971_v50  ;;  %v972_v2 = vmul.f32 0.01, %v957_v62  ;;  %639 = vst.msk [vmem:[#allocation3 + $0x58] sm:$0xff] %vm404_vm2, %v631_v55  ;;  %v632_v7 = vmax.f32 %v609_v53, %v624_v60  ;;  %v625_v9 = vmul.f32 0.01, %v611_v4 }
  0xf8   : > { %v959_v11 = vpop.f32.mrf.mxu1  ;;  %v615_v16 = vpop.f32.mrf.mxu0  ;;  %v2555_v49 = vld [vmem:[#allocation2 + $0xb8] sm:$0xff] }
  0xf9   : > { %987 = vst.msk [vmem:[#allocation2 + $0xd8] sm:$0xff] %vm404_vm2, %v979_v63  ;;  %v5196_v12 = vmax.f32 %v957_v62, %v972_v2  ;;  %v973_v14 = vmul.f32 0.01, %v959_v11  ;;  %640 = vst [vmem:[#allocation3 + $0x60] sm:$0xff] %v632_v7  ;;  %v633_v21 = vmax.f32 %v611_v4, %v625_v9  ;;  %v626_v23 = vmul.f32 0.01, %v615_v16 }
  0xfa   : > { %v963_v24 = vpop.f32.mrf.mxu1  ;;  %v617_v31 = vpop.f32.mrf.mxu0 }
  0xfb   : > { %988 = vst [vmem:[#allocation2 + $0xe0] sm:$0xff] %v5196_v12  ;;  %v981_v26 = vmax.f32 %v959_v11, %v973_v14  ;;  %v974_v28 = vmul.f32 0.01, %v963_v24  ;;  %641 = vst.msk [vmem:[#allocation3 + $0x68] sm:$0xff] %vm404_vm2, %v633_v21  ;;  %v634_v33 = vmax.f32 %v615_v16, %v626_v23  ;;  %v627_v35 = vmul.f32 0.01, %v617_v31 }
  0xfc   : > { %v965_v36 = vpop.f32.mrf.mxu1  ;;  %v829_v50 = vpop.f32.mrf.mxu0 }
  0xfd   : > { %989 = vst.msk [vmem:[#allocation2 + $0xe8] sm:$0xff] %vm404_vm2, %v981_v26  ;;  %v982_v38 = vmax.f32 %v963_v24, %v974_v28  ;;  %v975_v40 = vmul.f32 0.01, %v965_v36  ;;  %642 = vst [vmem:[#allocation3 + $0x70] sm:$0xff] %v634_v33  ;;  %v635_v53 = vmax.f32 %v617_v31, %v627_v35  ;;  %v852_v55 = vmul.f32 0.01, %v829_v50 }
  0xfe   : > { %v1177_v60 = vpop.f32.mrf.mxu1  ;;  %v831_v2 = vpop.f32.mrf.mxu0 }
  0xff   : > { %990 = vst [vmem:[#allocation2 + $0xf0] sm:$0xff] %v982_v38  ;;  %v983_v62 = vmax.f32 %v965_v36, %v975_v40  ;;  %v1200_v63 = vmul.f32 0.01, %v1177_v60  ;;  %643 = vst.msk [vmem:[#allocation3 + $0x78] sm:$0xff] %vm404_vm2, %v635_v53  ;;  %v860_v4 = vmax.f32 %v829_v50, %v852_v55  ;;  %v853_v7 = vmul.f32 0.01, %v831_v2 }
 0x100   : > { %v1179_v9 = vpop.f32.mrf.mxu1  ;;  %v5205_v16 = vpop.f32.mrf.mxu0 }
 0x101   : > { %991 = vst.msk [vmem:[#allocation2 + $0xf8] sm:$0xff] %vm404_vm2, %v983_v62  ;;  %v5203_v11 = vmax.f32 %v1177_v60, %v1200_v63  ;;  %v1201_v14 = vmul.f32 0.01, %v1179_v9  ;;  %868 = vst [vmem:[#allocation3 + $0x80] sm:$0xff] %v860_v4  ;;  %v861_v21 = vmax.f32 %v831_v2, %v853_v7  ;;  %v5208_v23 = vmul.f32 0.01, %v5205_v16 }
 0x102   : > { %v1183_v24 = vpop.f32.mrf.mxu1  ;;  %v837_v31 = vpop.f32.mrf.mxu0 }
 0x103   : > { %1216 = vst [vmem:[#allocation2 + $0x100] sm:$0xff] %v5203_v11  ;;  %v1209_v26 = vmax.f32 %v1179_v9, %v1201_v14  ;;  %v1202_v28 = vmul.f32 0.01, %v1183_v24  ;;  %869 = vst.msk [vmem:[#allocation3 + $0x88] sm:$0xff] %vm404_vm2, %v861_v21  ;;  %v855_v35 = vmul.f32 0.01, %v837_v31 }
 0x104   : > { %v1185_v36 = vpop.f32.mrf.mxu1  ;;  %v5217_v53 = vpop.f32.mrf.mxu0 }
 0x105   : > { %1217 = vst.msk [vmem:[#allocation2 + $0x108] sm:$0xff] %vm404_vm2, %v1209_v26  ;;  %v5215_v40 = vmax.f32 %v1183_v24, %v1202_v28  ;;  %v1203_v50 = vmul.f32 0.01, %v1185_v36  ;;  %v863_v55 = vmax.f32 %v837_v31, %v855_v35  ;;  %v5220_v60 = vmul.f32 0.01, %v5217_v53  ;;  %v5227_v24 = vld [vmem:[#allocation2 + $0xe8] sm:$0xff] }
 0x106   : > { %v1189_v62 = vpop.f32.mrf.mxu1  ;;  %v843_v4 = vpop.f32.mrf.mxu0 }
 0x107   : > { %v1211_v63 = vmax.f32 %v1185_v36, %v1203_v50  ;;  %v1204_v2 = vmul.f32 0.01, %v1189_v62  ;;  %871 = vst.msk [vmem:[#allocation3 + $0x98] sm:$0xff] %vm404_vm2, %v863_v55  ;;  %v857_v9 = vmul.f32 0.01, %v843_v4  ;;  %v5238_v55 = vld [vmem:[#allocation2 + $0xd8] sm:$0xff] }
 0x108   : > { %v1191_v14 = vpop.f32.mrf.mxu1  ;;  %v5225_v21 = vld [vmem:[#allocation2 + $0xf8] sm:$0xff]  ;;  %v5233_v31 = vpop.f32.mrf.mxu0 }
 0x109   : > { %1219 = vst.msk [vmem:[#allocation2 + $0x118] sm:$0xff] %vm404_vm2, %v1211_v63  ;;  %v5230_v26 = vmax.f32 %v1189_v62, %v1204_v2  ;;  %v1205_v28 = vmul.f32 0.01, %v1191_v14  ;;  %2593 = vmatprep.subr.mxu1 %v5225_v21  ;;  %v865_v35 = vmax.f32 %v843_v4, %v857_v9  ;;  %v5236_v36 = vmul.f32 0.01, %v5233_v31  ;;  %v5245_v4 = vld [vmem:[#allocation2 + $0xc8] sm:$0xff] }
 0x10a   : > { %v1195_v50 = vpop.f32.mrf.mxu1  ;;  %2594 = vmatpush1.msra.mxu1 %v982_v38  ;;  %v849_v63 = vpop.f32.mrf.mxu0 }
 0x10b   : > { %v1213_v0 = vmax.f32 %v1191_v14, %v1205_v28  ;;  %v1206_v33 = vmul.f32 0.01, %v1195_v50  ;;  %2595 = vmatprep.subr.mxu1 %v5227_v24  ;;  %873 = vst.msk [vmem:[#allocation3 + $0xa8] sm:$0xff] %vm404_vm2, %v865_v35  ;;  %v859_v2 = vmul.f32 0.01, %v849_v63 }
 0x10c   : > { %v1197_v7 = vpop.f32.mrf.mxu1  ;;  %2596 = vmatpush1.msra.mxu1 %v5196_v12  ;;  %v5251_v14 = vpop.f32.mrf.mxu0 }
 0x10d   : > { %1221 = vst.msk [vmem:[#allocation2 + $0x128] sm:$0xff] %vm404_vm2, %v1213_v0  ;;  %v5248_v38 = vmax.f32 %v1195_v50, %v1206_v33  ;;  %v1207_v9 = vmul.f32 0.01, %v1197_v7  ;;  %2597 = vmatprep.subr.mxu1 %v5238_v55  ;;  %v867_v28 = vmax.f32 %v849_v63, %v859_v2  ;;  %v5254_v35 = vmul.f32 0.01, %v5251_v14  ;;  %v2553_v63 = vld [vmem:[#allocation2 + $0xa8] sm:$0xff] }
 0x10e   : > { %v1409_v62 = vpop.f32.mrf.mxu1  ;;  %2598 = vmatpush1.msra.mxu1 %v5191_v43  ;;  %v1063_v0 = vpop.f32.mrf.mxu0  ;;  %v2551_v33 = vld [vmem:[#allocation2 + $0x98] sm:$0xff] }
 0x10f   : > { %v1215_v12 = vmax.f32 %v1197_v7, %v1207_v9  ;;  %v1432_v61 = vmul.f32 0.01, %v1409_v62  ;;  %2599 = vmatprep.subr.mxu1 %v5245_v4  ;;  %875 = vst.msk [vmem:[#allocation3 + $0xb8] sm:$0xff] %vm404_vm2, %v867_v28  ;;  %v1085_v50 = vmul.f32 0.01, %v1063_v0 }
 0x110   : > { %v1411_v10 = vpop.f32.mrf.mxu1  ;;  %2600 = vmatpush1.msra.mxu1 %v5186_v19  ;;  %v5265_v7 = vpop.f32.mrf.mxu0 }
 0x111   : > { %1223 = vst.msk [vmem:[#allocation2 + $0x138] sm:$0xff] %vm404_vm2, %v1215_v12  ;;  %v5263_v2 = vmax.f32 %v1409_v62, %v1432_v61  ;;  %v1433_v43 = vmul.f32 0.01, %v1411_v10  ;;  %2601 = vmatprep.subr.mxu1 %v2555_v49  ;;  %v1093_v9 = vmax.f32 %v1063_v0, %v1085_v50  ;;  %v5268_v22 = vmul.f32 0.01, %v5265_v7  ;;  %v2549_v0 = vld [vmem:[#allocation2 + $0x88] sm:$0xff] }
 0x112   : > { %v1415_v28 = vpop.f32.mrf.mxu1  ;;  %2602 = vmatpush1.msra.mxu1 %v750_v58  ;;  %v1069_v12 = vpop.f32.mrf.mxu0 }
 0x113   : > { %v1441_v19 = vmax.f32 %v1411_v10, %v1433_v43  ;;  %v1434_v34 = vmul.f32 0.01, %v1415_v28  ;;  %2603 = vmatprep.subr.mxu1 %v2553_v63  ;;  %1101 = vst.msk [vmem:[#allocation3 + $0xc8] sm:$0xff] %vm404_vm2, %v1093_v9  ;;  %v1087_v61 = vmul.f32 0.01, %v1069_v12 }
 0x114   : > { %v1417_v62 = vpop.f32.mrf.mxu1  ;;  %2604 = vmatpush1.msra.mxu1 %v748_v37  ;;  %v5282_v48 = vpop.f32.mrf.mxu0 }
 0x115   : > { %1449 = vst.msk [vmem:[#allocation2 + $0x148] sm:$0xff] %vm404_vm2, %v1441_v19  ;;  %v5280_v42 = vmax.f32 %v1415_v28, %v1434_v34  ;;  %v1435_v10 = vmul.f32 0.01, %v1417_v62  ;;  %2605 = vmatprep.subr.mxu1 %v2551_v33  ;;  %v1095_v58 = vmax.f32 %v1069_v12, %v1087_v61  ;;  %v5285_v50 = vmul.f32 0.01, %v5282_v48  ;;  %v2545_v61 = vld [vmem:[#allocation2 + $0x68] sm:$0xff] }
 0x116   : > { %v1421_v63 = vpop.f32.mrf.mxu1  ;;  %2606 = vmatpush1.msra.mxu1 %v746_v25  ;;  %v1075_v43 = vpop.f32.mrf.mxu0 }
 0x117   : > { %v1443_v32 = vmax.f32 %v1417_v62, %v1435_v10  ;;  %v1436_v37 = vmul.f32 0.01, %v1421_v63  ;;  %2607 = vmatprep.subr.mxu1 %v2549_v0  ;;  %1103 = vst.msk [vmem:[#allocation3 + $0xd8] sm:$0xff] %vm404_vm2, %v1095_v58  ;;  %v1089_v33 = vmul.f32 0.01, %v1075_v43  ;;  %v2543_v58 = vld [vmem:[#allocation2 + $0x58] sm:$0xff] }
 0x118   : > { %v1423_v9 = vpop.f32.mrf.mxu1  ;;  %2608 = vmatpush1.msra.mxu1 %v744_v13  ;;  %v5299_v25 = vpop.f32.mrf.mxu0 }
 0x119   : > { %1451 = vst.msk [vmem:[#allocation2 + $0x158] sm:$0xff] %vm404_vm2, %v1443_v32  ;;  %v5297_v18 = vmax.f32 %v1421_v63, %v1436_v37  ;;  %v1437_v20 = vmul.f32 0.01, %v1423_v9  ;;  %2609 = vmatprep.subr.mxu1 %v2547_v30  ;;  %v1097_v28 = vmax.f32 %v1075_v43, %v1089_v33  ;;  %v5302_v19 = vmul.f32 0.01, %v5299_v25  ;;  %v2541_v37 = vld [vmem:[#allocation2 + $0x48] sm:$0xff] }
 0x11a   : > { %v1427_v12 = vpop.f32.mrf.mxu1  ;;  %2610 = vmatpush1.msra.mxu1 %v518_v1  ;;  %v1081_v13 = vpop.f32.mrf.mxu0 }
 0x11b   : > { %v1445_v6 = vmax.f32 %v1423_v9, %v1437_v20  ;;  %v1438_v8 = vmul.f32 0.01, %v1427_v12  ;;  %2611 = vmatprep.subr.mxu1 %v2545_v61  ;;  %1105 = vst.msk [vmem:[#allocation3 + $0xe8] sm:$0xff] %vm404_vm2, %v1097_v28  ;;  %v1091_v0 = vmul.f32 0.01, %v1081_v13  ;;  %v7099_v20 = vmax.f32 %v5152_v27, %v5155_v29  ;;  %v2539_v28 = vld [vmem:[#allocation2 + $0x38] sm:$0xff] }
 0x11c   : > { %v1429_v10 = vpop.f32.mrf.mxu1  ;;  %2612 = vmatpush1.msra.mxu1 %v516_v52  ;;  %v1293_v1 = vpop.f32.mrf.mxu0  ;;  %v2537_v27 = vld [vmem:[#allocation2 + $0x28] sm:$0xff] }
 0x11d   : > { %1453 = vst.msk [vmem:[#allocation2 + $0x168] sm:$0xff] %vm404_vm2, %v1445_v6  ;;  %v5314_v57 = vmax.f32 %v1427_v12, %v1438_v8  ;;  %v1439_v59 = vmul.f32 0.01, %v1429_v10  ;;  %2613 = vmatprep.subr.mxu1 %v2543_v58  ;;  %v1099_v63 = vmax.f32 %v1081_v13, %v1091_v0  ;;  %v1316_v30 = vmul.f32 0.01, %v1293_v1 }
 0x11e   : > { %v5316_v32 = vpop.f32.mrf.mxu1  ;;  %2614 = vmatpush1.msra.mxu1 %v514_v51  ;;  %v1295_v47 = vpop.f32.mrf.mxu0  ;;  %v7100_v8 = vmax.f32 %v5136_v15, %v5139_v17 }
 0x11f   : > { %v1447_v43 = vmax.f32 %v1429_v10, %v1439_v59  ;;  %v5322_v46 = vmul.f32 0.01, %v5316_v32  ;;  %2615 = vmatprep.subr.mxu1 %v2541_v37  ;;  %1107 = vst.msk [vmem:[#allocation3 + $0xf8] sm:$0xff] %vm404_vm2, %v1099_v63  ;;  %v5325_v52 = vmax.f32 %v1293_v1, %v1316_v30  ;;  %v1317_v33 = vmul.f32 0.01, %v1295_v47  ;;  %v2535_v63 = vld [vmem:[#allocation2 + $0x18] sm:$0xff] }
 0x120   : > { %v1643_v9 = vpop.f32.mrf.mxu1  ;;  %2616 = vmatpush1.msra.mxu1 %v7099_v20  ;;  %v1299_v51 = vpop.f32.mrf.mxu0  ;;  %v7101_v1 = vmax.f32 %v5120_v3, %v5123_v5  ;;  %v2509_v37 = vld [vmem:[%s7087_s4 + $0x8] sm:$0xff]  ;;  %v7102_v3 = vmax.f32 %v5104_v54, %v5107_v56  ;;  %v2511_v20 = vld [vmem:[%s7087_s4 + $0x18] sm:$0xff] }
 0x121   : > { %1455 = vst.msk [vmem:[#allocation2 + $0x178] sm:$0xff] %vm404_vm2, %v1447_v43  ;;  %v1665_v41 = vmul.f32 0.01, %v1643_v9  ;;  %2617 = vmatprep.subr.mxu1 %v2539_v28  ;;  %1332 = vst [vmem:[#allocation3 + $0x100] sm:$0xff] %v5325_v52  ;;  %v1325_v12 = vmax.f32 %v1295_v47, %v1317_v33  ;;  %v1318_v61 = vmul.f32 0.01, %v1299_v51 }
 0x122   : > { %v5334_v6 = vpop.f32.mrf.mxu1  ;;  %2618 = vmatpush1.msra.mxu1 %v7100_v8  ;;  %v1301_v0 = vpop.f32.mrf.mxu0  ;;  %v2533_v5 = vld [vmem:[#allocation2 + $0x8] sm:$0xff] }
 0x123   : > { %v1673_v29 = vmax.f32 %v1643_v9, %v1665_v41  ;;  %v5340_v13 = vmul.f32 0.01, %v5334_v6  ;;  %2619 = vmatprep.subr.mxu1 %v2537_v27  ;;  %1333 = vst.msk [vmem:[#allocation3 + $0x108] sm:$0xff] %vm404_vm2, %v1325_v12  ;;  %v5343_v10 = vmax.f32 %v1299_v51, %v1318_v61  ;;  %v1319_v58 = vmul.f32 0.01, %v1301_v0 }
 0x124   : > { %v1649_v59 = vpop.f32.mrf.mxu1  ;;  %2620 = vmatpush1.msra.mxu1 %v7101_v1  ;;  %v1305_v30 = vpop.f32.mrf.mxu0  ;;  %v4741_v9 = vmov 0   ;;  %v7103_v61 = vmax.f32 %v5090_v44, %v5093_v45  ;;  %v5374_v27 = vld [vmem:[#allocation2 + $0x168] sm:$0xff] }
 0x125   : > { %1681 = vst.msk [vmem:[#allocation2 + $0x188] sm:$0xff] %vm404_vm2, %v1673_v29  ;;  %v1667_v17 = vmul.f32 0.01, %v1649_v59  ;;  %2621 = vmatprep.subr.mxu1 %v2535_v63  ;;  %1334 = vst [vmem:[#allocation3 + $0x110] sm:$0xff] %v5343_v10  ;;  %v1327_v43 = vmax.f32 %v1301_v0, %v1319_v58  ;;  %v1320_v47 = vmul.f32 0.01, %v1305_v30  ;;  %4724 = vset.pattern.permute.xlu1 %v4741_v9 }
 0x126   : > { %v5355_v33 = vpop.f32.mrf.mxu1  ;;  %2622 = vmatpush1.msra.mxu1 %v7102_v3  ;;  %v1307_v51 = vpop.f32.mrf.mxu0  ;;  %2519 = vperm.xlu1 %4724, %v2509_v37   ;;  %v2508_v29 = vld [vmem:[%s7087_s4] sm:$0xff]  ;;  %v5387_v63 = vld [vmem:[#allocation2 + $0x158] sm:$0xff] }
 0x127   : > { %v1675_v28 = vmax.f32 %v1649_v59, %v1667_v17  ;;  %v5364_v41 = vmul.f32 0.01, %v5355_v33  ;;  %2623 = vmatprep.subr.mxu1 %v2533_v5  ;;  %1335 = vst.msk [vmem:[#allocation3 + $0x118] sm:$0xff] %vm404_vm2, %v1327_v43  ;;  %v5367_v12 = vmax.f32 %v1305_v30, %v1320_v47  ;;  %v1321_v54 = vmul.f32 0.01, %v1307_v51  ;;  %4723 = vset.pattern.permute.xlu0 %v4741_v9  ;;  %v2510_v17 = vld [vmem:[%s7087_s4 + $0x10] sm:$0xff] }
 0x128   : > { %v1655_v56 = vpop.f32.mrf.mxu1  ;;  %2624 = vmatpush1.msra.mxu1 %v7103_v61  ;;  %v5372_v8 = vld [vmem:[#allocation2 + $0x178] sm:$0xff]  ;;  %v1311_v59 = vpop.f32.mrf.mxu0  ;;  %2529 = vperm.xlu0 %4723, %v2511_v20   ;;  %v5400_v9 = vld [vmem:[#allocation2 + $0x148] sm:$0xff] }
 0x129   : > { %1683 = vst.msk [vmem:[#allocation2 + $0x198] sm:$0xff] %vm404_vm2, %v1675_v28  ;;  %v1669_v58 = vmul.f32 0.01, %v1655_v56  ;;  %2641 = vmatprep.subr.mxu1 %v5372_v8  ;;  %1336 = vst [vmem:[#allocation3 + $0x120] sm:$0xff] %v5367_v12  ;;  %v1329_v44 = vmax.f32 %v1307_v51, %v1321_v54  ;;  %v1322_v45 = vmul.f32 0.01, %v1311_v59 }
 0x12a   : > { %v5384_v1 = vpop.f32.mrf.mxu1  ;;  %2642 = vmatpush2.msra.mxu1 %v5314_v57  ;;  %v1313_v43 = vpop.f32.mrf.mxu0  ;;  %2514 = vperm.xlu1 %4724, %v2508_v29   ;;  %v5408_v61 = vld [vmem:[#allocation2 + $0x138] sm:$0xff] }
 0x12b   : > { %v1677_v30 = vmax.f32 %v1655_v56, %v1669_v58  ;;  %v5393_v37 = vmul.f32 0.01, %v5384_v1  ;;  %2643 = vmatprep.subr.mxu1 %v5374_v27  ;;  %1337 = vst.msk [vmem:[#allocation3 + $0x128] sm:$0xff] %vm404_vm2, %v1329_v44  ;;  %v5397_v47 = vmax.f32 %v1311_v59, %v1322_v45  ;;  %v1323_v3 = vmul.f32 0.01, %v1313_v43 }
 0x12c   : > { %v1661_v5 = vpop.f32.mrf.mxu1  ;;  %2644 = vmatpush2.msra.mxu1 %v5297_v18  ;;  %v1525_v51 = vpop.f32.mrf.mxu0  ;;  %2524 = vperm.xlu0 %4723, %v2510_v17   ;;  %v5417_v17 = vld [vmem:[#allocation2 + $0x128] sm:$0xff] }
 0x12d   : > { %1685 = vst.msk [vmem:[#allocation2 + $0x1a8] sm:$0xff] %vm404_vm2, %v1677_v30  ;;  %v1671_v28 = vmul.f32 0.01, %v1661_v5  ;;  %2645 = vmatprep.subr.mxu1 %v5387_v63  ;;  %1338 = vst [vmem:[#allocation3 + $0x130] sm:$0xff] %v5397_v47  ;;  %v1331_v54 = vmax.f32 %v1313_v43, %v1323_v3  ;;  %v1548_v56 = vmul.f32 0.01, %v1525_v51 }
 0x12e   : > { %2646 = vmatpush2.msra.mxu1 %v5280_v42  ;;  %v1527_v58 = vpop.f32.mrf.mxu0  ;;  %v5411_v59 = vpop.f32.mrf.mxu1 }
 0x12f   : > { %v1679_v29 = vmax.f32 %v1661_v5, %v1671_v28  ;;  %2647 = vmatprep.subr.mxu1 %v5400_v9  ;;  %7104 = vst [vmem:[#allocation5_spill] sm:$0xff] %v5411_v59  ;;  %1339 = vst.msk [vmem:[#allocation3 + $0x138] sm:$0xff] %vm404_vm2, %v1331_v54  ;;  %v5414_v44 = vmax.f32 %v1525_v51, %v1548_v56  ;;  %v1549_v45 = vmul.f32 0.01, %v1527_v58  ;;  %v5420_v30 = vmul.f32 0.01, %v5411_v59 }
 0x130   : > { %2648 = vmatpush2.msra.mxu1 %v5263_v2  ;;  %v1531_v43 = vpop.f32.mrf.mxu0  ;;  %v1875_v3 = vpop.f32.mrf.mxu1  ;;  %v5425_v51 = vld [vmem:[#allocation2 + $0x118] sm:$0xff] }
 0x131   : > { %7105 = vst [vmem:[#allocation6_spill] sm:$0xff] %v5414_v44  ;;  %7106 = vst [vmem:[#allocation7_spill] sm:$0xff] %v5420_v30  ;;  %2649 = vmatprep.subr.mxu1 %v5408_v61  ;;  %v1557_v5 = vmax.f32 %v1527_v58, %v1549_v45  ;;  %v1550_v28 = vmul.f32 0.01, %v1531_v43  ;;  %v1897_v56 = vmul.f32 0.01, %v1875_v3 }
 0x132   : > { %1687 = vst.msk [vmem:[#allocation2 + $0x1b8] sm:$0xff] %vm404_vm2, %v1679_v29  ;;  %2650 = vmatpush2.msra.mxu1 %v5248_v38  ;;  %v1533_v49 = vpop.f32.mrf.mxu0  ;;  %v5430_v34 = vpop.f32.mrf.mxu1  ;;  %v5436_v58 = vld [vmem:[#allocation2 + $0x108] sm:$0xff] }
 0x133   : > { %2651 = vmatprep.subr.mxu1 %v5417_v17  ;;  %7107 = vst [vmem:[#allocation8_spill] sm:$0xff] %v5430_v34  ;;  %1565 = vst.msk [vmem:[#allocation3 + $0x148] sm:$0xff] %vm404_vm2, %v1557_v5  ;;  %v5433_v29 = vmax.f32 %v1531_v43, %v1550_v28  ;;  %v1551_v62 = vmul.f32 0.01, %v1533_v49  ;;  %v1905_v45 = vmax.f32 %v1875_v3, %v1897_v56  ;;  %v5439_v39 = vmul.f32 0.01, %v5430_v34 }
 0x134   : > { %2652 = vmatpush2.msra.mxu1 %v5230_v26  ;;  %v1537_v54 = vpop.f32.mrf.mxu0  ;;  %v1881_v15 = vpop.f32.mrf.mxu1  ;;  %v5447_v43 = vld [vmem:[%s7085_s2] sm:$0xff]  ;;  %v2896_v59 = vld [vmem:[#allocation2 + $0x1a8] sm:$0xff] }
 0x135   : > { %7108 = vst [vmem:[#allocation9_spill] sm:$0xff] %v5433_v29  ;;  %7109 = vst [vmem:[#allocation10_spill] sm:$0xff] %v5439_v39  ;;  %2653 = vmatprep.subr.mxu1 %v5425_v51  ;;  %v1559_v0 = vmax.f32 %v1533_v49, %v1551_v62  ;;  %v1552_v20 = vmul.f32 0.01, %v1537_v54  ;;  %v1899_v5 = vmul.f32 0.01, %v1881_v15 }
 0x136   : > { %2654 = vmatpush2.msra.mxu1 %v5215_v40  ;;  %1913 = vst.msk [vmem:[#allocation2 + $0x1c8] sm:$0xff] %vm404_vm2, %v1905_v45  ;;  %v1539_v28 = vpop.f32.mrf.mxu0  ;;  %v5452_v56 = vld [vmem:[#allocation3 + $0x138] sm:$0xff]  ;;  %v5454_v49 = vpop.f32.mrf.mxu1 }
 0x137   : > { %2655 = vmatprep.subr.mxu1 %v5436_v58  ;;  %1567 = vst.msk [vmem:[#allocation3 + $0x158] sm:$0xff] %vm404_vm2, %v1559_v0  ;;  %v5457_v62 = vmax.f32 %v1537_v54, %v1552_v20  ;;  %v1553_v45 = vmul.f32 0.01, %v1539_v28  ;;  %2754 = vmatprep.subr.mxu0 %v5452_v56  ;;  %v1907_v3 = vmax.f32 %v1881_v15, %v1899_v5  ;;  %v5462_v44 = vmul.f32 0.01, %v5454_v49  ;;  %v5469_v20 = vld [vmem:[#allocation3 + $0x128] sm:$0xff] }
 0x138   : > { %2656 = vmatpush2.msra.mxu1 %v5203_v11  ;;  %v1543_v39 = vpop.f32.mrf.mxu0  ;;  %v1887_v34 = vpop.f32.mrf.mxu1  ;;  %2755 = vmatpush1.msra.mxu0 %v5397_v47  ;;  %v7110_v11 = vmax.f32 %v5384_v1, %v5393_v37  ;;  %v2894_v54 = vld [vmem:[#allocation2 + $0x198] sm:$0xff]  ;;  %v7111_v37 = vmax.f32 %v5355_v33, %v5364_v41  ;;  %v7112_v33 = vmax.f32 %v5334_v6, %v5340_v13  ;;  %v5494_v41 = vld [vmem:[#allocation3 + $0x108] sm:$0xff] }
 0x139   : > { %v2898_v30 = vld [vmem:[#allocation2 + $0x1b8] sm:$0xff]  ;;  %2658 = vmatmul.mubr.f32.vlgmr.msra.gmra.mxu1 %v5447_v43  ;;  %v1561_v29 = vmax.f32 %v1539_v28, %v1553_v45  ;;  %v1554_v0 = vmul.f32 0.01, %v1543_v39  ;;  %1915 = vst.msk [vmem:[#allocation2 + $0x1d8] sm:$0xff] %vm404_vm2, %v1907_v3  ;;  %2756 = vmatprep.subr.mxu0 %v5469_v20  ;;  %v2892_v45 = vld [vmem:[#allocation2 + $0x188] sm:$0xff]  ;;  %v7113_v13 = vmax.f32 %v5316_v32, %v5322_v46 }
 0x13a   : > { %2915 = vmatprep.subr.mxu1 %v2898_v30  ;;  %v1901_v30 = vmul.f32 0.01, %v1887_v34  ;;  %v1545_v5 = vpop.f32.mrf.mxu0  ;;  %v5475_v28 = vpop.f32.mrf.mxu1  ;;  %2757 = vmatpush1.msra.mxu0 %v5367_v12  ;;  %v5484_v3 = vld [vmem:[#allocation3 + $0x118] sm:$0xff]  ;;  %v2727_v32 = vld [vmem:[#allocation3 + $0xe8] sm:$0xff] }
 0x13b   : > { %2916 = vmatpush1.msra.mxu1 %v7110_v11  ;;  %1569 = vst.msk [vmem:[#allocation3 + $0x168] sm:$0xff] %vm404_vm2, %v1561_v29  ;;  %v5478_v47 = vmax.f32 %v1543_v39, %v1554_v0  ;;  %v1555_v1 = vmul.f32 0.01, %v1545_v5  ;;  %2758 = vmatprep.subr.mxu0 %v5484_v3 }
 0x13c   : > { %2917 = vmatprep.subr.mxu1 %v2896_v59  ;;  %v1909_v11 = vmax.f32 %v1887_v34, %v1901_v30  ;;  %v5487_v59 = vmul.f32 0.01, %v5475_v28  ;;  %v1757_v29 = vpop.f32.mrf.mxu0  ;;  %v1893_v39 = vpop.f32.mrf.mxu1  ;;  %2759 = vmatpush1.msra.mxu0 %v5343_v10 }
 0x13d   : > { %2918 = vmatpush1.msra.mxu1 %v7111_v37  ;;  %v1563_v0 = vmax.f32 %v1545_v5, %v1555_v1  ;;  %v1780_v15 = vmul.f32 0.01, %v1757_v29  ;;  %v1903_v12 = vmul.f32 0.01, %v1893_v39  ;;  %2760 = vmatprep.subr.mxu0 %v5494_v41  ;;  %v2729_v5 = vld [vmem:[#allocation3 + $0xf8] sm:$0xff] }
 0x13e   : > { %2919 = vmatprep.subr.mxu1 %v2894_v54  ;;  %1917 = vst.msk [vmem:[#allocation2 + $0x1e8] sm:$0xff] %vm404_vm2, %v1909_v11  ;;  %v1910_v34 = vmax.f32 %v5475_v28, %v5487_v59  ;;  %v1759_v54 = vpop.f32.mrf.mxu0  ;;  %v5500_v30 = vpop.f32.mrf.mxu1  ;;  %2761 = vmatpush1.msra.mxu0 %v5325_v52  ;;  %v7121_v28 = vmax.f32 %v5454_v49, %v5462_v44  ;;  %v2900_v59 = vld [vmem:[#allocation2 + $0x1c8] sm:$0xff] }
 0x13f   : > { %2920 = vmatpush1.msra.mxu1 %v7112_v33  ;;  %1571 = vst.msk [vmem:[#allocation3 + $0x178] sm:$0xff] %vm404_vm2, %v1563_v0  ;;  %v5503_v10 = vmax.f32 %v1757_v29, %v1780_v15  ;;  %v1781_v6 = vmul.f32 0.01, %v1759_v54  ;;  %v1911_v1 = vmax.f32 %v1893_v39, %v1903_v12  ;;  %v5510_v37 = vmul.f32 0.01, %v5500_v30  ;;  %2762 = vmatprep.subr.mxu0 %v2729_v5 }
 0x140   : > { %2921 = vmatprep.subr.mxu1 %v2892_v45  ;;  %v1763_v45 = vpop.f32.mrf.mxu0  ;;  %v2107_v11 = vpop.f32.mrf.mxu1  ;;  %v7114_v29 = vmax.f32 %v5299_v25, %v5302_v19  ;;  %v7115_v19 = vmax.f32 %v5282_v48, %v5285_v50  ;;  %v2723_v48 = vld [vmem:[#allocation3 + $0xc8] sm:$0xff] }
 0x141   : > { %2922 = vmatpush1.msra.mxu1 %v7113_v13  ;;  %v1789_v0 = vmax.f32 %v1759_v54, %v1781_v6  ;;  %v1782_v15 = vmul.f32 0.01, %v1763_v45  ;;  %1919 = vst.msk [vmem:[#allocation2 + $0x1f8] sm:$0xff] %vm404_vm2, %v1911_v1  ;;  %v2136_v46 = vmax.f32 %v5500_v30, %v5510_v37  ;;  %v2129_v52 = vmul.f32 0.01, %v2107_v11 }
 0x142   : > { %2923 = vmatprep.subr.mxu1 %v5372_v8  ;;  %2763 = vmatpush1.msra.mxu0 %v7114_v29  ;;  %v1765_v8 = vpop.f32.mrf.mxu0  ;;  %v5521_v39 = vpop.f32.mrf.mxu1  ;;  %v7116_v1 = vmax.f32 %v5265_v7, %v5268_v22  ;;  %v7117_v7 = vmax.f32 %v5251_v14, %v5254_v35  ;;  %v2719_v14 = vld [vmem:[#allocation3 + $0xa8] sm:$0xff] }
 0x143   : > { %2924 = vmatpush1.msra.mxu1 %v5314_v57  ;;  %2764 = vmatprep.subr.mxu0 %v2727_v32  ;;  %1797 = vst.msk [vmem:[#allocation3 + $0x188] sm:$0xff] %vm404_vm2, %v1789_v0  ;;  %v5524_v33 = vmax.f32 %v1763_v45, %v1782_v15  ;;  %v1783_v25 = vmul.f32 0.01, %v1765_v8  ;;  %v2725_v57 = vld [vmem:[#allocation3 + $0xd8] sm:$0xff]  ;;  %v2137_v12 = vmax.f32 %v2107_v11, %v2129_v52  ;;  %v5531_v54 = vmul.f32 0.01, %v5521_v39 }
 0x144   : > { %2925 = vmatprep.subr.mxu1 %v5374_v27  ;;  %2765 = vmatpush1.msra.mxu0 %v7115_v19  ;;  %v1769_v27 = vpop.f32.mrf.mxu0  ;;  %v2113_v6 = vpop.f32.mrf.mxu1 }
 0x145   : > { %2926 = vmatpush1.msra.mxu1 %v5297_v18  ;;  %2766 = vmatprep.subr.mxu0 %v2725_v57  ;;  %v1791_v13 = vmax.f32 %v1765_v8, %v1783_v25  ;;  %v1784_v5 = vmul.f32 0.01, %v1769_v27  ;;  %2145 = vst.msk [vmem:[#allocation2 + $0x208] sm:$0xff] %vm404_vm2, %v2137_v12  ;;  %v2138_v50 = vmax.f32 %v5521_v39, %v5531_v54  ;;  %v2131_v18 = vmul.f32 0.01, %v2113_v6  ;;  %v2904_v39 = vld [vmem:[#allocation2 + $0x1e8] sm:$0xff] }
 0x146   : > { %2927 = vmatprep.subr.mxu1 %v5387_v63  ;;  %2767 = vmatpush1.msra.mxu0 %v7116_v1  ;;  %v1771_v63 = vpop.f32.mrf.mxu0  ;;  %v5542_v45 = vpop.f32.mrf.mxu1  ;;  %v7118_v8 = vmax.f32 %v5233_v31, %v5236_v36  ;;  %v7119_v36 = vmax.f32 %v5217_v53, %v5220_v60  ;;  %v7120_v53 = vmax.f32 %v5205_v16, %v5208_v23  ;;  %v2715_v60 = vld [vmem:[#allocation3 + $0x88] sm:$0xff]  ;;  %v2714_v1 = vld [vmem:[#allocation3 + $0x80] sm:$0xff] }
 0x147   : > { %2928 = vmatpush1.msra.mxu1 %v5280_v42  ;;  %2768 = vmatprep.subr.mxu0 %v2723_v48  ;;  %1799 = vst.msk [vmem:[#allocation3 + $0x198] sm:$0xff] %vm404_vm2, %v1791_v13  ;;  %v5545_v11 = vmax.f32 %v1769_v27, %v1784_v5  ;;  %v1785_v22 = vmul.f32 0.01, %v1771_v63  ;;  %v2721_v42 = vld [vmem:[#allocation3 + $0xb8] sm:$0xff]  ;;  %v2139_v0 = vmax.f32 %v2113_v6, %v2131_v18  ;;  %v5552_v15 = vmul.f32 0.01, %v5542_v45 }
 0x148   : > { %2929 = vmatprep.subr.mxu1 %v5400_v9  ;;  %2769 = vmatpush1.msra.mxu0 %v7117_v7  ;;  %v1775_v9 = vpop.f32.mrf.mxu0  ;;  %v2119_v29 = vpop.f32.mrf.mxu1  ;;  %v2875_v48 = vld [vmem:[#allocation2 + $0x100] sm:$0xff]  ;;  %v2873_v7 = vld [vmem:[#allocation2 + $0xf0] sm:$0xff] }
 0x149   : > { %2930 = vmatpush1.msra.mxu1 %v5263_v2  ;;  %2770 = vmatprep.subr.mxu0 %v2721_v42  ;;  %v1793_v32 = vmax.f32 %v1771_v63, %v1785_v22  ;;  %v1786_v52 = vmul.f32 0.01, %v1775_v9  ;;  %2147 = vst.msk [vmem:[#allocation2 + $0x218] sm:$0xff] %vm404_vm2, %v2139_v0  ;;  %v2140_v35 = vmax.f32 %v5542_v45, %v5552_v15  ;;  %v2133_v2 = vmul.f32 0.01, %v2119_v29 }
 0x14a   : > { %2931 = vmatprep.subr.mxu1 %v5408_v61  ;;  %2771 = vmatpush1.msra.mxu0 %v7118_v8  ;;  %v1777_v61 = vpop.f32.mrf.mxu0  ;;  %v5563_v25 = vpop.f32.mrf.mxu1 }
 0x14b   : > { %2932 = vmatpush1.msra.mxu1 %v5248_v38  ;;  %2772 = vmatprep.subr.mxu0 %v2719_v14  ;;  %1801 = vst.msk [vmem:[#allocation3 + $0x1a8] sm:$0xff] %vm404_vm2, %v1793_v32  ;;  %v5566_v19 = vmax.f32 %v1775_v9, %v1786_v52  ;;  %v1787_v31 = vmul.f32 0.01, %v1777_v61  ;;  %v2717_v38 = vld [vmem:[#allocation3 + $0x98] sm:$0xff]  ;;  %v2141_v57 = vmax.f32 %v2119_v29, %v2133_v2  ;;  %v5573_v12 = vmul.f32 0.01, %v5563_v25 }
 0x14c   : > { %2933 = vmatprep.subr.mxu1 %v5417_v17  ;;  %2773 = vmatpush1.msra.mxu0 %v7119_v36  ;;  %v5576_v17 = vpop.f32.mrf.mxu0  ;;  %v2125_v27 = vpop.f32.mrf.mxu1  ;;  %v2711_v29 = vld [vmem:[#allocation3 + $0x68] sm:$0xff]  ;;  %v2710_v52 = vld [vmem:[#allocation3 + $0x60] sm:$0xff]  ;;  %v2708_v36 = vld [vmem:[#allocation3 + $0x50] sm:$0xff] }
 0x14d   : > { %2934 = vmatpush1.msra.mxu1 %v5230_v26  ;;  %2774 = vmatprep.subr.mxu0 %v2717_v38  ;;  %v1795_v6 = vmax.f32 %v1777_v61, %v1787_v31  ;;  %v5579_v13 = vmul.f32 0.01, %v5576_v17  ;;  %2149 = vst.msk [vmem:[#allocation2 + $0x228] sm:$0xff] %vm404_vm2, %v2141_v57  ;;  %v2142_v26 = vmax.f32 %v5563_v25, %v5573_v12  ;;  %v2709_v61 = vld [vmem:[#allocation3 + $0x58] sm:$0xff]  ;;  %v2908_v25 = vld [vmem:[#allocation2 + $0x208] sm:$0xff] }
 0x14e   : > { %2935 = vmatprep.subr.mxu1 %v5425_v51  ;;  %2775 = vmatpush1.msra.mxu0 %v7120_v53  ;;  %v2135_v51 = vmul.f32 0.01, %v2125_v27  ;;  %v1991_v5 = vpop.f32.mrf.mxu0  ;;  %v2337_v18 = vpop.f32.mrf.mxu1  ;;  %v5612_v53 = vld [vmem:[%s7085_s2 + $0x18] sm:$0xff] }
 0x14f   : > { %2936 = vmatpush1.msra.mxu1 %v5215_v40  ;;  %2776 = vmatprep.subr.mxu0 %v2715_v60  ;;  %1803 = vst.msk [vmem:[#allocation3 + $0x1b8] sm:$0xff] %vm404_vm2, %v1795_v6  ;;  %v2020_v16 = vmax.f32 %v5576_v17, %v5579_v13  ;;  %v2013_v23 = vmul.f32 0.01, %v1991_v5  ;;  %v2713_v40 = vld [vmem:[#allocation3 + $0x78] sm:$0xff]  ;;  %v2707_v6 = vld [vmem:[#allocation3 + $0x48] sm:$0xff]  ;;  %v2706_v60 = vld [vmem:[#allocation3 + $0x40] sm:$0xff] }
 0x150   : > { %2937 = vmatprep.subr.mxu1 %v5436_v58  ;;  %2777 = vmatpush1.msra.mxu0 %v2714_v1  ;;  %v2143_v63 = vmax.f32 %v2125_v27, %v2135_v51  ;;  %v5593_v22 = vpop.f32.mrf.mxu0  ;;  %v2712_v58 = vld [vmem:[#allocation3 + $0x70] sm:$0xff]  ;;  %v2339_v42 = vpop.f32.mrf.mxu1  ;;  %v2867_v51 = vld [vmem:[#allocation2 + $0xc0] sm:$0xff] }
 0x151   : > { %2938 = vmatpush1.msra.mxu1 %v2875_v48  ;;  %2778 = vmatprep.subr.mxu0 %v2713_v40  ;;  %v2021_v0 = vmax.f32 %v1991_v5, %v2013_v23  ;;  %v5596_v9 = vmul.f32 0.01, %v5593_v22 }
 0x152   : > { %2939 = vmatprep.subr.mxu1 %v5225_v21  ;;  %2779 = vmatpush1.msra.mxu0 %v2712_v58  ;;  %2151 = vst.msk [vmem:[#allocation2 + $0x238] sm:$0xff] %vm404_vm2, %v2143_v63  ;;  %v1997_v32 = vpop.f32.mrf.mxu0  ;;  %v2871_v21 = vld [vmem:[#allocation2 + $0xe0] sm:$0xff]  ;;  %v2343_v8 = vpop.f32.mrf.mxu1  ;;  %v5629_v42 = vld [vmem:[#allocation3 + $0x1a8] sm:$0xff] }
 0x153   : > { %2940 = vmatpush1.msra.mxu1 %v2873_v7  ;;  %2780 = vmatprep.subr.mxu0 %v2711_v29  ;;  %2029 = vst.msk [vmem:[#allocation3 + $0x1c8] sm:$0xff] %vm404_vm2, %v2021_v0  ;;  %v2022_v14 = vmax.f32 %v5593_v22, %v5596_v9  ;;  %v2015_v2 = vmul.f32 0.01, %v1997_v32  ;;  %v2910_v29 = vld [vmem:[#allocation2 + $0x218] sm:$0xff] }
 0x154   : > { %2941 = vmatprep.subr.mxu1 %v5227_v24  ;;  %2781 = vmatpush1.msra.mxu0 %v2710_v52  ;;  %v5604_v31 = vpop.f32.mrf.mxu0  ;;  %v2869_v24 = vld [vmem:[#allocation2 + $0xd0] sm:$0xff]  ;;  %v2345_v38 = vpop.f32.mrf.mxu1 }
 0x155   : > { %2942 = vmatpush1.msra.mxu1 %v2871_v21  ;;  %2782 = vmatprep.subr.mxu0 %v2709_v61  ;;  %v2023_v57 = vmax.f32 %v1997_v32, %v2015_v2  ;;  %v5607_v27 = vmul.f32 0.01, %v5604_v31  ;;  %v5639_v21 = vld [vmem:[#allocation3 + $0x198] sm:$0xff]  ;;  %v5651_v2 = vld [vmem:[#allocation3 + $0x188] sm:$0xff] }
 0x156   : > { %2943 = vmatprep.subr.mxu1 %v5238_v55  ;;  %2783 = vmatpush1.msra.mxu0 %v2708_v36  ;;  %v2003_v55 = vpop.f32.mrf.mxu0  ;;  %v5615_v5 = vld [vmem:[#allocation3 + $0x1b8] sm:$0xff]  ;;  %v2349_v1 = vpop.f32.mrf.mxu1  ;;  %v5673_v38 = vld [vmem:[#allocation3 + $0x168] sm:$0xff] }
 0x157   : > { %2944 = vmatpush1.msra.mxu1 %v2869_v24  ;;  %2784 = vmatprep.subr.mxu0 %v2707_v6  ;;  %2031 = vst.msk [vmem:[#allocation3 + $0x1d8] sm:$0xff] %vm404_vm2, %v2023_v57  ;;  %v2024_v48 = vmax.f32 %v5604_v31, %v5607_v27  ;;  %v2017_v18 = vmul.f32 0.01, %v2003_v55  ;;  %v2906_v36 = vld [vmem:[#allocation2 + $0x1f8] sm:$0xff]  ;;  %v5695_v1 = vld [vmem:[#allocation3 + $0x148] sm:$0xff] }
 0x158   : > { %2945 = vmatprep.subr.mxu1 %v5245_v4  ;;  %2785 = vmatpush1.msra.mxu0 %v2706_v60  ;;  %v5621_v23 = vpop.f32.mrf.mxu0  ;;  %v2912_v4 = vld [vmem:[#allocation2 + $0x228] sm:$0xff]  ;;  %v2351_v63 = vpop.f32.mrf.mxu1  ;;  %v2902_v6 = vld [vmem:[#allocation2 + $0x1d8] sm:$0xff] }
 0x159   : > { %2946 = vmatpush1.msra.mxu1 %v2867_v51  ;;  %2802 = vmatprep.subr.mxu0 %v5615_v5  ;;  %v2914_v40 = vld [vmem:[#allocation2 + $0x238] sm:$0xff]  ;;  %v2025_v58 = vmax.f32 %v2003_v55, %v2017_v18  ;;  %v5626_v7 = vmul.f32 0.01, %v5621_v23  ;;  %v7122_v51 = vld [vmem:[#allocation9_spill] sm:$0xff]  ;;  %v7124_v63 = vld [vmem:[#allocation10_spill] sm:$0xff] }
 0x15a   : > { %4691 = vmatprep.mubr.msk.f32.mxu1 %vm2580_vm1, %v5612_v53  ;;  %2803 = vmatpush2.msra.mxu0 %v5566_v19  ;;  %v2009_v0 = vpop.f32.mrf.mxu0  ;;  %v3053_v31 = vld [vmem:[#allocation3 + $0x1c8] sm:$0xff] }
 0x15b   : > { %2963 = vmatprep.subr.mxu1 %v2914_v40  ;;  %2804 = vmatprep.subr.mxu0 %v5629_v42  ;;  %2033 = vst.msk [vmem:[#allocation3 + $0x1e8] sm:$0xff] %vm404_vm2, %v2025_v58  ;;  %v2026_v32 = vmax.f32 %v5621_v23, %v5626_v7  ;;  %v2019_v52 = vmul.f32 0.01, %v2009_v0 }
 0x15c   : > { %2964 = vmatpush2.msra.mxu1 %v2142_v26  ;;  %2805 = vmatpush2.msra.mxu0 %v5545_v11  ;;  %v5642_v8 = vpop.f32.mrf.mxu0 }
 0x15d   : > { %2965 = vmatprep.subr.mxu1 %v2912_v4  ;;  %2806 = vmatprep.subr.mxu0 %v5639_v21  ;;  %v2027_v12 = vmax.f32 %v2009_v0, %v2019_v52  ;;  %v5648_v26 = vmul.f32 0.01, %v5642_v8  ;;  %v7123_v4 = vld [vmem:[#allocation8_spill] sm:$0xff]  ;;  %v7126_v0 = vld [vmem:[#allocation6_spill] sm:$0xff]  ;;  %v5711_v52 = vld [vmem:[%s7085_s2 + $0x10] sm:$0xff] }
 0x15e   : > { %2966 = vmatpush2.msra.mxu1 %v2140_v35  ;;  %2807 = vmatpush2.msra.mxu0 %v5524_v33  ;;  %v2223_v61 = vpop.f32.mrf.mxu0  ;;  %v5661_v35 = vld [vmem:[#allocation3 + $0x178] sm:$0xff]  ;;  %v7125_v58 = vmax.f32 %v7123_v4, %v7124_v63  ;;  %v4727_v4 = vld [vmem:[%s7085_s2 + $0x8] sm:$0xff] }
 0x15f   : > { %2967 = vmatprep.subr.mxu1 %v2910_v29  ;;  %2808 = vmatprep.subr.mxu0 %v5651_v2  ;;  %2035 = vst.msk [vmem:[#allocation3 + $0x1f8] sm:$0xff] %vm404_vm2, %v2027_v12  ;;  %v2252_v45 = vmax.f32 %v5642_v8, %v5648_v26  ;;  %v2245_v15 = vmul.f32 0.01, %v2223_v61 }
 0x160   : > { %2968 = vmatpush2.msra.mxu1 %v2138_v50  ;;  %2809 = vmatpush2.msra.mxu0 %v5503_v10  ;;  %v5664_v24 = vpop.f32.mrf.mxu0 }
 0x161   : > { %2969 = vmatprep.subr.mxu1 %v2908_v25  ;;  %2810 = vmatprep.subr.mxu0 %v5661_v35  ;;  %v2253_v54 = vmax.f32 %v2223_v61, %v2245_v15  ;;  %v5670_v50 = vmul.f32 0.01, %v5664_v24  ;;  %v7128_v15 = vld [vmem:[#allocation7_spill] sm:$0xff] }
 0x162   : > { %2970 = vmatpush2.msra.mxu1 %v2136_v46  ;;  %2811 = vmatpush2.msra.mxu0 %v5478_v47  ;;  %v2229_v57 = vpop.f32.mrf.mxu0  ;;  %v5683_v46 = vld [vmem:[#allocation3 + $0x158] sm:$0xff]  ;;  %v3057_v61 = vld [vmem:[#allocation3 + $0x1e8] sm:$0xff] }
 0x163   : > { %2971 = vmatprep.subr.mxu1 %v2906_v36  ;;  %2812 = vmatprep.subr.mxu0 %v5673_v38  ;;  %2261 = vst.msk [vmem:[#allocation3 + $0x208] sm:$0xff] %vm404_vm2, %v2253_v54  ;;  %v2254_v30 = vmax.f32 %v5664_v24, %v5670_v50  ;;  %v2247_v37 = vmul.f32 0.01, %v2229_v57  ;;  %v7127_v36 = vld [vmem:[#allocation5_spill] sm:$0xff]  ;;  %v2355_v24 = vpop.f32.mrf.mxu1 }
 0x164   : > { %2972 = vmatpush2.msra.mxu1 %v1910_v34  ;;  %2813 = vmatpush2.msra.mxu0 %v5457_v62  ;;  %v5686_v55 = vpop.f32.mrf.mxu0 }
 0x165   : > { %2973 = vmatprep.subr.mxu1 %v2904_v39  ;;  %2814 = vmatprep.subr.mxu0 %v5683_v46  ;;  %v2255_v34 = vmax.f32 %v2229_v57, %v2247_v37  ;;  %v5692_v60 = vmul.f32 0.01, %v5686_v55  ;;  %v7129_v39 = vmax.f32 %v7127_v36, %v7128_v15  ;;  %v5727_v57 = vld [vmem:[%s7085_s2 + $0x28] sm:$0xff]  ;;  %v5742_v37 = vld [vmem:[%s7085_s2 + $0x20] sm:$0xff]  ;;  %v2357_v8 = vpop.f32.mrf.mxu1 }
 0x166   : > { %2974 = vmatpush2.msra.mxu1 %v7121_v28  ;;  %2815 = vmatpush2.msra.mxu0 %v7122_v51  ;;  %v2235_v18 = vpop.f32.mrf.mxu0  ;;  %v3059_v40 = vld [vmem:[#allocation3 + $0x1f8] sm:$0xff]  ;;  %v4729_v15 = vld [vmem:[%s7087_s4 + $0x8] sm:$0xff] }
 0x167   : > { %2975 = vmatprep.subr.mxu1 %v2902_v6  ;;  %2816 = vmatprep.subr.mxu0 %v5695_v1  ;;  %2263 = vst.msk [vmem:[#allocation3 + $0x218] sm:$0xff] %vm404_vm2, %v2255_v34  ;;  %v2256_v44 = vmax.f32 %v5686_v55, %v5692_v60  ;;  %v2249_v49 = vmul.f32 0.01, %v2235_v18  ;;  %v5773_v34 = vld [vmem:[%s7085_s2 + $0x30] sm:$0xff] }
 0x168   : > { %2976 = vmatpush2.msra.mxu1 %v7125_v58  ;;  %2817 = vmatpush2.msra.mxu0 %v7126_v0  ;;  %v5706_v29 = vpop.f32.mrf.mxu0 }
 0x169   : > { %2977 = vmatprep.subr.mxu1 %v2900_v59  ;;  %2819 = vmatmul.mubr.f32.vlgmr.msra.gmra.mxu0 %v5447_v43  ;;  %v2257_v25 = vmax.f32 %v2235_v18, %v2249_v49  ;;  %v5714_v12 = vmul.f32 0.01, %v5706_v29 }
 0x16a   : > { %3076 = vmatprep.subr.mxu0 %v3059_v40  ;;  %2978 = vmatpush2.msra.mxu1 %v7129_v39  ;;  %v2241_v54 = vpop.f32.mrf.mxu0  ;;  %v3061_v36 = vld [vmem:[#allocation3 + $0x208] sm:$0xff]  ;;  %v4730_v39 = vld [vmem:[%s7087_s4 + $0x18] sm:$0xff] }
 0x16b   : > { %3077 = vmatpush1.msra.mxu0 %v2026_v32  ;;  %4695 = vmatprep.mubr.msk.f32.mxu0 %vm2580_vm1, %v5612_v53  ;;  %2265 = vst.msk [vmem:[#allocation3 + $0x228] sm:$0xff] %vm404_vm2, %v2257_v25  ;;  %v2258_v23 = vmax.f32 %v5706_v29, %v5714_v12  ;;  %v2251_v7 = vmul.f32 0.01, %v2241_v54  ;;  %v3055_v32 = vld [vmem:[#allocation3 + $0x1d8] sm:$0xff]  ;;  %v4728_v12 = vld [vmem:[%s7087_s4] sm:$0xff] }
 0x16c   : > { %3078 = vmatprep.subr.mxu0 %v3057_v61  ;;  %2664 = vmatmul.mubr.f32.gmra.mxu1 %v5711_v52  ;;  %v5736_v6 = vpop.f32.mrf.mxu0 }
 0x16d   : > { %3079 = vmatpush1.msra.mxu0 %v2024_v48  ;;  %v2259_v28 = vmax.f32 %v2241_v54, %v2251_v7  ;;  %v5745_v59 = vmul.f32 0.01, %v5736_v6  ;;  %4692 = vmatprep.mubr.msk.f32.mxu1 %vm2580_vm1, %v5727_v57  ;;  %v5757_v48 = vld [vmem:[%s7085_s2 + $0x38] sm:$0xff]  ;;  %v4731_v54 = vld [vmem:[%s7087_s4 + $0x10] sm:$0xff] }
 0x16e   : > { %3080 = vmatprep.subr.mxu0 %v3055_v32  ;;  %2825 = vmatmul.mubr.f32.gmra.mxu0 %v5711_v52  ;;  %v2455_v27 = vpop.f32.mrf.mxu0 }
 0x16f   : > { %3081 = vmatpush1.msra.mxu0 %v2022_v14  ;;  %4696 = vmatprep.mubr.msk.f32.mxu0 %vm2580_vm1, %v5727_v57  ;;  %2267 = vst.msk [vmem:[#allocation3 + $0x238] sm:$0xff] %vm404_vm2, %v2259_v28  ;;  %v2484_v22 = vmax.f32 %v5736_v6, %v5745_v59  ;;  %v2477_v9 = vmul.f32 0.01, %v2455_v27 }
 0x170   : > { %3082 = vmatprep.subr.mxu0 %v3053_v31  ;;  %2670 = vmatmul.mubr.f32.gmra.mxu1 %v5742_v37  ;;  %v5767_v14 = vpop.f32.mrf.mxu0 }
 0x171   : > { %3083 = vmatpush1.msra.mxu0 %v2020_v16  ;;  %v2485_v18 = vmax.f32 %v2455_v27, %v2477_v9  ;;  %v5776_v40 = vmul.f32 0.01, %v5767_v14  ;;  %4693 = vmatprep.mubr.msk.f32.mxu1 %vm2580_vm1, %v5757_v48 }
 0x172   : > { %3084 = vmatprep.subr.mxu0 %v5615_v5  ;;  %2831 = vmatmul.mubr.f32.gmra.mxu0 %v5742_v37  ;;  %v2461_v17 = vpop.f32.mrf.mxu0 }
 0x173   : > { %3085 = vmatpush1.msra.mxu0 %v5566_v19  ;;  %4697 = vmatprep.mubr.msk.f32.mxu0 %vm2580_vm1, %v5757_v48  ;;  %2493 = vst.msk [vmem:[#allocation3 + $0x248] sm:$0xff] %vm404_vm2, %v2485_v18  ;;  %v2486_v13 = vmax.f32 %v5767_v14, %v5776_v40  ;;  %v2479_v16 = vmul.f32 0.01, %v2461_v17 }
 0x174   : > { %3086 = vmatprep.subr.mxu0 %v5629_v42  ;;  %2676 = vmatmul.mubr.f32.gmra.mxu1 %v5773_v34  ;;  %v2465_v19 = vpop.f32.mrf.mxu0 }
 0x175   : > { %3087 = vmatpush1.msra.mxu0 %v5545_v11  ;;  %v2487_v5 = vmax.f32 %v2461_v17, %v2479_v16  ;;  %v2480_v42 = vmul.f32 0.01, %v2465_v19  ;;  %4698 = vmatprep.mubr.msk.f32.mxu1 %vm2580_vm1, %v4727_v4 }
 0x176   : > { %3088 = vmatprep.subr.mxu0 %v5639_v21  ;;  %2837 = vmatmul.mubr.f32.gmra.mxu0 %v5773_v34  ;;  %v2467_v11 = vpop.f32.mrf.mxu0 }
 0x177   : > { %3089 = vmatpush1.msra.mxu0 %v5524_v33  ;;  %4702 = vmatprep.mubr.msk.f32.mxu0 %vm2580_vm1, %v4727_v4  ;;  %2495 = vst.msk [vmem:[#allocation3 + $0x258] sm:$0xff] %vm404_vm2, %v2487_v5  ;;  %v2488_v21 = vmax.f32 %v2465_v19, %v2480_v42  ;;  %v2481_v63 = vmul.f32 0.01, %v2467_v11 }
 0x178   : > { %3090 = vmatprep.subr.mxu0 %v5651_v2  ;;  %2980 = vmatmul.mubr.f32.vlgmr.msra.gmra.mxu1 %v5447_v43  ;;  %v2471_v33 = vpop.f32.mrf.mxu0 }
 0x179   : > { %3091 = vmatpush1.msra.mxu0 %v5503_v10  ;;  %4699 = vmatprep.mubr.msk.f32.mxu1 %vm2580_vm1, %v5612_v53  ;;  %v2489_v58 = vmax.f32 %v2467_v11, %v2481_v63  ;;  %v2482_v49 = vmul.f32 0.01, %v2471_v33 }
 0x17a   : > { %3092 = vmatprep.subr.mxu0 %v5661_v35  ;;  %v2473_v2 = vpop.f32.mrf.mxu0  ;;  %v3030_v35 = vld [vmem:[#allocation3 + $0x110] sm:$0xff] }
 0x17b   : > { %3093 = vmatpush1.msra.mxu0 %v5478_v47  ;;  %2497 = vst.msk [vmem:[#allocation3 + $0x268] sm:$0xff] %vm404_vm2, %v2489_v58  ;;  %v2490_v25 = vmax.f32 %v2471_v33, %v2482_v49  ;;  %v2483_v61 = vmul.f32 0.01, %v2473_v2  ;;  %v3032_v47 = vld [vmem:[#allocation3 + $0x120] sm:$0xff] }
 0x17c   : > { %3094 = vmatprep.subr.mxu0 %v5673_v38  ;;  %2986 = vmatmul.mubr.f32.gmra.mxu1 %v5711_v52  ;;  %v7130_v38 = vmov 0.0  }
 0x17d   : > { %3095 = vmatpush1.msra.mxu0 %v5457_v62  ;;  %4700 = vmatprep.mubr.msk.f32.mxu1 %vm2580_vm1, %v5727_v57  ;;  %v2491_v10 = vmax.f32 %v2473_v2, %v2483_v61  ;;  %v3034_v62 = vld [vmem:[#allocation3 + $0x130] sm:$0xff] }
 0x17e   : > { %3096 = vmatprep.subr.mxu0 %v5683_v46 }
 0x17f   : > { %3097 = vmatpush1.msra.mxu0 %v7122_v51  ;;  %2499 = vst.msk [vmem:[#allocation3 + $0x278] sm:$0xff] %vm404_vm2, %v2491_v10 }
 0x180   : > { %3098 = vmatprep.subr.mxu0 %v5695_v1  ;;  %2992 = vmatmul.mubr.f32.gmra.mxu1 %v5742_v37  ;;  %v3065_v1 = vld [vmem:[#allocation3 + $0x228] sm:$0xff] }
 0x181   : > { %3099 = vmatpush1.msra.mxu0 %v7126_v0  ;;  %4701 = vmatprep.mubr.msk.f32.mxu1 %vm2580_vm1, %v5757_v48  ;;  %v3063_v0 = vld [vmem:[#allocation3 + $0x218] sm:$0xff] }
 0x182   : > { %3100 = vmatprep.subr.mxu0 %v5452_v56  ;;  %v3028_v56 = vld [vmem:[#allocation3 + $0x100] sm:$0xff]  ;;  %v3073_v51 = vld [vmem:[#allocation3 + $0x268] sm:$0xff] }
 0x183   : > { %3101 = vmatpush1.msra.mxu0 %v3034_v62 }
 0x184   : > { %3102 = vmatprep.subr.mxu0 %v5469_v20  ;;  %2998 = vmatmul.mubr.f32.gmra.mxu1 %v5773_v34  ;;  %v3071_v20 = vld [vmem:[#allocation3 + $0x258] sm:$0xff] }
 0x185   : > { %3103 = vmatpush1.msra.mxu0 %v3032_v47  ;;  %3313 = vmatprep.mubr.f32.mxu1 %v7130_v38 }
 0x186   : > { %3104 = vmatprep.subr.mxu0 %v5484_v3  ;;  %v3075_v46 = vld [vmem:[#allocation3 + $0x278] sm:$0xff]  ;;  %v3069_v3 = vld [vmem:[#allocation3 + $0x248] sm:$0xff] }
 0x187   : > { %3105 = vmatpush1.msra.mxu0 %v3030_v35 }
 0x188   : > { %3106 = vmatprep.subr.mxu0 %v5494_v41  ;;  %v3067_v41 = vld [vmem:[#allocation3 + $0x238] sm:$0xff] }
 0x189   : > { %3107 = vmatpush1.msra.mxu0 %v3028_v56 }
 0x18a   : > { %3124 = vmatprep.subr.mxu0 %v3075_v46 }
 0x18b   : > { %3125 = vmatpush2.msra.mxu0 %v2490_v25 }
 0x18c   : > { %3126 = vmatprep.subr.mxu0 %v3073_v51 }
 0x18d   : > { %3127 = vmatpush2.msra.mxu0 %v2488_v21 }
 0x18e   : > { %3128 = vmatprep.subr.mxu0 %v3071_v20 }
 0x18f   : > { %3129 = vmatpush2.msra.mxu0 %v2486_v13 }
 0x190   : > { %3130 = vmatprep.subr.mxu0 %v3069_v3 }
 0x191   : > { %3131 = vmatpush2.msra.mxu0 %v2484_v22 }
 0x192   : > { %3132 = vmatprep.subr.mxu0 %v3067_v41 }
 0x193   : > { %3133 = vmatpush2.msra.mxu0 %v2258_v23 }
 0x194   : > { %3134 = vmatprep.subr.mxu0 %v3065_v1 }
 0x195   : > { %3135 = vmatpush2.msra.mxu0 %v2256_v44 }
 0x196   : > { %3136 = vmatprep.subr.mxu0 %v3063_v0 }
 0x197   : > { %3137 = vmatpush2.msra.mxu0 %v2254_v30 }
 0x198   : > { %3138 = vmatprep.subr.mxu0 %v3061_v36 }
 0x199   : > { %3139 = vmatpush2.msra.mxu0 %v2252_v45 }
 0x19a   : > { %3141 = vmatmul.mubr.f32.vlgmr.msra.gmra.mxu0 %v5447_v43 }
 0x19b   : > { %4703 = vmatprep.mubr.msk.f32.mxu0 %vm2580_vm1, %v5612_v53 }
 0x19e   : > { %3147 = vmatmul.mubr.f32.gmra.mxu0 %v5711_v52  ;;  %v4742_v52 = vmov 1  }
 0x19f   : > { %4704 = vmatprep.mubr.msk.f32.mxu0 %vm2580_vm1, %v5727_v57  ;;  %4725 = vset.pattern.permute.xlu0 %v4742_v52 }
 0x1a0   : > { %4726 = vset.pattern.permute.xlu1 %v4742_v52  ;;  %3195 = vperm.xlu0 %4725, %v4728_v12  }
 0x1a1   : > { %v5853_v26 = vpop.permute.xlu1 %2519  ;;  %3200 = vperm.xlu1 %4726, %v4729_v15  }
 0x1a2   : > { %3153 = vmatmul.mubr.f32.gmra.mxu0 %v5742_v37 }
 0x1a3   : > { %4705 = vmatprep.mubr.msk.f32.mxu0 %vm2580_vm1, %v5757_v48  ;;  %v5879_v23 = vpop.permute.xlu0 %2529 }
 0x1a4   : > { %3210 = vperm.xlu0 %4725, %v4730_v39  }
 0x1a5   : > { %v5855_v43 = vpop.permute.xlu1 %2514  ;;  %3205 = vperm.xlu1 %4726, %v4731_v54  }
 0x1a6   : > { %3159 = vmatmul.mubr.f32.gmra.mxu0 %v5773_v34 }
 0x1a7   : > { %v5900_v40 = vpop.permute.xlu0 %2524 }
 0x1f9   : > { %v2659_v45 = vpop.f32.mrf.mxu1 }
 0x1fa   : > { %v5858_v53 = vadd.f32 %v2659_v45, %v5855_v43 }
 0x1fb   : > { %v2661_v50 = vpop.f32.mrf.mxu1 }
 0x1fc   : > { %v5861_v30 = vmul.f32 0.01, %v5858_v53  ;;  %v2662_v55 = vadd.f32 %v2661_v50, %v5855_v43 }
 0x1fe   : > { %v2690_v60 = vmax.f32 %v5858_v53, %v5861_v30  ;;  %v2683_v44 = vmul.f32 0.01, %v2662_v55  ;;  %v3216_v53 = vld [vmem:[%s7086_s3 + $0x18] sm:$0xff] }
 0x200   : > { %v2691_v29 = vmax.f32 %v2662_v55, %v2683_v44 }
 0x202   : > { %2699 = vst.msk [vmem:[#allocation4 + $0x8] sm:$0xff] %vm404_vm2, %v2691_v29 }
 0x21b   : > { %v3196_v30 = vpop.permute.xlu0 %3195 }
 0x229   : > { %v2820_v57 = vpop.f32.mrf.mxu0 }
 0x22a   : > { %v5882_v7 = vadd.f32 %v2820_v57, %v5855_v43 }
 0x22b   : > { %v2822_v32 = vpop.f32.mrf.mxu0 }
 0x22c   : > { %v5885_v6 = vmul.f32 0.01, %v5882_v7  ;;  %v2823_v37 = vadd.f32 %v2822_v32, %v5855_v43  ;;  %v2665_v28 = vpop.f32.mrf.mxu1 }
 0x22d   : > { %v5889_v59 = vadd.f32 %v2665_v28, %v5853_v26 }
 0x22e   : > { %v2826_v31 = vpop.f32.mrf.mxu0  ;;  %v2851_v27 = vmax.f32 %v5882_v7, %v5885_v6  ;;  %v2844_v48 = vmul.f32 0.01, %v2823_v37  ;;  %v2667_v9 = vpop.f32.mrf.mxu1  ;;  %v3218_v7 = vld [vmem:[#allocation4 + $0x8] sm:$0xff]  ;;  %v3213_v6 = vld [vmem:[%s7086_s3] sm:$0xff] }
 0x22f   : > { %v5894_v22 = vadd.f32 %v2826_v31, %v5853_v26  ;;  %v5897_v14 = vmul.f32 0.01, %v5889_v59  ;;  %v2668_v34 = vadd.f32 %v2667_v9, %v5853_v26 }
 0x230   : > { %v2828_v18 = vpop.f32.mrf.mxu0  ;;  %v2852_v17 = vmax.f32 %v2823_v37, %v2844_v48  ;;  %v2671_v19 = vpop.f32.mrf.mxu1 }
 0x231   : > { %v5903_v13 = vmul.f32 0.01, %v5894_v22  ;;  %v2829_v16 = vadd.f32 %v2828_v18, %v5853_v26  ;;  %v2692_v5 = vmax.f32 %v5889_v59, %v5897_v14  ;;  %v2685_v42 = vmul.f32 0.01, %v2668_v34  ;;  %v3215_v59 = vld [vmem:[%s7086_s3 + $0x10] sm:$0xff] }
 0x232   : > { %v2832_v4 = vpop.f32.mrf.mxu0  ;;  %v5909_v11 = vadd.f32 %v2671_v19, %v5900_v40  ;;  %2860 = vst.msk [vmem:[#allocation4 + $0x48] sm:$0xff] %vm404_vm2, %v2852_v17  ;;  %v2673_v58 = vpop.f32.mrf.mxu1 }
 0x233   : > { %v2853_v21 = vmax.f32 %v5894_v22, %v5903_v13  ;;  %v2846_v63 = vmul.f32 0.01, %v2829_v16  ;;  %v5915_v33 = vadd.f32 %v2832_v4, %v5900_v40  ;;  %v2693_v49 = vmax.f32 %v2668_v34, %v2685_v42 }
 0x234   : > { %v5918_v2 = vmul.f32 0.01, %v5909_v11  ;;  %v2674_v25 = vadd.f32 %v2673_v58, %v5900_v40  ;;  %v2834_v61 = vpop.f32.mrf.mxu0  ;;  %v2677_v35 = vpop.f32.mrf.mxu1 }
 0x235   : > { %v2854_v10 = vmax.f32 %v2829_v16, %v2846_v63  ;;  %v5922_v62 = vmul.f32 0.01, %v5915_v33  ;;  %v2835_v47 = vadd.f32 %v2834_v61, %v5900_v40  ;;  %2701 = vst.msk [vmem:[#allocation4 + $0x18] sm:$0xff] %vm404_vm2, %v2693_v49  ;;  %v5929_v51 = vadd.f32 %v2677_v35, %v5879_v23 }
 0x236   : > { %v2694_v56 = vmax.f32 %v5909_v11, %v5918_v2  ;;  %v2687_v46 = vmul.f32 0.01, %v2674_v25  ;;  %v2838_v20 = vpop.f32.mrf.mxu0  ;;  %v2679_v0 = vpop.f32.mrf.mxu1 }
 0x237   : > { %2862 = vst.msk [vmem:[#allocation4 + $0x58] sm:$0xff] %vm404_vm2, %v2854_v10  ;;  %v2855_v3 = vmax.f32 %v5915_v33, %v5922_v62  ;;  %v2848_v41 = vmul.f32 0.01, %v2835_v47  ;;  %v5935_v1 = vadd.f32 %v2838_v20, %v5879_v23  ;;  %v5938_v24 = vmul.f32 0.01, %v5929_v51  ;;  %v3363_v62 = vld [vmem:[%s7088_s5 + $0x48] sm:$0xff] }
 0x238   : > { %v2695_v36 = vmax.f32 %v2674_v25, %v2687_v46  ;;  %v2680_v8 = vadd.f32 %v2679_v0, %v5879_v23  ;;  %v2840_v45 = vpop.f32.mrf.mxu0  ;;  %v2981_v29 = vpop.f32.mrf.mxu1 }
 0x239   : > { %v2856_v50 = vmax.f32 %v2835_v47, %v2848_v41  ;;  %v5942_v55 = vmul.f32 0.01, %v5935_v1  ;;  %v2841_v44 = vadd.f32 %v2840_v45, %v5879_v23  ;;  %v2696_v52 = vmax.f32 %v5929_v51, %v5938_v24  ;;  %v3362_v24 = vld [vmem:[%s7088_s5 + $0x40] sm:$0xff] }
 0x23a   : > { %2703 = vst.msk [vmem:[#allocation4 + $0x28] sm:$0xff] %vm404_vm2, %v2695_v36  ;;  %v2689_v12 = vmul.f32 0.01, %v2680_v8  ;;  %v5949_v15 = vadd.f32 %v2981_v29, %v5855_v43  ;;  %v2983_v57 = vpop.f32.mrf.mxu1 }
 0x23b   : > { %2864 = vst.msk [vmem:[#allocation4 + $0x68] sm:$0xff] %vm404_vm2, %v2856_v50  ;;  %v2857_v39 = vmax.f32 %v5935_v1, %v5942_v55  ;;  %v2850_v54 = vmul.f32 0.01, %v2841_v44  ;;  %v2984_v28 = vadd.f32 %v2983_v57, %v5855_v43  ;;  %v3354_v55 = vld [vmem:[%s7088_s5] sm:$0xff] }
 0x23c   : > { %v2697_v32 = vmax.f32 %v2680_v8, %v2689_v12  ;;  %v5955_v37 = vmul.f32 0.01, %v5949_v15  ;;  %v2987_v48 = vpop.f32.mrf.mxu1  ;;  %v3220_v22 = vld [vmem:[#allocation4 + $0x18] sm:$0xff] }
 0x23d   : > { %v2858_v31 = vmax.f32 %v2841_v44, %v2850_v54  ;;  %v3005_v34 = vmul.f32 0.01, %v2984_v28  ;;  %v5962_v18 = vadd.f32 %v2987_v48, %v5853_v26 }
 0x23e   : > { %2705 = vst.msk [vmem:[#allocation4 + $0x38] sm:$0xff] %vm404_vm2, %v2697_v32  ;;  %v3012_v9 = vmax.f32 %v5949_v15, %v5955_v37  ;;  %v2989_v17 = vpop.f32.mrf.mxu1  ;;  %v3226_v15 = vld [vmem:[#allocation4 + $0x48] sm:$0xff] }
 0x23f   : > { %2866 = vst.msk [vmem:[#allocation4 + $0x78] sm:$0xff] %vm404_vm2, %v2858_v31  ;;  %v3013_v16 = vmax.f32 %v2984_v28, %v3005_v34  ;;  %v5966_v19 = vmul.f32 0.01, %v5962_v18  ;;  %v2990_v42 = vadd.f32 %v2989_v17, %v5853_v26 }
 0x240   : > { %v2993_v4 = vpop.f32.mrf.mxu1 }
 0x241   : > { %3021 = vst.msk [vmem:[#allocation4 + $0x88] sm:$0xff] %vm404_vm2, %v3013_v16  ;;  %v3014_v63 = vmax.f32 %v5962_v18, %v5966_v19  ;;  %v3007_v58 = vmul.f32 0.01, %v2990_v42  ;;  %v5973_v49 = vadd.f32 %v2993_v4, %v5900_v40  ;;  %v3228_v18 = vld [vmem:[#allocation4 + $0x58] sm:$0xff]  ;;  %v3222_v33 = vld [vmem:[#allocation4 + $0x28] sm:$0xff] }
 0x242   : > { %v2995_v25 = vpop.f32.mrf.mxu1 }
 0x243   : > { %v3015_v61 = vmax.f32 %v2990_v42, %v3007_v58  ;;  %v5976_v10 = vmul.f32 0.01, %v5973_v49  ;;  %v2996_v47 = vadd.f32 %v2995_v25, %v5900_v40 }
 0x244   : > { %v2999_v35 = vpop.f32.mrf.mxu1 }
 0x245   : > { %3023 = vst.msk [vmem:[#allocation4 + $0x98] sm:$0xff] %vm404_vm2, %v3015_v61  ;;  %v3016_v46 = vmax.f32 %v5973_v49, %v5976_v10  ;;  %v3009_v20 = vmul.f32 0.01, %v2996_v47  ;;  %v3000_v41 = vadd.f32 %v2999_v35, %v5879_v23  ;;  %v3230_v49 = vld [vmem:[#allocation4 + $0x68] sm:$0xff]  ;;  %v3224_v1 = vld [vmem:[#allocation4 + $0x38] sm:$0xff] }
 0x246   : > { %v3001_v0 = vpop.f32.mrf.mxu1 }
 0x247   : > { %v3017_v36 = vmax.f32 %v2996_v47, %v3009_v20  ;;  %v3010_v8 = vmul.f32 0.01, %v3000_v41  ;;  %v3002_v45 = vadd.f32 %v3001_v0, %v5879_v23 }
 0x249   : > { %3025 = vst.msk [vmem:[#allocation4 + $0xa8] sm:$0xff] %vm404_vm2, %v3017_v36  ;;  %v3018_v50 = vmax.f32 %v3000_v41, %v3010_v8  ;;  %v3011_v44 = vmul.f32 0.01, %v3002_v45 }
 0x24b   : > { %v3019_v29 = vmax.f32 %v3002_v45, %v3011_v44 }
 0x24d   : > { %3027 = vst.msk [vmem:[#allocation4 + $0xb8] sm:$0xff] %vm404_vm2, %v3019_v29 }
 0x25a   : > { %v3142_v12 = vpop.f32.mrf.mxu0 }
 0x25b   : > { %v3143_v54 = vadd.f32 %v3142_v12, %v5855_v43 }
 0x25c   : > { %v3144_v57 = vpop.f32.mrf.mxu0 }
 0x25d   : > { %v3165_v32 = vmul.f32 0.01, %v3143_v54  ;;  %v3145_v28 = vadd.f32 %v3144_v57, %v5855_v43 }
 0x25e   : > { %v3148_v31 = vpop.f32.mrf.mxu0 }
 0x25f   : > { %v3173_v48 = vmax.f32 %v3143_v54, %v3165_v32  ;;  %v3166_v34 = vmul.f32 0.01, %v3145_v28  ;;  %v3149_v17 = vadd.f32 %v3148_v31, %v5853_v26 }
 0x260   : > { %v3150_v16 = vpop.f32.mrf.mxu0 }
 0x261   : > { %v3174_v42 = vmax.f32 %v3145_v28, %v3166_v34  ;;  %v3167_v4 = vmul.f32 0.01, %v3149_v17  ;;  %v3151_v58 = vadd.f32 %v3150_v16, %v5853_v26  ;;  %v3238_v16 = vld [vmem:[#allocation4 + $0xa8] sm:$0xff] }
 0x262   : > { %v3154_v25 = vpop.f32.mrf.mxu0 }
 0x263   : > { %3182 = vst.msk [vmem:[#allocation4 + $0xc8] sm:$0xff] %vm404_vm2, %v3174_v42  ;;  %v3175_v61 = vmax.f32 %v3149_v17, %v3167_v4  ;;  %v3168_v47 = vmul.f32 0.01, %v3151_v58  ;;  %v3155_v35 = vadd.f32 %v3154_v25, %v5900_v40  ;;  %v3236_v42 = vld [vmem:[#allocation4 + $0x98] sm:$0xff]  ;;  %v3234_v4 = vld [vmem:[#allocation4 + $0x88] sm:$0xff] }
 0x264   : > { %v3156_v20 = vpop.f32.mrf.mxu0 }
 0x265   : > { %v3176_v41 = vmax.f32 %v3151_v58, %v3168_v47  ;;  %v3169_v43 = vmul.f32 0.01, %v3155_v35  ;;  %v3157_v0 = vadd.f32 %v3156_v20, %v5900_v40  ;;  %v3418_v47 = vld [vmem:[%s7088_s5 + $0x200] sm:$0xff]  ;;  %v3435_v20 = vld [vmem:[%s7088_s5 + $0x288] sm:$0xff] }
 0x266   : > { %v3160_v36 = vpop.f32.mrf.mxu0 }
 0x267   : > { %3184 = vst.msk [vmem:[#allocation4 + $0xd8] sm:$0xff] %vm404_vm2, %v3176_v41  ;;  %v3177_v8 = vmax.f32 %v3155_v35, %v3169_v43  ;;  %v3170_v45 = vmul.f32 0.01, %v3157_v0  ;;  %v3161_v44 = vadd.f32 %v3160_v36, %v5879_v23  ;;  %v3370_v35 = vld [vmem:[%s7088_s5 + $0x80] sm:$0xff] }
 0x268   : > { %v3162_v26 = vpop.f32.mrf.mxu0 }
 0x269   : > { %v3178_v29 = vmax.f32 %v3157_v0, %v3170_v45  ;;  %v3171_v12 = vmul.f32 0.01, %v3161_v44  ;;  %v3163_v54 = vadd.f32 %v3162_v26, %v5879_v23  ;;  %v3240_v23 = vld [vmem:[#allocation4 + $0xb8] sm:$0xff] }
 0x26a   : > { %v3242_v17 = vld [vmem:[#allocation4 + $0xc8] sm:$0xff] }
 0x26b   : > { %3186 = vst.msk [vmem:[#allocation4 + $0xe8] sm:$0xff] %vm404_vm2, %v3178_v29  ;;  %v3179_v57 = vmax.f32 %v3161_v44, %v3171_v12  ;;  %v3172_v32 = vmul.f32 0.01, %v3163_v54  ;;  %v3443_v12 = vld [vmem:[%s7088_s5 + $0x2c8] sm:$0xff] }
 0x26d   : > { %v3180_v28 = vmax.f32 %v3163_v54, %v3172_v32  ;;  %v3426_v54 = vld [vmem:[%s7088_s5 + $0x240] sm:$0xff]  ;;  %v3379_v32 = vld [vmem:[%s7088_s5 + $0xc8] sm:$0xff] }
 0x26e   : > { %v3244_v34 = vld [vmem:[#allocation4 + $0xd8] sm:$0xff] }
 0x26f   : > { %3188 = vst.msk [vmem:[#allocation4 + $0xf8] sm:$0xff] %vm404_vm2, %v3180_v28 }
 0x272   : > { %v3246_v31 = vld [vmem:[#allocation4 + $0xe8] sm:$0xff] }
 0x276   : > { %v3248_v40 = vld [vmem:[#allocation4 + $0xf8] sm:$0xff] }
 0x277   : > { %3249 = vmatprep.subr.mxu1 %v3248_v40 }
 0x278   : > { %3250 = vmatpush1.msra.mxu1 %v3179_v57  ;;  %v3434_v57 = vld [vmem:[%s7088_s5 + $0x280] sm:$0xff] }
 0x279   : > { %3251 = vmatprep.subr.mxu1 %v3246_v31 }
 0x27a   : > { %3252 = vmatpush1.msra.mxu1 %v3177_v8 }
 0x27b   : > { %3253 = vmatprep.subr.mxu1 %v3244_v34 }
 0x27c   : > { %3254 = vmatpush1.msra.mxu1 %v3175_v61  ;;  %v3201_v61 = vpop.permute.xlu1 %3200 }
 0x27d   : > { %3255 = vmatprep.subr.mxu1 %v3242_v17 }
 0x27e   : > { %3256 = vmatpush1.msra.mxu1 %v3173_v48  ;;  %v3232_v48 = vld [vmem:[#allocation4 + $0x78] sm:$0xff] }
 0x27f   : > { %3257 = vmatprep.subr.mxu1 %v3240_v23 }
 0x280   : > { %3258 = vmatpush1.msra.mxu1 %v3018_v50 }
 0x281   : > { %3259 = vmatprep.subr.mxu1 %v3238_v16 }
 0x282   : > { %3260 = vmatpush1.msra.mxu1 %v3016_v46  ;;  %v3427_v46 = vld [vmem:[%s7088_s5 + $0x248] sm:$0xff] }
 0x283   : > { %3261 = vmatprep.subr.mxu1 %v3236_v42 }
 0x284   : > { %3262 = vmatpush1.msra.mxu1 %v3014_v63 }
 0x285   : > { %3263 = vmatprep.subr.mxu1 %v3234_v4 }
 0x286   : > { %3264 = vmatpush1.msra.mxu1 %v3012_v9 }
 0x287   : > { %3265 = vmatprep.subr.mxu1 %v3232_v48 }
 0x288   : > { %3266 = vmatpush1.msra.mxu1 %v2857_v39 }
 0x289   : > { %3267 = vmatprep.subr.mxu1 %v3230_v49  ;;  %v3387_v49 = vld [vmem:[%s7088_s5 + $0x108] sm:$0xff] }
 0x28a   : > { %3268 = vmatpush1.msra.mxu1 %v2855_v3 }
 0x28b   : > { %3269 = vmatprep.subr.mxu1 %v3228_v18  ;;  %v3507_v18 = vld [vmem:[%s7088_s5 + $0x4c8] sm:$0xff] }
 0x28c   : > { %3270 = vmatpush1.msra.mxu1 %v2853_v21 }
 0x28d   : > { %3271 = vmatprep.subr.mxu1 %v3226_v15  ;;  %v3442_v15 = vld [vmem:[%s7088_s5 + $0x2c0] sm:$0xff] }
 0x28e   : > { %3272 = vmatpush1.msra.mxu1 %v2851_v27  ;;  %v3214_v27 = vld [vmem:[%s7086_s3 + $0x8] sm:$0xff] }
 0x28f   : > { %3273 = vmatprep.subr.mxu1 %v3224_v1  ;;  %v3378_v1 = vld [vmem:[%s7088_s5 + $0xc0] sm:$0xff] }
 0x290   : > { %3274 = vmatpush1.msra.mxu1 %v2696_v52  ;;  %v3371_v52 = vld [vmem:[%s7088_s5 + $0x88] sm:$0xff] }
 0x291   : > { %3275 = vmatprep.subr.mxu1 %v3222_v33 }
 0x292   : > { %3276 = vmatpush1.msra.mxu1 %v2694_v56  ;;  %v3419_v56 = vld [vmem:[%s7088_s5 + $0x208] sm:$0xff] }
 0x293   : > { %3277 = vmatprep.subr.mxu1 %v3220_v22 }
 0x294   : > { %3278 = vmatpush1.msra.mxu1 %v2692_v5 }
 0x295   : > { %3279 = vmatprep.subr.mxu1 %v3218_v7 }
 0x296   : > { %3280 = vmatpush1.msra.mxu1 %v2690_v60 }
 0x297   : > { %3314 = vmatmul.mubr.f32.vlgmr.msra.gmra.mxu1 %v3213_v6 }
 0x298   : > { %3319 = vmatprep.mubr.f32.mxu1 %v7130_v38 }
 0x29b   : > { %3320 = vmatmul.mubr.f32.gmra.mxu1 %v3214_v27 }
 0x29c   : > { %3325 = vmatprep.mubr.f32.mxu1 %v7130_v38 }
 0x29f   : > { %3326 = vmatmul.mubr.f32.gmra.mxu1 %v3215_v59 }
 0x2a0   : > { %3331 = vmatprep.mubr.f32.mxu1 %v7130_v38  ;;  %v3355_v38 = vld [vmem:[%s7088_s5 + $0x8] sm:$0xff] }
 0x2a3   : > { %3332 = vmatmul.mubr.f32.gmra.mxu1 %v3216_v53 }
 0x357   : > { %v3315_v60 = vpop.f32.mrf.mxu1 }
 0x358   : > { %v3316_v14 = vadd.f32 %v3315_v60, %v3196_v30 }
 0x359   : > { %v3317_v13 = vpop.f32.mrf.mxu1 }
 0x35a   : > { %v3338_v5 = vmul.f32 0.01, %v3316_v14  ;;  %v3318_v11 = vadd.f32 %v3317_v13, %v3196_v30  ;;  %v3451_v13 = vld [vmem:[%s7088_s5 + $0x308] sm:$0xff] }
 0x35b   : > { %v3321_v3 = vpop.f32.mrf.mxu1 }
 0x35c   : > { %v3339_v21 = vmul.f32 0.01, %v3318_v11  ;;  %v6046_v2 = vmax.f32 %v3316_v14, %v3338_v5  ;;  %v3322_v28 = vadd.f32 %v3321_v3, %v3201_v61  ;;  %v3365_v5 = vld [vmem:[%s7088_s5 + $0x58] sm:$0xff] }
 0x35d   : > { %v3323_v50 = vpop.f32.mrf.mxu1 }
 0x35e   : > { %v6057_v51 = vmax.f32 %v3318_v11, %v3339_v21  ;;  %v3522_v19 = vmul.f32 %v3362_v24, %v6046_v2  ;;  %v3514_v63 = vmul.f32 %v3354_v55, %v6046_v2  ;;  %v3324_v0 = vadd.f32 %v3323_v50, %v3201_v61  ;;  %v3386_v11 = vld [vmem:[%s7088_s5 + $0x100] sm:$0xff] }
 0x35f   : > { %v3578_v44 = vmul.f32 %v3418_v47, %v6046_v2  ;;  %v3530_v26 = vmul.f32 %v3370_v35, %v6046_v2  ;;  %v3586_v42 = vmul.f32 %v3426_v54, %v6046_v2  ;;  %v3594_v4 = vmul.f32 %v3434_v57, %v6046_v2  ;;  %v3506_v21 = vld [vmem:[%s7088_s5 + $0x4c0] sm:$0xff]  ;;  %v3420_v35 = vld [vmem:[%s7088_s5 + $0x210] sm:$0xff] }
 0x360   : > { %v3523_v39 = vmul.f32 %v3363_v62, %v6057_v51  ;;  %v3515_v37 = vmul.f32 %v3355_v38, %v6057_v51  ;;  %v3579_v9 = vmul.f32 %v3419_v56, %v6057_v51  ;;  %v3531_v10 = vmul.f32 %v3371_v52, %v6057_v51  ;;  %v3364_v52 = vld [vmem:[%s7088_s5 + $0x50] sm:$0xff] }
 0x361   : > { %v3587_v45 = vmul.f32 %v3427_v46, %v6057_v51  ;;  %v3595_v29 = vmul.f32 %v3435_v20, %v6057_v51  ;;  %v3341_v40 = vmul.f32 0.01, %v3324_v0  ;;  %v3603_v16 = vmul.f32 %v3443_v12, %v6057_v51  ;;  %v3428_v54 = vld [vmem:[%s7088_s5 + $0x250] sm:$0xff] }
 0x362   : > { %v3690_v58 = vsel %vm404_vm2, %v3523_v39, 0.0  ;;  %v3674_v25 = vsel %vm404_vm2, %v3515_v37, 0.0  ;;  %v3802_v36 = vsel %vm404_vm2, %v3579_v9, 0.0  ;;  %v3706_v8 = vsel %vm404_vm2, %v3531_v10, 0.0  ;;  %v3450_v10 = vld [vmem:[%s7088_s5 + $0x300] sm:$0xff] }
 0x363   : > { %v3691_v41 = vadd.f32 %v3690_v58, %v3522_v19  ;;  %v3675_v43 = vadd.f32 %v3674_v25, %v3514_v63  ;;  %v3803_v31 = vadd.f32 %v3802_v36, %v3578_v44  ;;  %v3707_v34 = vadd.f32 %v3706_v8, %v3530_v26  ;;  %v3395_v19 = vld [vmem:[%s7088_s5 + $0x148] sm:$0xff]  ;;  %v3421_v63 = vld [vmem:[%s7088_s5 + $0x218] sm:$0xff]  ;;  %v3394_v36 = vld [vmem:[%s7088_s5 + $0x140] sm:$0xff] }
 0x364   : > { %v3818_v17 = vsel %vm404_vm2, %v3587_v45, 0.0  ;;  %v3834_v23 = vsel %vm404_vm2, %v3595_v29, 0.0  ;;  %v3539_v48 = vmul.f32 %v3379_v32, %v6057_v51  ;;  %v3340_v33 = vmul.f32 0.01, %v3322_v28 }
 0x365   : > { %3692 = vadd.xlane.f32.xlu0 %v3691_v41  ;;  %3676 = vadd.xlane.f32.xlu1 %v3675_v43  ;;  %v6124_v22 = vmax.f32 %v3324_v0, %v3341_v40  ;;  %v3819_v7 = vadd.f32 %v3818_v17, %v3586_v42  ;;  %v3835_v6 = vadd.f32 %v3834_v23, %v3594_v4  ;;  %v3850_v27 = vsel %vm404_vm2, %v3603_v16, 0.0  ;;  %v3459_v43 = vld [vmem:[%s7088_s5 + $0x348] sm:$0xff]  ;;  %v3429_v0 = vld [vmem:[%s7088_s5 + $0x258] sm:$0xff] }
 0x366   : > { %v3722_v59 = vsel %vm404_vm2, %v3539_v48, 0.0  ;;  %v3547_v53 = vmul.f32 %v3387_v49, %v6057_v51  ;;  %v3667_v30 = vmul.f32 %v3507_v18, %v6057_v51  ;;  %v3602_v60 = vmul.f32 %v3442_v15, %v6046_v2  ;;  %v3445_v40 = vld [vmem:[%s7088_s5 + $0x2d8] sm:$0xff]  ;;  %v3444_v48 = vld [vmem:[%s7088_s5 + $0x2d0] sm:$0xff]  ;;  %v3491_v15 = vld [vmem:[%s7088_s5 + $0x448] sm:$0xff] }
 0x367   : > { %v3538_v14 = vmul.f32 %v3378_v1, %v6046_v2  ;;  %v6144_v62 = vmax.f32 %v3322_v28, %v3340_v33  ;;  %v3611_v55 = vmul.f32 %v3451_v13, %v6057_v51  ;;  %v3525_v39 = vmul.f32 %v3365_v5, %v6124_v22  ;;  %v3483_v28 = vld [vmem:[%s7088_s5 + $0x408] sm:$0xff]  ;;  %v3389_v1 = vld [vmem:[%s7088_s5 + $0x118] sm:$0xff]  ;;  %v3482_v33 = vld [vmem:[%s7088_s5 + $0x400] sm:$0xff] }
 0x368   : > { %v3851_v38 = vadd.f32 %v3850_v27, %v3602_v60  ;;  %v3738_v3 = vsel %vm404_vm2, %v3547_v53, 0.0  ;;  %v3978_v24 = vsel %vm404_vm2, %v3667_v30, 0.0  ;;  %v3546_v37 = vmul.f32 %v3386_v11, %v6046_v2  ;;  %v3388_v60 = vld [vmem:[%s7088_s5 + $0x110] sm:$0xff]  ;;  %v3403_v5 = vld [vmem:[%s7088_s5 + $0x188] sm:$0xff]  ;;  %v3453_v11 = vld [vmem:[%s7088_s5 + $0x318] sm:$0xff] }
 0x369   : > { %3804 = vadd.xlane.f32.xlu0 %v3803_v31  ;;  %3708 = vadd.xlane.f32.xlu1 %v3707_v34  ;;  %v3723_v56 = vadd.f32 %v3722_v59, %v3538_v14  ;;  %v3666_v9 = vmul.f32 %v3506_v21, %v6046_v2  ;;  %v3524_v58 = vmul.f32 %v3364_v52, %v6144_v62  ;;  %v3866_v25 = vsel %vm404_vm2, %v3611_v55, 0.0  ;;  %v3458_v31 = vld [vmem:[%s7088_s5 + $0x340] sm:$0xff] }
 0x36a   : > { %v3739_v46 = vadd.f32 %v3738_v3, %v3546_v37  ;;  %v3694_v61 = vsel %vm404_vm2, %v3525_v39, 0.0  ;;  %v3555_v47 = vmul.f32 %v3395_v19, %v6057_v51  ;;  %v3581_v20 = vmul.f32 %v3421_v63, %v6124_v22  ;;  %v3490_v21 = vld [vmem:[%s7088_s5 + $0x440] sm:$0xff]  ;;  %v3452_v39 = vld [vmem:[%s7088_s5 + $0x310] sm:$0xff]  ;;  %v3467_v19 = vld [vmem:[%s7088_s5 + $0x388] sm:$0xff] }
 0x36b   : > { %v3979_v50 = vadd.f32 %v3978_v24, %v3666_v9  ;;  %v3610_v41 = vmul.f32 %v3450_v10, %v6046_v2  ;;  %v3695_v45 = vadd.f32 %v3694_v61, %v3524_v58  ;;  %v3580_v44 = vmul.f32 %v3420_v35, %v6144_v62  ;;  %v3397_v63 = vld [vmem:[%s7088_s5 + $0x158] sm:$0xff]  ;;  %v3402_v10 = vld [vmem:[%s7088_s5 + $0x180] sm:$0xff]  ;;  %v3396_v35 = vld [vmem:[%s7088_s5 + $0x150] sm:$0xff] }
 0x36c   : > { %v3754_v26 = vsel %vm404_vm2, %v3555_v47, 0.0  ;;  %v3806_v29 = vsel %vm404_vm2, %v3581_v20, 0.0  ;;  %v3619_v12 = vmul.f32 %v3459_v43, %v6057_v51  ;;  %v3589_v57 = vmul.f32 %v3429_v0, %v6124_v22  ;;  %v3499_v43 = vld [vmem:[%s7088_s5 + $0x488] sm:$0xff]  ;;  %v3461_v0 = vld [vmem:[%s7088_s5 + $0x358] sm:$0xff] }
 0x36d   : > { %3820 = vadd.xlane.f32.xlu0 %v3819_v7  ;;  %3836 = vadd.xlane.f32.xlu1 %v3835_v6  ;;  %v3867_v8 = vadd.f32 %v3866_v25, %v3610_v41  ;;  %v3554_v32 = vmul.f32 %v3394_v36, %v6046_v2  ;;  %v3807_v17 = vadd.f32 %v3806_v29, %v3580_v44  ;;  %v3466_v36 = vld [vmem:[%s7088_s5 + $0x380] sm:$0xff] }
 0x36e   : > { %v3588_v23 = vmul.f32 %v3428_v54, %v6144_v62  ;;  %v3882_v16 = vsel %vm404_vm2, %v3619_v12, 0.0  ;;  %v3822_v42 = vsel %vm404_vm2, %v3589_v57, 0.0  ;;  %v3643_v4 = vmul.f32 %v3483_v28, %v6057_v51  ;;  %v3460_v54 = vld [vmem:[%s7088_s5 + $0x350] sm:$0xff]  ;;  %v3411_v28 = vld [vmem:[%s7088_s5 + $0x1c8] sm:$0xff] }
 0x36f   : > { %v3755_v34 = vadd.f32 %v3754_v26, %v3554_v32  ;;  %v3605_v49 = vmul.f32 %v3445_v40, %v6124_v22  ;;  %v3618_v18 = vmul.f32 %v3458_v31, %v6046_v2  ;;  %v3604_v27 = vmul.f32 %v3444_v48, %v6144_v62  ;;  %v3485_v40 = vld [vmem:[%s7088_s5 + $0x418] sm:$0xff]  ;;  %v3498_v31 = vld [vmem:[%s7088_s5 + $0x480] sm:$0xff]  ;;  %v3484_v48 = vld [vmem:[%s7088_s5 + $0x410] sm:$0xff] }
 0x370   : > { %v3823_v6 = vadd.f32 %v3822_v42, %v3588_v23  ;;  %v3930_v59 = vsel %vm404_vm2, %v3643_v4, 0.0  ;;  %v3651_v30 = vmul.f32 %v3491_v15, %v6057_v51  ;;  %v3549_v14 = vmul.f32 %v3389_v1, %v6124_v22  ;;  %v3475_v15 = vld [vmem:[%s7088_s5 + $0x3c8] sm:$0xff]  ;;  %v3493_v1 = vld [vmem:[%s7088_s5 + $0x458] sm:$0xff] }
 0x371   : > { %3852 = vadd.xlane.f32.xlu0 %v3851_v38  ;;  %3724 = vadd.xlane.f32.xlu1 %v3723_v56  ;;  %v3883_v7 = vadd.f32 %v3882_v16, %v3618_v18  ;;  %v3854_v53 = vsel %vm404_vm2, %v3605_v49, 0.0  ;;  %v3642_v13 = vmul.f32 %v3482_v33, %v6046_v2  ;;  %v3548_v3 = vmul.f32 %v3388_v60, %v6144_v62  ;;  %v3410_v33 = vld [vmem:[%s7088_s5 + $0x1c0] sm:$0xff]  ;;  %v3492_v60 = vld [vmem:[%s7088_s5 + $0x450] sm:$0xff] }
 0x372   : > { %v3855_v56 = vadd.f32 %v3854_v53, %v3604_v27  ;;  %v3946_v24 = vsel %vm404_vm2, %v3651_v30, 0.0  ;;  %v3742_v55 = vsel %vm404_vm2, %v3549_v14, 0.0  ;;  %v3563_v52 = vmul.f32 %v3403_v5, %v6057_v51  ;;  %v3357_v5 = vld [vmem:[%s7088_s5 + $0x18] sm:$0xff] }
 0x373   : > { %v3931_v38 = vadd.f32 %v3930_v59, %v3642_v13  ;;  %v3613_v37 = vmul.f32 %v3453_v11, %v6124_v22  ;;  %v3650_v9 = vmul.f32 %v3490_v21, %v6046_v2  ;;  %v3612_v58 = vmul.f32 %v3452_v39, %v6144_v62  ;;  %v3405_v11 = vld [vmem:[%s7088_s5 + $0x198] sm:$0xff]  ;;  %v3404_v39 = vld [vmem:[%s7088_s5 + $0x190] sm:$0xff] }
 0x374   : > { %v3770_v25 = vsel %vm404_vm2, %v3563_v52, 0.0  ;;  %v3627_v47 = vmul.f32 %v3467_v19, %v6057_v51  ;;  %v3557_v20 = vmul.f32 %v3397_v63, %v6124_v22  ;;  %v3562_v41 = vmul.f32 %v3402_v10, %v6046_v2  ;;  %v3373_v63 = vld [vmem:[%s7088_s5 + $0x98] sm:$0xff] }
 0x375   : > { %3740 = vadd.xlane.f32.xlu0 %v3739_v46  ;;  %3980 = vadd.xlane.f32.xlu1 %v3979_v50  ;;  %v3947_v46 = vadd.f32 %v3946_v24, %v3650_v9  ;;  %v3743_v50 = vadd.f32 %v3742_v55, %v3548_v3  ;;  %v3870_v61 = vsel %vm404_vm2, %v3613_v37, 0.0  ;;  %v3556_v44 = vmul.f32 %v3396_v35, %v6144_v62  ;;  %v3356_v55 = vld [vmem:[%s7088_s5 + $0x10] sm:$0xff]  ;;  %v3327_v9 = vpop.f32.mrf.mxu1  ;;  %v3469_v10 = vld [vmem:[%s7088_s5 + $0x398] sm:$0xff] }
 0x376   : > { %v3898_v26 = vsel %vm404_vm2, %v3627_v47, 0.0  ;;  %v3758_v29 = vsel %vm404_vm2, %v3557_v20, 0.0  ;;  %v3659_v12 = vmul.f32 %v3499_v43, %v6057_v51  ;;  %v3621_v57 = vmul.f32 %v3461_v0, %v6124_v22 }
 0x377   : > { %v3626_v32 = vmul.f32 %v3466_v36, %v6046_v2  ;;  %v3620_v23 = vmul.f32 %v3460_v54, %v6144_v62  ;;  %v3571_v4 = vmul.f32 %v3411_v28, %v6057_v51  ;;  %v3645_v49 = vmul.f32 %v3485_v40, %v6124_v22  ;;  %v3329_v0 = vpop.f32.mrf.mxu1  ;;  %v3437_v36 = vld [vmem:[%s7088_s5 + $0x298] sm:$0xff]  ;;  %v3500_v40 = vld [vmem:[%s7088_s5 + $0x490] sm:$0xff] }
 0x378   : > { %v3962_v16 = vsel %vm404_vm2, %v3659_v12, 0.0  ;;  %v3886_v42 = vsel %vm404_vm2, %v3621_v57, 0.0  ;;  %v3658_v18 = vmul.f32 %v3498_v31, %v6046_v2  ;;  %v3644_v27 = vmul.f32 %v3484_v48, %v6144_v62 }
 0x379   : > { %3868 = vadd.xlane.f32.xlu0 %v3867_v8  ;;  %3696 = vadd.xlane.f32.xlu1 %v3695_v45  ;;  %v3771_v8 = vadd.f32 %v3770_v25, %v3562_v41  ;;  %v3871_v45 = vadd.f32 %v3870_v61, %v3612_v58  ;;  %v3786_v59 = vsel %vm404_vm2, %v3571_v4, 0.0  ;;  %v3934_v53 = vsel %vm404_vm2, %v3645_v49, 0.0  ;;  %v3468_v41 = vld [vmem:[%s7088_s5 + $0x390] sm:$0xff] }
 0x37a   : > { %v3635_v30 = vmul.f32 %v3475_v15, %v6057_v51  ;;  %v3653_v14 = vmul.f32 %v3493_v1, %v6124_v22  ;;  %v3570_v13 = vmul.f32 %v3410_v33, %v6046_v2  ;;  %v3474_v51 = vld [vmem:[%s7088_s5 + $0x3c0] sm:$0xff]  ;;  %v3517_v52 = vmul.f32 %v3357_v5, %v6124_v22  ;;  %v3380_v1 = vld [vmem:[%s7088_s5 + $0xd0] sm:$0xff] }
 0x37b   : > { %v3565_v37 = vmul.f32 %v3405_v11, %v6124_v22  ;;  %v3634_v19 = vmul.f32 %v3474_v51, %v6046_v2  ;;  %v3516_v25 = vmul.f32 %v3356_v55, %v6144_v62  ;;  %v3564_v61 = vmul.f32 %v3404_v39, %v6144_v62  ;;  %v3372_v2 = vld [vmem:[%s7088_s5 + $0x90] sm:$0xff]  ;;  %v3423_v55 = vld [vmem:[%s7088_s5 + $0x228] sm:$0xff] }
 0x37c   : > { %v3787_v21 = vadd.f32 %v3786_v59, %v3570_v13  ;;  %v3914_v3 = vsel %vm404_vm2, %v3635_v30, 0.0  ;;  %v3950_v24 = vsel %vm404_vm2, %v3653_v14, 0.0  ;;  %v3678_v47 = vsel %vm404_vm2, %v3517_v52, 0.0  ;;  %v3477_v59 = vld [vmem:[%s7088_s5 + $0x3d8] sm:$0xff] }
 0x37d   : > { %3756 = vadd.xlane.f32.xlu0 %v3755_v34  ;;  %3808 = vadd.xlane.f32.xlu1 %v3807_v17  ;;  %v3899_v34 = vadd.f32 %v3898_v26, %v3626_v32  ;;  %v3759_v17 = vadd.f32 %v3758_v29, %v3556_v44  ;;  %v3774_v35 = vsel %vm404_vm2, %v3565_v37, 0.0  ;;  %v3533_v20 = vmul.f32 %v3373_v63, %v6124_v22  ;;  %v3436_v32 = vld [vmem:[%s7088_s5 + $0x290] sm:$0xff] }
 0x37e   : > { %v3629_v43 = vmul.f32 %v3469_v10, %v6124_v22  ;;  %v3679_v44 = vadd.f32 %v3678_v47, %v3516_v25  ;;  %v3775_v26 = vadd.f32 %v3774_v35, %v3564_v61  ;;  %v3532_v29 = vmul.f32 %v3372_v2, %v6144_v62  ;;  %v3358_v10 = vld [vmem:[%s7088_s5 + $0x20] sm:$0xff]  ;;  %v3439_v25 = vld [vmem:[%s7088_s5 + $0x2a8] sm:$0xff] }
 0x37f   : > { %v3628_v12 = vmul.f32 %v3468_v41, %v6144_v62  ;;  %v3710_v54 = vsel %vm404_vm2, %v3533_v20, 0.0  ;;  %v3597_v28 = vmul.f32 %v3437_v36, %v6124_v22  ;;  %v3596_v48 = vmul.f32 %v3436_v32, %v6144_v62  ;;  %v3438_v36 = vld [vmem:[%s7088_s5 + $0x2a0] sm:$0xff] }
 0x380   : > { %v3902_v57 = vsel %vm404_vm2, %v3629_v43, 0.0  ;;  %v3660_v49 = vmul.f32 %v3500_v40, %v6144_v62  ;;  %v3540_v13 = vmul.f32 %v3380_v1, %v6144_v62  ;;  %v3366_v43 = vld [vmem:[%s7088_s5 + $0x60] sm:$0xff] }
 0x381   : > { %3884 = vadd.xlane.f32.xlu0 %v3883_v7  ;;  %3824 = vadd.xlane.f32.xlu1 %v3823_v6  ;;  %v3963_v7 = vadd.f32 %v3962_v16, %v3658_v18  ;;  %v3887_v6 = vadd.f32 %v3886_v42, %v3620_v23  ;;  %v3711_v42 = vadd.f32 %v3710_v54, %v3532_v29  ;;  %v3838_v18 = vsel %vm404_vm2, %v3597_v28, 0.0  ;;  %v3430_v28 = vld [vmem:[%s7088_s5 + $0x260] sm:$0xff] }
 0x382   : > { %v3903_v4 = vadd.f32 %v3902_v57, %v3628_v12 }
 0x385   : > { %3932 = vadd.xlane.f32.xlu0 %v3931_v38  ;;  %3856 = vadd.xlane.f32.xlu1 %v3855_v56  ;;  %v3935_v38 = vadd.f32 %v3934_v53, %v3644_v27  ;;  %v3652_v56 = vmul.f32 %v3492_v60, %v6144_v62  ;;  %v3509_v27 = vld [vmem:[%s7088_s5 + $0x4d8] sm:$0xff]  ;;  %v3839_v60 = vadd.f32 %v3838_v18, %v3596_v48 }
 0x387   : > { %v3951_v58 = vadd.f32 %v3950_v24, %v3652_v56  ;;  %v3476_v56 = vld [vmem:[%s7088_s5 + $0x3d0] sm:$0xff]  ;;  %v3359_v24 = vld [vmem:[%s7088_s5 + $0x28] sm:$0xff] }
 0x389   : > { %3948 = vadd.xlane.f32.xlu0 %v3947_v46  ;;  %3744 = vadd.xlane.f32.xlu1 %v3743_v50  ;;  %v3206_v46 = vpop.permute.xlu1 %3205  ;;  %v3915_v50 = vadd.f32 %v3914_v3, %v3634_v19  ;;  %v3637_v3 = vmul.f32 %v3477_v59, %v6124_v22  ;;  %v3636_v19 = vmul.f32 %v3476_v56, %v6144_v62  ;;  %v3333_v59 = vpop.f32.mrf.mxu1 }
 0x38a   : > { %v3328_v23 = vadd.f32 %v3327_v9, %v3206_v46 }
 0x38b   : > { %v3918_v63 = vsel %vm404_vm2, %v3637_v3, 0.0  ;;  %v3503_v3 = vld [vmem:[%s7088_s5 + $0x4a8] sm:$0xff] }
 0x38c   : > { %v3342_v53 = vmul.f32 0.01, %v3328_v23  ;;  %v3919_v47 = vadd.f32 %v3918_v63, %v3636_v19 }
 0x38d   : > { %3772 = vadd.xlane.f32.xlu0 %v3771_v8  ;;  %3872 = vadd.xlane.f32.xlu1 %v3871_v45  ;;  %v3501_v8 = vld [vmem:[%s7088_s5 + $0x498] sm:$0xff]  ;;  %v3330_v45 = vadd.f32 %v3329_v0, %v3206_v46 }
 0x38e   : > { %v3661_v31 = vmul.f32 %v3501_v8, %v6124_v22  ;;  %v6418_v52 = vmax.f32 %v3328_v23, %v3342_v53  ;;  %v3447_v23 = vld [vmem:[%s7088_s5 + $0x2e8] sm:$0xff] }
 0x38f   : > { %v3343_v16 = vmul.f32 0.01, %v3330_v45 }
 0x390   : > { %v3966_v15 = vsel %vm404_vm2, %v3661_v31, 0.0  ;;  %v3518_v35 = vmul.f32 %v3358_v10, %v6418_v52  ;;  %v3526_v12 = vmul.f32 %v3366_v43, %v6418_v52  ;;  %v3598_v54 = vmul.f32 %v3438_v36, %v6418_v52  ;;  %v3382_v31 = vld [vmem:[%s7088_s5 + $0xe0] sm:$0xff] }
 0x391   : > { %3900 = vadd.xlane.f32.xlu0 %v3899_v34  ;;  %3760 = vadd.xlane.f32.xlu1 %v3759_v17  ;;  %v3381_v34 = vld [vmem:[%s7088_s5 + $0xd8] sm:$0xff]  ;;  %v6398_v30 = vmax.f32 %v3330_v45, %v3343_v16  ;;  %v3967_v14 = vadd.f32 %v3966_v15, %v3660_v49  ;;  %v3431_v45 = vld [vmem:[%s7088_s5 + $0x268] sm:$0xff]  ;;  %v3542_v48 = vmul.f32 %v3382_v31, %v6418_v52  ;;  %v3374_v15 = vld [vmem:[%s7088_s5 + $0xa0] sm:$0xff] }
 0x392   : > { %v3413_v17 = vld [vmem:[%s7088_s5 + $0x1d8] sm:$0xff]  ;;  %v3541_v33 = vmul.f32 %v3381_v34, %v6124_v22  ;;  %v3502_v10 = vld [vmem:[%s7088_s5 + $0x4a0] sm:$0xff] }
 0x393   : > { %v3519_v46 = vmul.f32 %v3359_v24, %v6398_v30  ;;  %v3599_v8 = vmul.f32 %v3439_v25, %v6398_v30  ;;  %v3591_v40 = vmul.f32 %v3431_v45, %v6398_v30  ;;  %v3455_v24 = vld [vmem:[%s7088_s5 + $0x328] sm:$0xff]  ;;  %v3414_v36 = vld [vmem:[%s7088_s5 + $0x1e0] sm:$0xff] }
 0x394   : > { %v3726_v11 = vsel %vm404_vm2, %v3541_v33, 0.0  ;;  %v3446_v33 = vld [vmem:[%s7088_s5 + $0x2e0] sm:$0xff]  ;;  %v3415_v25 = vld [vmem:[%s7088_s5 + $0x1e8] sm:$0xff] }
 0x395   : > { %3964 = vadd.xlane.f32.xlu0 %v3963_v7  ;;  %3888 = vadd.xlane.f32.xlu1 %v3887_v6  ;;  %v3412_v7 = vld [vmem:[%s7088_s5 + $0x1d0] sm:$0xff]  ;;  %v3573_v6 = vmul.f32 %v3413_v17, %v6124_v22  ;;  %v3727_v39 = vadd.f32 %v3726_v11, %v3540_v13  ;;  %v3682_v20 = vsel %vm404_vm2, %v3519_v46, 0.0  ;;  %v3842_v32 = vsel %vm404_vm2, %v3599_v8, 0.0  ;;  %v3375_v17 = vld [vmem:[%s7088_s5 + $0xa8] sm:$0xff]  ;;  %v3398_v45 = vld [vmem:[%s7088_s5 + $0x160] sm:$0xff] }
 0x396   : > { %v3572_v5 = vmul.f32 %v3412_v7, %v6144_v62  ;;  %v3826_v49 = vsel %vm404_vm2, %v3591_v40, 0.0  ;;  %v3535_v1 = vmul.f32 %v3375_v17, %v6398_v30  ;;  %v3607_v7 = vmul.f32 %v3447_v23, %v6398_v30  ;;  %v3462_v23 = vld [vmem:[%s7088_s5 + $0x360] sm:$0xff] }
 0x397   : > { %v3790_v51 = vsel %vm404_vm2, %v3573_v6, 0.0  ;;  %v3487_v6 = vld [vmem:[%s7088_s5 + $0x428] sm:$0xff]  ;;  %v3606_v13 = vmul.f32 %v3446_v33, %v6418_v52  ;;  %v3663_v46 = vmul.f32 %v3503_v3, %v6398_v30  ;;  %v3575_v8 = vmul.f32 %v3415_v25, %v6398_v30  ;;  %v3470_v25 = vld [vmem:[%s7088_s5 + $0x3a0] sm:$0xff] }
 0x398   : > { %v3791_v37 = vadd.f32 %v3790_v51, %v3572_v5  ;;  %v3714_v5 = vsel %vm404_vm2, %v3535_v1, 0.0  ;;  %v3858_v11 = vsel %vm404_vm2, %v3607_v7, 0.0  ;;  %v3486_v51 = vld [vmem:[%s7088_s5 + $0x420] sm:$0xff]  ;;  %v3622_v33 = vmul.f32 %v3462_v23, %v6418_v52  ;;  %v3449_v23 = vld [vmem:[%s7088_s5 + $0x2f8] sm:$0xff] }
 0x399   : > { %3788 = vadd.xlane.f32.xlu0 %v3787_v21  ;;  %3936 = vadd.xlane.f32.xlu1 %v3935_v38  ;;  %v3508_v21 = vld [vmem:[%s7088_s5 + $0x4d0] sm:$0xff]  ;;  %v3669_v38 = vmul.f32 %v3509_v27, %v6124_v22  ;;  %v3391_v27 = vld [vmem:[%s7088_s5 + $0x128] sm:$0xff]  ;;  %v3970_v43 = vsel %vm404_vm2, %v3663_v46, 0.0  ;;  %v3794_v40 = vsel %vm404_vm2, %v3575_v8, 0.0 }
 0x39a   : > { %v3668_v9 = vmul.f32 %v3508_v21, %v6144_v62  ;;  %v3367_v62 = vld [vmem:[%s7088_s5 + $0x68] sm:$0xff]  ;;  %v3647_v21 = vmul.f32 %v3487_v6, %v6398_v30  ;;  %v3551_v56 = vmul.f32 %v3391_v27, %v6398_v30  ;;  %v3510_v27 = vld [vmem:[%s7088_s5 + $0x4e0] sm:$0xff] }
 0x39b   : > { %v3982_v22 = vsel %vm404_vm2, %v3669_v38, 0.0  ;;  %v3527_v0 = vmul.f32 %v3367_v62, %v6398_v30  ;;  %v3390_v38 = vld [vmem:[%s7088_s5 + $0x120] sm:$0xff]  ;;  %v3211_v62 = vpop.permute.xlu0 %3210 }
 0x39c   : > { %v3983_v61 = vadd.f32 %v3982_v22, %v3668_v9  ;;  %v3646_v9 = vmul.f32 %v3486_v51, %v6418_v52  ;;  %v3550_v19 = vmul.f32 %v3390_v38, %v6418_v52  ;;  %v3938_v22 = vsel %vm404_vm2, %v3647_v21, 0.0 }
 0x39d   : > { %3916 = vadd.xlane.f32.xlu0 %v3915_v50  ;;  %3952 = vadd.xlane.f32.xlu1 %v3951_v58  ;;  %v3422_v50 = vld [vmem:[%s7088_s5 + $0x220] sm:$0xff]  ;;  %v3583_v58 = vmul.f32 %v3423_v55, %v6398_v30  ;;  %v3698_v57 = vsel %vm404_vm2, %v3527_v0, 0.0  ;;  %v3335_v55 = vpop.f32.mrf.mxu1  ;;  %v3746_v63 = vsel %vm404_vm2, %v3551_v56, 0.0  ;;  %v3670_v21 = vmul.f32 %v3510_v27, %v6418_v52 }
 0x39e   : > { %v3582_v2 = vmul.f32 %v3422_v50, %v6418_v52  ;;  %v3699_v16 = vadd.f32 %v3698_v57, %v3526_v12  ;;  %v3454_v50 = vld [vmem:[%s7088_s5 + $0x320] sm:$0xff] }
 0x39f   : > { %v3810_v41 = vsel %vm404_vm2, %v3583_v58, 0.0  ;;  %v3615_v58 = vmul.f32 %v3455_v24, %v6398_v30 }
 0x3a0   : > { %v3811_v29 = vadd.f32 %v3810_v41, %v3582_v2  ;;  %v3747_v2 = vadd.f32 %v3746_v63, %v3550_v19  ;;  %v3614_v41 = vmul.f32 %v3454_v50, %v6418_v52  ;;  %v3471_v19 = vld [vmem:[%s7088_s5 + $0x3a8] sm:$0xff] }
 0x3a1   : > { %3680 = vadd.xlane.f32.xlu0 %v3679_v44  ;;  %3776 = vadd.xlane.f32.xlu1 %v3775_v26  ;;  %v3383_v44 = vld [vmem:[%s7088_s5 + $0xe8] sm:$0xff]  ;;  %v3683_v26 = vadd.f32 %v3682_v20, %v3518_v35  ;;  %v3939_v35 = vadd.f32 %v3938_v22, %v3646_v9  ;;  %v3662_v20 = vmul.f32 %v3502_v10, %v6418_v52  ;;  %v3874_v0 = vsel %vm404_vm2, %v3615_v58, 0.0  ;;  %v3377_v9 = vld [vmem:[%s7088_s5 + $0xb8] sm:$0xff]  ;;  %v3432_v22 = vld [vmem:[%s7088_s5 + $0x270] sm:$0xff] }
 0x3a2   : > { %v3543_v34 = vmul.f32 %v3383_v44, %v6398_v30  ;;  %v3875_v57 = vadd.f32 %v3874_v0, %v3614_v41 }
 0x3a4   : > { %v3730_v18 = vsel %vm404_vm2, %v3543_v34, 0.0  ;;  %v3478_v34 = vld [vmem:[%s7088_s5 + $0x3e0] sm:$0xff] }
 0x3a5   : > { %3712 = vadd.xlane.f32.xlu0 %v3711_v42  ;;  %3904 = vadd.xlane.f32.xlu1 %v3903_v4  ;;  %v3843_v42 = vadd.f32 %v3842_v32, %v3598_v54  ;;  %v3590_v4 = vmul.f32 %v3430_v28, %v6418_v52  ;;  %v3971_v54 = vadd.f32 %v3970_v43, %v3662_v20  ;;  %v3376_v20 = vld [vmem:[%s7088_s5 + $0xb0] sm:$0xff] }
 0x3a6   : > { %v3574_v32 = vmul.f32 %v3414_v36, %v6418_v52  ;;  %v3558_v28 = vmul.f32 %v3398_v45, %v6418_v52  ;;  %v3638_v1 = vmul.f32 %v3478_v34, %v6418_v52 }
 0x3a7   : > { %v3827_v53 = vadd.f32 %v3826_v49, %v3590_v4  ;;  %v3511_v4 = vld [vmem:[%s7088_s5 + $0x4e8] sm:$0xff] }
 0x3a9   : > { %3840 = vadd.xlane.f32.xlu0 %v3839_v60  ;;  %3968 = vadd.xlane.f32.xlu1 %v3967_v14  ;;  %v3731_v60 = vadd.f32 %v3730_v18, %v3542_v48  ;;  %v3534_v14 = vmul.f32 %v3374_v15, %v6418_v52  ;;  %v3495_v48 = vld [vmem:[%s7088_s5 + $0x468] sm:$0xff]  ;;  %v3795_v18 = vadd.f32 %v3794_v40, %v3574_v32 }
 0x3ad   : > { %3728 = vadd.xlane.f32.xlu0 %v3727_v39  ;;  %3792 = vadd.xlane.f32.xlu1 %v3791_v37  ;;  %v3715_v39 = vadd.f32 %v3714_v5, %v3534_v14  ;;  %v3859_v37 = vadd.f32 %v3858_v11, %v3606_v13  ;;  %v3433_v13 = vld [vmem:[%s7088_s5 + $0x278] sm:$0xff]  ;;  %v3407_v5 = vld [vmem:[%s7088_s5 + $0x1a8] sm:$0xff] }
 0x3b1   : > { %3984 = vadd.xlane.f32.xlu0 %v3983_v61  ;;  %3920 = vadd.xlane.f32.xlu1 %v3919_v47  ;;  %v3399_v61 = vld [vmem:[%s7088_s5 + $0x168] sm:$0xff]  ;;  %v3336_v47 = vadd.f32 %v3335_v55, %v3211_v62  ;;  %v3406_v55 = vld [vmem:[%s7088_s5 + $0x1a0] sm:$0xff] }
 0x3b2   : > { %v3559_v44 = vmul.f32 %v3399_v61, %v6398_v30  ;;  %v3566_v46 = vmul.f32 %v3406_v55, %v6418_v52  ;;  %v3631_v61 = vmul.f32 %v3471_v19, %v6398_v30  ;;  %v3409_v55 = vld [vmem:[%s7088_s5 + $0x1b8] sm:$0xff] }
 0x3b3   : > { %v3345_v12 = vmul.f32 0.01, %v3336_v47 }
 0x3b4   : > { %v3762_v31 = vsel %vm404_vm2, %v3559_v44, 0.0  ;;  %v3906_v36 = vsel %vm404_vm2, %v3631_v61, 0.0  ;;  %v3473_v61 = vld [vmem:[%s7088_s5 + $0x3b8] sm:$0xff] }
 0x3b5   : > { %3684 = vadd.xlane.f32.xlu0 %v3683_v26  ;;  %3812 = vadd.xlane.f32.xlu1 %v3811_v29  ;;  %v3479_v26 = vld [vmem:[%s7088_s5 + $0x3e8] sm:$0xff]  ;;  %v6564_v49 = vmax.f32 %v3336_v47, %v3345_v12  ;;  %v3763_v15 = vadd.f32 %v3762_v31, %v3558_v28  ;;  %v3360_v12 = vld [vmem:[%s7088_s5 + $0x30] sm:$0xff] }
 0x3b6   : > { %v3463_v29 = vld [vmem:[%s7088_s5 + $0x368] sm:$0xff]  ;;  %v3639_v17 = vmul.f32 %v3479_v26, %v6398_v30  ;;  %v3385_v26 = vld [vmem:[%s7088_s5 + $0xf8] sm:$0xff] }
 0x3b7   : > { %v3593_v24 = vmul.f32 %v3433_v13, %v6564_v49  ;;  %v3545_v40 = vmul.f32 %v3385_v26, %v6564_v49 }
 0x3b8   : > { %v3922_v7 = vsel %vm404_vm2, %v3639_v17, 0.0 }
 0x3b9   : > { %3700 = vadd.xlane.f32.xlu0 %v3699_v16  ;;  %3844 = vadd.xlane.f32.xlu1 %v3843_v42  ;;  %v3623_v16 = vmul.f32 %v3463_v29, %v6398_v30  ;;  %v3334_v42 = vadd.f32 %v3333_v59, %v3211_v62  ;;  %v3671_v59 = vmul.f32 %v3511_v4, %v6398_v30  ;;  %v3830_v50 = vsel %vm404_vm2, %v3593_v24, 0.0  ;;  %v3440_v29 = vld [vmem:[%s7088_s5 + $0x2b0] sm:$0xff]  ;;  %v3457_v24 = vld [vmem:[%s7088_s5 + $0x338] sm:$0xff] }
 0x3ba   : > { %v3923_v11 = vadd.f32 %v3922_v7, %v3638_v1  ;;  %v3537_v62 = vmul.f32 %v3377_v9, %v6564_v49  ;;  %v3368_v4 = vld [vmem:[%s7088_s5 + $0x70] sm:$0xff] }
 0x3bb   : > { %v3890_v6 = vsel %vm404_vm2, %v3623_v16, 0.0  ;;  %v3344_v14 = vmul.f32 0.01, %v3334_v42  ;;  %v3986_v56 = vsel %vm404_vm2, %v3671_v59, 0.0  ;;  %v3425_v16 = vld [vmem:[%s7088_s5 + $0x238] sm:$0xff]  ;;  %v3496_v9 = vld [vmem:[%s7088_s5 + $0x470] sm:$0xff] }
 0x3bc   : > { %v3891_v51 = vadd.f32 %v3890_v6, %v3622_v33  ;;  %v3987_v63 = vadd.f32 %v3986_v56, %v3670_v21  ;;  %v3718_v0 = vsel %vm404_vm2, %v3537_v62, 0.0  ;;  %v3609_v33 = vmul.f32 %v3449_v23, %v6564_v49  ;;  %v3393_v59 = vld [vmem:[%s7088_s5 + $0x138] sm:$0xff] }
 0x3bd   : > { %3828 = vadd.xlane.f32.xlu0 %v3827_v53  ;;  %3732 = vadd.xlane.f32.xlu1 %v3731_v60  ;;  %v3494_v53 = vld [vmem:[%s7088_s5 + $0x460] sm:$0xff]  ;;  %v3655_v60 = vmul.f32 %v3495_v48, %v6398_v30  ;;  %v3585_v7 = vmul.f32 %v3425_v16, %v6564_v49  ;;  %v3553_v21 = vmul.f32 %v3393_v59, %v6564_v49  ;;  %v3489_v23 = vld [vmem:[%s7088_s5 + $0x438] sm:$0xff]  ;;  %v4074_v59 = vlaneseq }
 0x3be   : > { %v3654_v38 = vmul.f32 %v3494_v53, %v6418_v52  ;;  %v3497_v53 = vld [vmem:[%s7088_s5 + $0x478] sm:$0xff] }
 0x3bf   : > { %v3954_v3 = vsel %vm404_vm2, %v3655_v60, 0.0  ;;  %v3448_v60 = vld [vmem:[%s7088_s5 + $0x2f0] sm:$0xff]  ;;  %v3417_v16 = vld [vmem:[%s7088_s5 + $0x1f8] sm:$0xff] }
 0x3c0   : > { %v3955_v10 = vadd.f32 %v3954_v3, %v3654_v38  ;;  %v3657_v38 = vmul.f32 %v3497_v53, %v6564_v49 }
 0x3c1   : > { %3716 = vadd.xlane.f32.xlu0 %v3715_v39  ;;  %3860 = vadd.xlane.f32.xlu1 %v3859_v37  ;;  %v3567_v39 = vmul.f32 %v3407_v5, %v6398_v30  ;;  %v6593_v37 = vmax.f32 %v3334_v42, %v3344_v14  ;;  %v3630_v30 = vmul.f32 %v3470_v25, %v6418_v52  ;;  %v3369_v52 = vld [vmem:[%s7088_s5 + $0x78] sm:$0xff]  ;;  %v3384_v42 = vld [vmem:[%s7088_s5 + $0xf0] sm:$0xff] }
 0x3c2   : > { %v3529_v31 = vmul.f32 %v3369_v52, %v6564_v49  ;;  %v3424_v14 = vld [vmem:[%s7088_s5 + $0x230] sm:$0xff]  ;;  %v3401_v25 = vld [vmem:[%s7088_s5 + $0x178] sm:$0xff] }
 0x3c3   : > { %v3778_v58 = vsel %vm404_vm2, %v3567_v39, 0.0  ;;  %v3592_v47 = vmul.f32 %v3432_v22, %v6593_v37  ;;  %v3536_v44 = vmul.f32 %v3376_v20, %v6593_v37  ;;  %v3600_v34 = vmul.f32 %v3440_v29, %v6593_v37  ;;  %v3392_v39 = vld [vmem:[%s7088_s5 + $0x130] sm:$0xff] }
 0x3c4   : > { %v3779_v43 = vadd.f32 %v3778_v58, %v3566_v46  ;;  %v3520_v17 = vmul.f32 %v3360_v12, %v6593_v37  ;;  %v3702_v1 = vsel %vm404_vm2, %v3529_v31, 0.0  ;;  %v3544_v6 = vmul.f32 %v3384_v42, %v6593_v37  ;;  %v3400_v29 = vld [vmem:[%s7088_s5 + $0x170] sm:$0xff] }
 0x3c5   : > { %3940 = vadd.xlane.f32.xlu0 %v3939_v35  ;;  %3748 = vadd.xlane.f32.xlu1 %v3747_v2  ;;  %v3441_v35 = vld [vmem:[%s7088_s5 + $0x2b8] sm:$0xff]  ;;  %v3831_v41 = vadd.f32 %v3830_v50, %v3592_v47  ;;  %v3528_v27 = vmul.f32 %v3368_v4, %v6593_v37  ;;  %v3608_v56 = vmul.f32 %v3448_v60, %v6593_v37  ;;  %v3456_v47 = vld [vmem:[%s7088_s5 + $0x330] sm:$0xff] }
 0x3c6   : > { %v3361_v2 = vld [vmem:[%s7088_s5 + $0x38] sm:$0xff]  ;;  %v3601_v8 = vmul.f32 %v3441_v35, %v6564_v49  ;;  %v3584_v3 = vmul.f32 %v3424_v14, %v6593_v37  ;;  %v3617_v46 = vmul.f32 %v3457_v24, %v6564_v49  ;;  %v3569_v50 = vmul.f32 %v3409_v55, %v6564_v49  ;;  %v3408_v35 = vld [vmem:[%s7088_s5 + $0x1b0] sm:$0xff] }
 0x3c7   : > { %v3521_v45 = vmul.f32 %v3361_v2, %v6564_v49  ;;  %v3703_v5 = vadd.f32 %v3702_v1, %v3528_v27  ;;  %v3552_v58 = vmul.f32 %v3392_v39, %v6593_v37  ;;  %v3656_v62 = vmul.f32 %v3496_v9, %v6593_v37  ;;  %v3472_v12 = vld [vmem:[%s7088_s5 + $0x3b0] sm:$0xff]  ;;  %v3481_v14 = vld [vmem:[%s7088_s5 + $0x3f8] sm:$0xff] }
 0x3c8   : > { %v3846_v32 = vsel %vm404_vm2, %v3601_v8, 0.0  ;;  %v3568_v8 = vmul.f32 %v3408_v35, %v6593_v37  ;;  %v3577_v27 = vmul.f32 %v3417_v16, %v6564_v49  ;;  %v3641_v55 = vmul.f32 %v3481_v14, %v6564_v49 }
 0x3c9   : > { %3972 = vadd.xlane.f32.xlu0 %v3971_v54  ;;  %3876 = vadd.xlane.f32.xlu1 %v3875_v57  ;;  %v3719_v54 = vadd.f32 %v3718_v0, %v3536_v44  ;;  %v3907_v57 = vadd.f32 %v3906_v36, %v3630_v30  ;;  %v3686_v28 = vsel %vm404_vm2, %v3521_v45, 0.0  ;;  %v3847_v48 = vadd.f32 %v3846_v32, %v3600_v34  ;;  %v3465_v45 = vld [vmem:[%s7088_s5 + $0x378] sm:$0xff] }
 0x3ca   : > { %v3561_v30 = vmul.f32 %v3401_v25, %v6564_v49  ;;  %v3633_v0 = vmul.f32 %v3473_v61, %v6564_v49  ;;  %v3616_v36 = vmul.f32 %v3456_v47, %v6593_v37  ;;  %v3505_v44 = vld [vmem:[%s7088_s5 + $0x4b8] sm:$0xff]  ;;  %v3560_v34 = vmul.f32 %v3400_v29, %v6593_v37 }
 0x3cb   : > { %v3665_v31 = vmul.f32 %v3505_v44, %v6564_v49  ;;  %v3798_v24 = vsel %vm404_vm2, %v3577_v27, 0.0  ;;  %v6780_v9 = vand.u32 127, %v4074_v59  ;;  %v3926_v61 = vsel %vm404_vm2, %v3641_v55, 0.0 }
 0x3cc   : > { %v3766_v32 = vsel %vm404_vm2, %v3561_v30, 0.0 }
 0x3cd   : > { %3796 = vadd.xlane.f32.xlu0 %v3795_v18  ;;  %3764 = vadd.xlane.f32.xlu1 %v3763_v15  ;;  %v3687_v18 = vadd.f32 %v3686_v28, %v3520_v17  ;;  %v3734_v15 = vsel %vm404_vm2, %v3545_v40, 0.0  ;;  %v3910_v28 = vsel %vm404_vm2, %v3633_v0, 0.0  ;;  %v3625_v40 = vmul.f32 %v3465_v45, %v6564_v49 }
 0x3ce   : > { %v3735_v13 = vadd.f32 %v3734_v15, %v3544_v6  ;;  %v3632_v17 = vmul.f32 %v3472_v12, %v6593_v37  ;;  %v3767_v15 = vadd.f32 %v3766_v32, %v3560_v34  ;;  %v3649_v6 = vmul.f32 %v3489_v23, %v6564_v49 }
 0x3cf   : > { %v4080_v25 = vadd.s32 4294967288, %v6780_v9 }
 0x3d0   : > { %v3911_v1 = vadd.f32 %v3910_v28, %v3632_v17 }
 0x3d1   : > { %3924 = vadd.xlane.f32.xlu0 %v3923_v11  ;;  %3892 = vadd.xlane.f32.xlu1 %v3891_v51  ;;  %v3862_v11 = vsel %vm404_vm2, %v3609_v33, 0.0  ;;  %v3814_v51 = vsel %vm404_vm2, %v3585_v7, 0.0  ;;  %v3894_v33 = vsel %vm404_vm2, %v3625_v40, 0.0  ;;  %v3974_v7 = vsel %vm404_vm2, %v3665_v31, 0.0 }
 0x3d2   : > { %v3863_v19 = vadd.f32 %v3862_v11, %v3608_v56  ;;  %v3815_v22 = vadd.f32 %v3814_v51, %v3584_v3  ;;  %v3488_v51 = vld [vmem:[%s7088_s5 + $0x430] sm:$0xff]  ;;  %v3942_v3 = vsel %vm404_vm2, %v3649_v6, 0.0 }
 0x3d5   : > { %3988 = vadd.xlane.f32.xlu0 %v3987_v63  ;;  %3956 = vadd.xlane.f32.xlu1 %v3955_v10  ;;  %v3750_v63 = vsel %vm404_vm2, %v3553_v21, 0.0  ;;  %v3958_v10 = vsel %vm404_vm2, %v3657_v38, 0.0  ;;  %v3416_v21 = vld [vmem:[%s7088_s5 + $0x1f0] sm:$0xff] }
 0x3d6   : > { %v3751_v2 = vadd.f32 %v3750_v63, %v3552_v58  ;;  %v3959_v20 = vadd.f32 %v3958_v10, %v3656_v62 }
 0x3d9   : > { %3832 = vadd.xlane.f32.xlu0 %v3831_v41  ;;  %3780 = vadd.xlane.f32.xlu1 %v3779_v43  ;;  %v3878_v41 = vsel %vm404_vm2, %v3617_v46, 0.0  ;;  %v3782_v43 = vsel %vm404_vm2, %v3569_v50, 0.0  ;;  %v3480_v46 = vld [vmem:[%s7088_s5 + $0x3f0] sm:$0xff] }
 0x3da   : > { %v3512_v50 = vld [vmem:[%s7088_s5 + $0x4f0] sm:$0xff]  ;;  %v3640_v35 = vmul.f32 %v3480_v46, %v6593_v37 }
 0x3dc   : > { %v3927_v30 = vadd.f32 %v3926_v61, %v3640_v35 }
 0x3dd   : > { %3720 = vadd.xlane.f32.xlu0 %v3719_v54  ;;  %3908 = vadd.xlane.f32.xlu1 %v3907_v57  ;;  %v3879_v54 = vadd.f32 %v3878_v41, %v3616_v36  ;;  %v3783_v57 = vadd.f32 %v3782_v43, %v3568_v8 }
 0x3e1   : > { %3848 = vadd.xlane.f32.xlu0 %v3847_v48  ;;  %3688 = vadd.xlane.f32.xlu1 %v3687_v18  ;;  %v3464_v48 = vld [vmem:[%s7088_s5 + $0x370] sm:$0xff] }
 0x3e2   : > { %v3504_v18 = vld [vmem:[%s7088_s5 + $0x4b0] sm:$0xff]  ;;  %v3624_v53 = vmul.f32 %v3464_v48, %v6593_v37 }
 0x3e3   : > { %v3664_v60 = vmul.f32 %v3504_v18, %v6593_v37 }
 0x3e4   : > { %v3895_v38 = vadd.f32 %v3894_v33, %v3624_v53 }
 0x3e5   : > { %3736 = vadd.xlane.f32.xlu0 %v3735_v13  ;;  %3704 = vadd.xlane.f32.xlu1 %v3703_v5  ;;  %v3513_v13 = vld [vmem:[%s7088_s5 + $0x4f8] sm:$0xff]  ;;  %v3975_v56 = vadd.f32 %v3974_v7, %v3664_v60 }
 0x3e6   : > { %v3673_v39 = vmul.f32 %v3513_v13, %v6564_v49  ;;  %v6792_v49 = vshrl.u32 %v4074_v59, 7 }
 0x3e8   : > { %v3990_v47 = vsel %vm404_vm2, %v3673_v39, 0.0  ;;  %v6803_v43 = vsub.s32 %v6780_v9, %v6792_v49  ;;  %v6806_v36 = vsub.s32 %v4080_v25, %v6792_v49 }
 0x3e9   : > { %3864 = vadd.xlane.f32.xlu0 %v3863_v19  ;;  %3816 = vadd.xlane.f32.xlu1 %v3815_v22  ;;  %v3648_v19 = vmul.f32 %v3488_v51, %v6593_v37  ;;  %v3576_v22 = vmul.f32 %v3416_v21, %v6593_v37 }
 0x3eb   : > { %v3943_v58 = vadd.f32 %v3942_v3, %v3648_v19  ;;  %v3799_v62 = vadd.f32 %v3798_v24, %v3576_v22 }
 0x3ed   : > { %3752 = vadd.xlane.f32.xlu0 %v3751_v2  ;;  %3960 = vadd.xlane.f32.xlu1 %v3959_v20  ;;  %v3672_v2 = vmul.f32 %v3512_v50, %v6593_v37 }
 0x3ee   : > { %v6724_v26 = vpop.xlane.xlu0 %3692  ;;  %v6726_v52 = vpop.xlane.xlu1 %3676 }
 0x3ef   : > { %v3991_v0 = vadd.f32 %v3990_v47, %v3672_v2  ;;  %v4104_v37 = vrot.slane %v6724_v26, %v6803_v43 }
 0x3f1   : > { %3880 = vadd.xlane.f32.xlu0 %v3879_v54  ;;  %3784 = vadd.xlane.f32.xlu1 %v3783_v57 }
 0x3f2   : > { %v6746_v42 = vpop.xlane.xlu0 %3804  ;;  %v6748_v4 = vpop.xlane.xlu1 %3708 }
 0x3f3   : > { %v4237_v57 = vrot.slane %v6746_v42, %v6803_v43 }
 0x3f5   : > { %3768 = vadd.xlane.f32.xlu0 %v3767_v15  ;;  %3912 = vadd.xlane.f32.xlu1 %v3911_v1 }
 0x3f6   : > { %v3821_v5 = vpop.xlane.xlu0 %3820  ;;  %v6768_v11 = vpop.xlane.xlu1 %3836 }
 0x3f7   : > { %v4256_v34 = vrot.slane %v3821_v5, %v6803_v43 }
 0x3f9   : > { %3896 = vadd.xlane.f32.xlu0 %v3895_v38  ;;  %3976 = vadd.xlane.f32.xlu1 %v3975_v56 }
 0x3fa   : > { %v3853_v63 = vpop.xlane.xlu0 %3852  ;;  %v6784_v10 = vpop.xlane.xlu1 %3724 }
 0x3fb   : > { %v4294_v48 = vrot.slane %v3853_v63, %v6803_v43 }
 0x3fd   : > { %3944 = vadd.xlane.f32.xlu0 %v3943_v58  ;;  %3800 = vadd.xlane.f32.xlu1 %v3799_v62 }
 0x3fe   : > { %v3741_v20 = vpop.xlane.xlu0 %3740  ;;  %v6799_v41 = vpop.xlane.xlu1 %3980 }
 0x3ff   : > { %v4161_v33 = vrot.slane %v3741_v20, %v6803_v43  ;;  %v4079_v20 = vrot.slane %v6726_v52, %v6803_v43 }
 0x401   : > { %3928 = vadd.xlane.f32.xlu0 %v3927_v30  ;;  %3992 = vadd.xlane.f32.xlu1 %v3991_v0 }
 0x402   : > { %v3869_v8 = vpop.xlane.xlu0 %3868  ;;  %v3697_v45 = vpop.xlane.xlu1 %3696 }
 0x403   : > { %v4108_v44 = vrot.slane %v3697_v45, %v6806_v36  ;;  %v4313_v53 = vrot.slane %v3869_v8, %v6803_v43 }
 0x405   : > { %v6812_v29 = vsel %vm4085_vm3, %v4108_v44, %v4104_v37 }
 0x406   : > { %v3757_v12 = vpop.xlane.xlu0 %3756  ;;  %v3809_v54 = vpop.xlane.xlu1 %3808 }
 0x407   : > { %v4241_v32 = vrot.slane %v3809_v54, %v6806_v36  ;;  %v4180_v51 = vrot.slane %v3757_v12, %v6803_v43  ;;  %v4123_v54 = vrot.slane %v6748_v4, %v6803_v43 }
 0x409   : > { %v6818_v28 = vsel %vm4085_vm3, %v4241_v32, %v4237_v57 }
 0x40a   : > { %v3885_v40 = vpop.xlane.xlu0 %3884  ;;  %v3825_v31 = vpop.xlane.xlu1 %3824 }
 0x40b   : > { %v4260_v26 = vrot.slane %v3825_v31, %v6806_v36  ;;  %v4332_v24 = vrot.slane %v3885_v40, %v6803_v43 }
 0x40d   : > { %v6823_v17 = vsel %vm4085_vm3, %v4260_v26, %v4256_v34 }
 0x40e   : > { %v3933_v23 = vpop.xlane.xlu0 %3932  ;;  %v3857_v16 = vpop.xlane.xlu1 %3856 }
 0x40f   : > { %v4298_v42 = vrot.slane %v3857_v16, %v6806_v36  ;;  %v4389_v63 = vrot.slane %v3933_v23, %v6803_v43  ;;  %v4275_v23 = vrot.slane %v6768_v11, %v6803_v43 }
 0x411   : > { %v6828_v18 = vsel %vm4085_vm3, %v4298_v42, %v4294_v48 }
 0x412   : > { %v3949_v15 = vpop.xlane.xlu0 %3948  ;;  %v3745_v1 = vpop.xlane.xlu1 %3744 }
 0x413   : > { %v4165_v7 = vrot.slane %v3745_v1, %v6806_v36  ;;  %v4408_v25 = vrot.slane %v3949_v15, %v6803_v43 }
 0x415   : > { %v6833_v6 = vsel %vm4085_vm3, %v4165_v7, %v4161_v33  ;;  %v4087_v7 = vadd.s32 4294967280, %v6780_v9 }
 0x416   : > { %v3773_v27 = vpop.xlane.xlu0 %3772  ;;  %v3873_v59 = vpop.xlane.xlu1 %3872 }
 0x417   : > { %v4317_v60 = vrot.slane %v3873_v59, %v6806_v36  ;;  %v4199_v30 = vrot.slane %v3773_v27, %v6803_v43  ;;  %v4142_v27 = vrot.slane %v6784_v10, %v6803_v43 }
 0x419   : > { %v6838_v14 = vsel %vm4085_vm3, %v4317_v60, %v4313_v53 }
 0x41a   : > { %v3901_v13 = vpop.xlane.xlu0 %3900  ;;  %v3761_v5 = vpop.xlane.xlu1 %3760 }
 0x41b   : > { %v4184_v21 = vrot.slane %v3761_v5, %v6806_v36  ;;  %v4351_v57 = vrot.slane %v3901_v13, %v6803_v43 }
 0x41d   : > { %v6843_v38 = vsel %vm4085_vm3, %v4184_v21, %v4180_v51  ;;  %v6900_v21 = vsub.s32 %v4087_v7, %v6792_v49 }
 0x41e   : > { %v3965_v56 = vpop.xlane.xlu0 %3964  ;;  %v3889_v3 = vpop.xlane.xlu1 %3888 }
 0x41f   : > { %v4336_v55 = vrot.slane %v3889_v3, %v6806_v36  ;;  %v4427_v16 = vrot.slane %v3965_v56, %v6803_v43  ;;  %v4446_v56 = vrot.slane %v6799_v41, %v6803_v43 }
 0x421   : > { %v6848_v39 = vsel %vm4085_vm3, %v4336_v55, %v4332_v24 }
 0x422   : > { %v3789_v19 = vpop.xlane.xlu0 %3788  ;;  %v3937_v22 = vpop.xlane.xlu1 %3936 }
 0x423   : > { %v4393_v46 = vrot.slane %v3937_v22, %v6806_v36  ;;  %v4218_v11 = vrot.slane %v3789_v19, %v6803_v43 }
 0x425   : > { %v6853_v50 = vsel %vm4085_vm3, %v4393_v46, %v4389_v63 }
 0x426   : > { %v3917_v58 = vpop.xlane.xlu0 %3916  ;;  %v3953_v62 = vpop.xlane.xlu1 %3952 }
 0x427   : > { %v4412_v61 = vrot.slane %v3953_v62, %v6806_v36  ;;  %v4370_v10 = vrot.slane %v3917_v58, %v6803_v43 }
 0x429   : > { %v6858_v47 = vsel %vm4085_vm3, %v4412_v61, %v4408_v25 }
 0x42a   : > { %v3681_v35 = vpop.xlane.xlu0 %3680  ;;  %v3777_v2 = vpop.xlane.xlu1 %3776 }
 0x42b   : > { %v4084_v0 = vrot.slane %v3681_v35, %v6806_v36  ;;  %v4203_v8 = vrot.slane %v3777_v2, %v6806_v36 }
 0x42d   : > { %v4086_v45 = vsel %vm4085_vm3, %v4084_v0, %v4079_v20  ;;  %v6867_v37 = vsel %vm4085_vm3, %v4203_v8, %v4199_v30 }
 0x42e   : > { %v3713_v44 = vpop.xlane.xlu0 %3712  ;;  %v3905_v12 = vpop.xlane.xlu1 %3904 }
 0x42f   : > { %v4127_v52 = vrot.slane %v3713_v44, %v6806_v36  ;;  %v4355_v32 = vrot.slane %v3905_v12, %v6806_v36 }
 0x431   : > { %v6875_v40 = vsel %vm4085_vm3, %v4127_v52, %v4123_v54  ;;  %v6878_v31 = vsel %vm4085_vm3, %v4355_v32, %v4351_v57 }
 0x432   : > { %v3841_v34 = vpop.xlane.xlu0 %3840  ;;  %v3969_v26 = vpop.xlane.xlu1 %3968 }
 0x433   : > { %v4279_v4 = vrot.slane %v3841_v34, %v6806_v36  ;;  %v4431_v48 = vrot.slane %v3969_v26, %v6806_v36 }
 0x435   : > { %v4280_v42 = vsel %vm4085_vm3, %v4279_v4, %v4275_v23  ;;  %v6887_v15 = vsel %vm4085_vm3, %v4431_v48, %v4427_v16  ;;  %v4094_v4 = vadd.s32 4294967272, %v6780_v9 }
 0x436   : > { %v3729_v1 = vpop.xlane.xlu0 %3728  ;;  %v3793_v33 = vpop.xlane.xlu1 %3792 }
 0x437   : > { %v4146_v59 = vrot.slane %v3729_v1, %v6806_v36  ;;  %v4222_v53 = vrot.slane %v3793_v33, %v6806_v36  ;;  %v6946_v1 = vsub.s32 %v4094_v4, %v6792_v49 }
 0x439   : > { %v4147_v60 = vsel %vm4085_vm3, %v4146_v59, %v4142_v27  ;;  %v6897_v13 = vsel %vm4085_vm3, %v4222_v53, %v4218_v11 }
 0x43a   : > { %v3985_v5 = vpop.xlane.xlu0 %3984  ;;  %v3921_v51 = vpop.xlane.xlu1 %3920 }
 0x43b   : > { %v4450_v3 = vrot.slane %v3985_v5, %v6806_v36  ;;  %v4374_v24 = vrot.slane %v3921_v51, %v6806_v36 }
 0x43d   : > { %v6908_v55 = vsel %vm4085_vm3, %v4450_v3, %v4446_v56  ;;  %v6911_v19 = vsel %vm4085_vm3, %v4374_v24, %v4370_v10 }
 0x43e   : > { %v3685_v22 = vpop.xlane.xlu0 %3684  ;;  %v3813_v63 = vpop.xlane.xlu1 %3812 }
 0x43f   : > { %v4091_v46 = vrot.slane %v3685_v22, %v6900_v21  ;;  %v4246_v62 = vrot.slane %v3813_v63, %v6900_v21 }
 0x441   : > { %v4093_v41 = vsel %vm4092_vm4, %v4091_v46, %v4086_v45  ;;  %v4247_v43 = vsel %vm4092_vm4, %v4246_v62, %v6818_v28 }
 0x442   : > { %v3701_v58 = vpop.xlane.xlu0 %3700  ;;  %v3845_v36 = vpop.xlane.xlu1 %3844 }
 0x443   : > { %v4284_v25 = vrot.slane %v3845_v36, %v6900_v21  ;;  %v4113_v33 = vrot.slane %v3701_v58, %v6900_v21 }
 0x445   : > { %v4285_v61 = vsel %vm4092_vm4, %v4284_v25, %v4280_v42  ;;  %v4114_v51 = vsel %vm4092_vm4, %v4113_v33, %v6812_v29 }
 0x446   : > { %v3829_v35 = vpop.xlane.xlu0 %3828  ;;  %v3733_v2 = vpop.xlane.xlu1 %3732 }
 0x447   : > { %v4151_v7 = vrot.slane %v3733_v2, %v6900_v21  ;;  %v4265_v56 = vrot.slane %v3829_v35, %v6900_v21 }
 0x449   : > { %v4152_v10 = vsel %vm4092_vm4, %v4151_v7, %v4147_v60  ;;  %v4266_v2 = vsel %vm4092_vm4, %v4265_v56, %v6823_v17 }
 0x44a   : > { %v3717_v20 = vpop.xlane.xlu0 %3716  ;;  %v3861_v30 = vpop.xlane.xlu1 %3860 }
 0x44b   : > { %v4132_v27 = vrot.slane %v3717_v20, %v6900_v21  ;;  %v4303_v46 = vrot.slane %v3861_v30, %v6900_v21 }
 0x44d   : > { %v4133_v3 = vsel %vm4092_vm4, %v4132_v27, %v6875_v40  ;;  %v4304_v4 = vsel %vm4092_vm4, %v4303_v46, %v6828_v18 }
 0x44e   : > { %v6920_v0 = vpop.xlane.xlu0 %3940  ;;  %v6922_v8 = vpop.xlane.xlu1 %3748 }
 0x44f   : > { %v4170_v20 = vrot.slane %v6922_v8, %v6900_v21 }
 0x452   : > { %v6924_v44 = vpop.xlane.xlu0 %3972  ;;  %v6926_v45 = vpop.xlane.xlu1 %3876 }
 0x456   : > { %v6928_v12 = vpop.xlane.xlu0 %3796  ;;  %v6930_v28 = vpop.xlane.xlu1 %3764 }
 0x45a   : > { %v6932_v54 = vpop.xlane.xlu0 %3924  ;;  %v6934_v57 = vpop.xlane.xlu1 %3892 }
 0x45e   : > { %v6936_v52 = vpop.xlane.xlu0 %3988  ;;  %v6938_v32 = vpop.xlane.xlu1 %3956 }
 0x462   : > { %v3833_v34 = vpop.xlane.xlu0 %3832  ;;  %v6940_v26 = vpop.xlane.xlu1 %3780 }
 0x463   : > { %v4270_v24 = vrot.slane %v3833_v34, %v6946_v1 }
 0x465   : > { %v4271_v34 = vsel %vm4099_vm5, %v4270_v24, %v4266_v2 }
 0x466   : > { %v3721_v23 = vpop.xlane.xlu0 %3720  ;;  %v6942_v16 = vpop.xlane.xlu1 %3908 }
 0x467   : > { %v4137_v59 = vrot.slane %v3721_v23, %v6946_v1 }
 0x469   : > { %v4138_v62 = vsel %vm4099_vm5, %v4137_v59, %v4133_v3 }
 0x46a   : > { %v3849_v48 = vpop.xlane.xlu0 %3848  ;;  %v3689_v42 = vpop.xlane.xlu1 %3688 }
 0x46b   : > { %v4098_v11 = vrot.slane %v3689_v42, %v6946_v1  ;;  %v4289_v29 = vrot.slane %v3849_v48, %v6946_v1 }
 0x46d   : > { %v4100_v22 = vsel %vm4099_vm5, %v4098_v11, %v4093_v41  ;;  %v4290_v48 = vsel %vm4099_vm5, %v4289_v29, %v4285_v61  ;;  %v4171_v11 = vsel %vm4092_vm4, %v4170_v20, %v6833_v6  ;;  %v4208_v6 = vrot.slane %v6940_v26, %v6900_v21 }
 0x46e   : > { %v3737_v53 = vpop.xlane.xlu0 %3736  ;;  %v3705_v5 = vpop.xlane.xlu1 %3704  ;;  %v4360_v26 = vrot.slane %v6942_v16, %v6900_v21  ;;  %v4227_v16 = vrot.slane %v6928_v12, %v6900_v21 }
 0x46f   : > { %v4156_v9 = vrot.slane %v3737_v53, %v6946_v1  ;;  %v4118_v49 = vrot.slane %v3705_v5, %v6946_v1 }
 0x471   : > { %v4119_v63 = vsel %vm4099_vm5, %v4118_v49, %v4114_v51  ;;  %v4157_v25 = vsel %vm4099_vm5, %v4156_v9, %v4152_v10  ;;  %v4189_v51 = vrot.slane %v6930_v28, %v6900_v21  ;;  %v4209_v28 = vsel %vm4092_vm4, %v4208_v6, %v6867_v37  ;;  %v4501_v6 = vld [vmem:[%s7089_s6 + $0x10] sm:$0xf] }
 0x472   : > { %v4463_v58 = vsel %vm4462_vm6, %v4119_v63, %v4100_v22  ;;  %v3865_v36 = vpop.xlane.xlu0 %3864  ;;  %v3817_v60 = vpop.xlane.xlu1 %3816 }
 0x473   : > { %v4465_v40 = vsel %vm4464_vm7, %v4138_v62, %v4463_v58  ;;  %v4308_v35 = vrot.slane %v3865_v36, %v6946_v1  ;;  %v4251_v41 = vrot.slane %v3817_v60, %v6946_v1  ;;  %v4190_v63 = vsel %vm4092_vm4, %v4189_v51, %v6843_v38 }
 0x474   : > { %v4467_v30 = vsel %vm4466_vm8, %v4157_v25, %v4465_v40  ;;  %v4417_v40 = vrot.slane %v6938_v32, %v6900_v21 }
 0x475   : > { %v4252_v23 = vsel %vm4099_vm5, %v4251_v41, %v4247_v43  ;;  %v4309_v17 = vsel %vm4099_vm5, %v4308_v35, %v4304_v4  ;;  %v4322_v43 = vrot.slane %v6926_v45, %v6900_v21  ;;  %v4436_v35 = vrot.slane %v6924_v44, %v6900_v21 }
 0x476   : > { %v4476_v42 = vsel %vm4462_vm6, %v4271_v34, %v4252_v23  ;;  %v3753_v33 = vpop.xlane.xlu0 %3752  ;;  %v3961_v7 = vpop.xlane.xlu1 %3960  ;;  %v4361_v41 = vsel %vm4092_vm4, %v4360_v26, %v6878_v31  ;;  %v4228_v4 = vsel %vm4092_vm4, %v4227_v16, %v6897_v13 }
 0x477   : > { %v4477_v27 = vsel %vm4464_vm7, %v4290_v48, %v4476_v42  ;;  %v4175_v8 = vrot.slane %v3753_v33, %v6946_v1  ;;  %v4323_v49 = vsel %vm4092_vm4, %v4322_v43, %v6838_v14  ;;  %v4341_v14 = vrot.slane %v6934_v57, %v6900_v21 }
 0x478   : > { %v4478_v18 = vsel %vm4466_vm8, %v4309_v17, %v4477_v27  ;;  %v4398_v57 = vrot.slane %v6920_v0, %v6900_v21  ;;  %v4422_v0 = vrot.slane %v3961_v7, %v6946_v1  ;;  %v4379_v48 = vrot.slane %v6932_v54, %v6900_v21 }
 0x479   : > { %v4176_v61 = vsel %vm4099_vm5, %v4175_v8, %v4171_v11  ;;  %v4342_v25 = vsel %vm4092_vm4, %v4341_v14, %v6848_v39  ;;  %v4455_v42 = vrot.slane %v6936_v52, %v6900_v21  ;;  %v4418_v33 = vsel %vm4092_vm4, %v4417_v40, %v6858_v47 }
 0x47a   : > { %v4469_v59 = vsel %vm4468_vm9, %v4176_v61, %v4467_v30  ;;  %v3881_v53 = vpop.xlane.xlu0 %3880  ;;  %v3785_v5 = vpop.xlane.xlu1 %3784  ;;  %v4399_v32 = vsel %vm4092_vm4, %v4398_v57, %v6853_v50  ;;  %v4437_v50 = vsel %vm4092_vm4, %v4436_v35, %v6887_v15  ;;  %v4423_v7 = vsel %vm4099_vm5, %v4422_v0, %v4418_v33 }
 0x47b   : > { %v4327_v9 = vrot.slane %v3881_v53, %v6946_v1  ;;  %v4213_v10 = vrot.slane %v3785_v5, %v6946_v1  ;;  %v4456_v61 = vsel %vm4092_vm4, %v4455_v42, %v6908_v55 }
 0x47d   : > { %v4328_v45 = vsel %vm4099_vm5, %v4327_v9, %v4323_v49  ;;  %v4214_v62 = vsel %vm4099_vm5, %v4213_v10, %v4209_v28 }
 0x47e   : > { %v4479_v56 = vsel %vm4468_vm9, %v4328_v45, %v4478_v18  ;;  %v3769_v3 = vpop.xlane.xlu0 %3768  ;;  %v3913_v24 = vpop.xlane.xlu1 %3912  ;;  %v4380_v18 = vsel %vm4092_vm4, %v4379_v48, %v6911_v19  ;;  %v4499_v19 = vld [vmem:[%s7089_s6] sm:$0xff]  ;;  %v4500_v45 = vld [vmem:[%s7089_s6 + $0x8] sm:$0xff] }
 0x47f   : > { %v4194_v22 = vrot.slane %v3769_v3, %v6946_v1  ;;  %v4365_v29 = vrot.slane %v3913_v24, %v6946_v1 }
 0x481   : > { %v4195_v46 = vsel %vm4099_vm5, %v4194_v22, %v4190_v63  ;;  %v4366_v20 = vsel %vm4099_vm5, %v4365_v29, %v4361_v41 }
 0x482   : > { %v3897_v58 = vpop.xlane.xlu0 %3896  ;;  %v3977_v36 = vpop.xlane.xlu1 %3976  ;;  %v4471_v38 = vsel %vm4470_vm10, %v4195_v46, %v4469_v59 }
 0x483   : > { %v4346_v60 = vrot.slane %v3897_v58, %v6946_v1  ;;  %v4473_v37 = vsel %vm4472_vm11, %v4214_v62, %v4471_v38  ;;  %v4441_v12 = vrot.slane %v3977_v36, %v6946_v1 }
 0x485   : > { %v4347_v2 = vsel %vm4099_vm5, %v4346_v60, %v4342_v25  ;;  %v4442_v13 = vsel %vm4099_vm5, %v4441_v12, %v4437_v50 }
 0x486   : > { %v3945_v30 = vpop.xlane.xlu0 %3944  ;;  %v3801_v34 = vpop.xlane.xlu1 %3800  ;;  %v4480_v39 = vsel %vm4470_vm10, %v4347_v2, %v4479_v56 }
 0x487   : > { %v4403_v44 = vrot.slane %v3945_v30, %v6946_v1  ;;  %v4232_v31 = vrot.slane %v3801_v34, %v6946_v1  ;;  %v4481_v23 = vsel %vm4472_vm11, %v4366_v20, %v4480_v39 }
 0x489   : > { %v4404_v17 = vsel %vm4099_vm5, %v4403_v44, %v4399_v32  ;;  %v4233_v27 = vsel %vm4099_vm5, %v4232_v31, %v4228_v4 }
 0x48a   : > { %v3929_v8 = vpop.xlane.xlu0 %3928  ;;  %v3993_v11 = vpop.xlane.xlu1 %3992  ;;  %v4475_v54 = vsel %vm4474_vm12, %v4233_v27, %v4473_v37  ;;  %v4483_v21 = vsel %vm4462_vm6, %v4423_v7, %v4404_v17 }
 0x48b   : > { %v4384_v52 = vrot.slane %v3929_v8, %v6946_v1  ;;  %v4460_v47 = vrot.slane %v3993_v11, %v6946_v1  ;;  %v4489_v15 = vsel %vm404_vm2, %v4475_v54, 0.0  ;;  %v4484_v43 = vsel %vm4464_vm7, %v4442_v13, %v4483_v21 }
 0x48c   : > { %4490 = vadd.xlane.f32.xlu0 %v4489_v15 }
 0x48d   : > { %v4385_v59 = vsel %vm4099_vm5, %v4384_v52, %v4380_v18  ;;  %v4461_v53 = vsel %vm4099_vm5, %v4460_v47, %v4456_v61 }
 0x48e   : > { %v4482_v5 = vsel %vm4474_vm12, %v4385_v59, %v4481_v23  ;;  %v4485_v1 = vsel %vm4466_vm8, %v4461_v53, %v4484_v43 }
 0x48f   : > { %v4492_v9 = vsel %vm404_vm2, %v4482_v5, 0.0  ;;  %v4496_v49 = vsel %vm4495_vm13, %v4485_v1, 0.0 }
 0x490   : > { %4493 = vadd.xlane.f32.xlu1 %v4492_v9  ;;  %4497 = vadd.xlane.f32.xlu0 %v4496_v49 }
 0x515   : > { %v4491_v55 = vpop.xlane.xlu0 %4490 }
 0x516   : > { %v4502_v51 = vadd.f32 %v4499_v19, %v4491_v55 }
 0x518   : > { %v4505_v56 = vmul.f32 0.01, %v4502_v51 }
 0x519   : > { %v4498_v10 = vpop.xlane.xlu0 %4497  ;;  %v4494_v3 = vpop.xlane.xlu1 %4493 }
 0x51a   : > { %v4508_v24 = vmax.f32 %v4502_v51, %v4505_v56  ;;  %v4504_v22 = vadd.f32 %v4501_v6, %v4498_v10  ;;  %v4503_v63 = vadd.f32 %v4500_v45, %v4494_v3 }
 0x51c   : > { %4512 = vst.msk [vmem:[%s278_s8] sm:$0xff] %vm4511_vm14, %v4508_v24  ;;  %v4507_v14 = vmul.f32 0.01, %v4504_v22  ;;  %v4506_v28 = vmul.f32 0.01, %v4503_v63 }
 0x51e   : > { %v4510_v26 = vmax.f32 %v4504_v22, %v4507_v14  ;;  %v4509_v46 = vmax.f32 %v4503_v63, %v4506_v28 }
 0x520   : > { %4515 = vst.msk [vmem:[%s278_s8 + $0x10] sm:$0xf] %vm4514_vm15, %v4510_v26 }
 0x521   : > { %4513 = vst.msk [vmem:[%s278_s8 + $0x8] sm:$0xff] %vm4511_vm14, %v4509_v46 }
 0x522 PF: > { %s17_s24 = sadd.s32 1, %s4738_s24  }
 0x523   : > { %p14_p4 = scmp.ge.s32.totalorder %s17_s24, 4  }
 0x525   :  { %16 = sbr.rel (!%p14_p4) target bundleno = 1 (0x1), region = 96 }

</bundles_post_ra>
